<compile_context>
chip_gen: v5e
topology: v5e:2x2
jax: 0.10.0
libtpu: 0.0.40
codegen_flags: <defaults>
</compile_context>

<pallas_src>
import functools

import jax
import jax.numpy as jnp
from jax.experimental import pallas as pl
from jax.experimental.pallas import tpu as pltpu


# ----------------------------------------------------------------------------
# Fused CBAM kernel on a (Bt, C, H*W) lane-dense block.
#   ChannelGate: avg/max pool over HW -> shared MLP -> sigmoid -> scale
#   SpatialGate: channel max/mean pool -> 7x7 conv (pad=3) -> sigmoid -> scale
# ----------------------------------------------------------------------------
def cbam_kernel(x_ref, w1t_ref, b1_ref, w2_ref, b2_ref, cw_ref, o_ref, *, H, W):
    Bt, C, HW = x_ref.shape
    inv_hw = 1.0 / float(HW)
    inv_c = 1.0 / float(C)
    P = 3 * W + 3  # max |flat shift| of a 7x7 tap == left/right zero-pad width

    w1t = w1t_ref[...]      # (C, hidden)
    b1 = b1_ref[...]        # (1, hidden)
    w2 = w2_ref[...]        # (C, hidden)
    b2 = b2_ref[...]        # (C, 1)

    # ------------------- per-batch ChannelGate + channel pool -------------------
    # 2-D (C, HW) ops per batch element keep reductions on well-trodden layouts;
    # the per-batch pooled rows are then stacked so the expensive 7x7 tap loop
    # below runs once for all Bt batch elements.
    scale_c_list = []
    ch_max_rows = []
    ch_mean_rows = []
    for bt in range(Bt):
        x = x_ref[bt]                                           # (C, HW)

        avg_p = jnp.sum(x, axis=1, keepdims=True) * inv_hw      # (C, 1)
        max_p = jnp.max(x, axis=1, keepdims=True)               # (C, 1)

        def mlp(p):  # (C, 1) -> (C, 1); tiny, so VPU mul + reduce (no MXU)
            z1 = jnp.sum(w1t * p, axis=0, keepdims=True) + b1   # (1, hidden)
            z1 = jnp.maximum(z1, 0.0)
            return jnp.sum(w2 * z1, axis=1, keepdims=True) + b2  # (C, 1)

        scale_c = jax.nn.sigmoid(mlp(avg_p) + mlp(max_p))       # (C, 1)
        scale_c_list.append(scale_c)

        x_cg = x * scale_c                                      # (C, HW)
        ch_max_rows.append(jnp.max(x_cg, axis=0, keepdims=True))            # (1, HW)
        ch_mean_rows.append(jnp.sum(x_cg, axis=0, keepdims=True) * inv_c)   # (1, HW)

    if Bt > 1:
        ch_max = jnp.concatenate(ch_max_rows, axis=0)           # (Bt, HW)
        ch_mean = jnp.concatenate(ch_mean_rows, axis=0)         # (Bt, HW)
    else:
        ch_max, ch_mean = ch_max_rows[0], ch_mean_rows[0]

    # ------------- 7x7 conv (pad=3, no bias) directly in flat layout -------------
    # Zero-padded wide copies + 49 static lane-offset slices.  A per-dx
    # column-validity mask handles the row-major wrap at W borders; applied
    # once per dx column (after summing over dy) instead of once per tap.
    zpad = jnp.zeros((Bt, P), jnp.float32)
    max_wide = jnp.concatenate([zpad, ch_max, zpad], axis=1)    # (Bt, HW + 2P)
    mean_wide = jnp.concatenate([zpad, ch_mean, zpad], axis=1)  # (Bt, HW + 2P)

    col = jax.lax.broadcasted_iota(jnp.int32, (1, HW), 1) % W   # flat col index

    acc = jnp.zeros((Bt, HW), jnp.float32)
    for dx in range(7):
        ox = dx - 3
        acc_dx = jnp.zeros((Bt, HW), jnp.float32)
        for dy in range(7):
            s = (dy - 3) * W + ox                               # flat tap shift
            sm = max_wide[:, P + s:P + s + HW]                  # (Bt, HW)
            se = mean_wide[:, P + s:P + s + HW]                 # (Bt, HW)
            w_max = cw_ref[dy * 7 + dx]                         # scalar (SMEM)
            w_mean = cw_ref[49 + dy * 7 + dx]
            acc_dx = acc_dx + w_max * sm + w_mean * se
        if ox == 0:
            acc = acc + acc_dx                                  # center column: no wrap
        else:
            mask = jnp.logical_and(col + ox >= 0, col + ox < W)
            acc = acc + jnp.where(mask, acc_dx, 0.0)

    scale_s = jax.nn.sigmoid(acc)                               # (Bt, HW)

    # --------------------------- fused output store ---------------------------
    # Re-read x from VMEM instead of keeping Bt full-size x_cg values live
    # across the tap loop; the store is lane-dense (last dim = HW).
    for bt in range(Bt):
        o_ref[bt] = (x_ref[bt] * scale_c_list[bt]
                     * scale_s[bt:bt + 1, :]).astype(o_ref.dtype)


# ----------------------------------------------------------------------------
# Wrapper
# ----------------------------------------------------------------------------
def cbam_pallas(x, w1, b1, w2, b2, conv_w):
    """x: (B, C, H, W) float32. Parameters use PyTorch shapes:
       w1 (hidden, C), b1 (hidden,), w2 (C, hidden), b2 (C,), conv_w (1, 2, 7, 7)."""
    B, C, H, W = x.shape
    hidden = w1.shape[0]
    HW = H * W

    x_flat = x.reshape(B, C, HW)              # free bitcast; lane-dense layout
    w1t = jnp.transpose(w1)                   # (C, hidden)
    b1r = b1.reshape(1, hidden)
    b2r = b2.reshape(C, 1)
    cw_flat = conv_w.reshape(-1).astype(jnp.float32)   # (98,) [max-plane | mean-plane]

    # Batch elements per grid step: fill sublanes in the tap loop and enlarge
    # DMA blocks (target ~2 MiB input block), bounded to limit in-kernel
    # unrolling; must divide B exactly.
    per_b = C * HW * 4
    bt_cap = max(1, min(B, 8, (2 << 20) // max(per_b, 1)))
    Bt = 1
    for d in range(1, bt_cap + 1):
        if B % d == 0:
            Bt = d
    nb = B // Bt

    # Raise the scoped VMEM limit only when the working set needs it
    # (defaults are ~16 MiB on v5e, ~32 MiB on v6e/v7x).
    est_vmem = (4 * Bt + 2) * per_b            # dbl-buffered in/out + temps
    cp_kwargs = dict(dimension_semantics=("parallel",))
    if est_vmem > 12 * 1024 * 1024:
        cp_kwargs["vmem_limit_bytes"] = int(min(est_vmem + (8 << 20), 96 << 20))

    out_flat = pl.pallas_call(
        functools.partial(cbam_kernel, H=H, W=W),
        out_shape=jax.ShapeDtypeStruct((B, C, HW), x.dtype),
        grid_spec=pltpu.PrefetchScalarGridSpec(
            num_scalar_prefetch=0,
            grid=(nb,),
            in_specs=[
                pl.BlockSpec((Bt, C, HW), lambda b: (b, 0, 0)),
                pl.BlockSpec((C, hidden), lambda b: (0, 0)),
                pl.BlockSpec((1, hidden), lambda b: (0, 0)),
                pl.BlockSpec((C, hidden), lambda b: (0, 0)),
                pl.BlockSpec((C, 1), lambda b: (0, 0)),
                pl.BlockSpec(memory_space=pltpu.MemorySpace.SMEM),
            ],
            out_specs=pl.BlockSpec((Bt, C, HW), lambda b: (b, 0, 0)),
        ),
        compiler_params=pltpu.CompilerParams(**cp_kwargs),
    )(x_flat, w1t, b1r, w2, b2r, cw_flat)

    return out_flat.reshape(B, C, H, W)


# ----------------------------------------------------------------------------
# Pure-JAX reference (for correctness check)
# ----------------------------------------------------------------------------
def cbam_ref(x, w1, b1, w2, b2, conv_w):
    avg = x.mean(axis=(2, 3))          # (B, C)
    mx = x.max(axis=(2, 3))            # (B, C)

    def mlp(p):
        h = jnp.maximum(p @ w1.T + b1, 0.0)
        return h @ w2.T + b2

    att = mlp(avg) + mlp(mx)
    scale_c = jax.nn.sigmoid(att)[:, :, None, None]
    x_cg = x * scale_c

    cmax = x_cg.max(axis=1, keepdims=True)
    cmean = x_cg.mean(axis=1, keepdims=True)
    cp = jnp.concatenate([cmax, cmean], axis=1)    # (B, 2, H, W)
    conv = jax.lax.conv_general_dilated(
        cp, conv_w, window_strides=(1, 1), padding=((3, 3), (3, 3)),
        dimension_numbers=("NCHW", "OIHW", "NCHW"))
    scale_s = jax.nn.sigmoid(conv)                 # (B, 1, H, W)
    return x_cg * scale_s


if __name__ == "__main__":
    B, C, H, W = 2, 32, 16, 16
    reduction_ratio = 16
    hidden = C // reduction_ratio  # 2

    key = jax.random.PRNGKey(0)
    k1, k2, k3, k4, k5, kx = jax.random.split(key, 6)
    w1 = jax.random.normal(k1, (hidden, C), jnp.float32) * 0.1
    b1 = jax.random.normal(k2, (hidden,), jnp.float32) * 0.1
    w2 = jax.random.normal(k3, (C, hidden), jnp.float32) * 0.1
    b2 = jax.random.normal(k4, (C,), jnp.float32) * 0.1
    conv_w = jax.random.normal(k5, (1, 2, 7, 7), jnp.float32) * 0.1
    x = jax.random.normal(kx, (B, C, H, W), jnp.float32)

    out = cbam_pallas(x, w1, b1, w2, b2, conv_w)
    out = jax.block_until_ready(out)

    ref = jax.block_until_ready(cbam_ref(x, w1, b1, w2, b2, conv_w))
    assert out.shape == (B, C, H, W)
    assert jnp.allclose(out, ref, rtol=1e-4, atol=1e-4), (
        f"max abs err = {jnp.max(jnp.abs(out - ref))}")

    print("KERNEL_OK")
</pallas_src>

<mosaic_0001>
module attributes {stable_mosaic.version = 11 : i64} {
  func.func @cbam_kernel(%arg0: i32, %arg1: memref<2x32x256xf32, #tpu.memory_space<vmem>>, %arg2: memref<32x2xf32, #tpu.memory_space<vmem>>, %arg3: memref<1x2xf32, #tpu.memory_space<vmem>>, %arg4: memref<32x2xf32, #tpu.memory_space<vmem>>, %arg5: memref<32x1xf32, #tpu.memory_space<vmem>>, %arg6: memref<98xf32, #tpu.memory_space<smem>>, %arg7: memref<2x32x256xf32, #tpu.memory_space<vmem>>) attributes {dimension_semantics = [#tpu.dimension_semantics<parallel>], iteration_bounds = array<i64: 1>, scalar_prefetch = 0 : i64, scratch_operands = 0 : i64, tpu.core_type = #tpu.core_type<tc>, window_params = [{transform_indices = @transform_0, window_bounds = array<i64: 2, 32, 256>}, {pipeline_mode = #tpu.pipeline_mode<synchronous>, transform_indices = @transform_1, window_bounds = array<i64: 32, 2>}, {pipeline_mode = #tpu.pipeline_mode<synchronous>, transform_indices = @transform_2, window_bounds = array<i64: 1, 2>}, {pipeline_mode = #tpu.pipeline_mode<synchronous>, transform_indices = @transform_3, window_bounds = array<i64: 32, 2>}, {pipeline_mode = #tpu.pipeline_mode<synchronous>, transform_indices = @transform_4, window_bounds = array<i64: 32, 1>}, {transform_indices = @transform_5, window_bounds = array<i64: 98>}, {transform_indices = @transform_6, window_bounds = array<i64: 2, 32, 256>}]} {
    %c0 = arith.constant 0 : index
    %c0_0 = arith.constant 0 : index
    %0 = vector.load %arg2[%c0, %c0_0] : memref<32x2xf32, #tpu.memory_space<vmem>>, vector<32x2xf32>
    %c0_1 = arith.constant 0 : index
    %c0_2 = arith.constant 0 : index
    %1 = vector.load %arg3[%c0_1, %c0_2] : memref<1x2xf32, #tpu.memory_space<vmem>>, vector<1x2xf32>
    %c0_3 = arith.constant 0 : index
    %c0_4 = arith.constant 0 : index
    %2 = vector.load %arg4[%c0_3, %c0_4] : memref<32x2xf32, #tpu.memory_space<vmem>>, vector<32x2xf32>
    %c0_5 = arith.constant 0 : index
    %c0_6 = arith.constant 0 : index
    %3 = vector.load %arg5[%c0_5, %c0_6] : memref<32x1xf32, #tpu.memory_space<vmem>>, vector<32x1xf32>
    %c0_7 = arith.constant 0 : index
    %c0_8 = arith.constant 0 : index
    %c0_9 = arith.constant 0 : index
    %4 = vector.load %arg1[%c0_7, %c0_8, %c0_9] : memref<2x32x256xf32, #tpu.memory_space<vmem>>, vector<1x32x256xf32>
    %5 = vector.shape_cast %4 : vector<1x32x256xf32> to vector<32x256xf32>
    %cst = arith.constant dense<0.000000e+00> : vector<32xf32>
    %6 = vector.multi_reduction <add>, %5, %cst [1] : vector<32x256xf32> to vector<32xf32>
    %7 = vector.shape_cast %6 : vector<32xf32> to vector<32x1xf32>
    %cst_10 = arith.constant 3.906250e-03 : f32
    %8 = vector.broadcast %cst_10 : f32 to vector<32x1xf32>
    %9 = arith.mulf %7, %8 : vector<32x1xf32>
    %cst_11 = arith.constant dense<0xFF800000> : vector<32xf32>
    %10 = vector.multi_reduction <maximumf>, %5, %cst_11 [1] : vector<32x256xf32> to vector<32xf32>
    %11 = vector.shape_cast %10 : vector<32xf32> to vector<32x1xf32>
    %12 = vector.broadcast %9 : vector<32x1xf32> to vector<32x2xf32>
    %13 = arith.mulf %0, %12 : vector<32x2xf32>
    %cst_12 = arith.constant dense<0.000000e+00> : vector<2xf32>
    %14 = vector.multi_reduction <add>, %13, %cst_12 [0] : vector<32x2xf32> to vector<2xf32>
    %15 = vector.shape_cast %14 : vector<2xf32> to vector<1x2xf32>
    %16 = arith.addf %15, %1 : vector<1x2xf32>
    %cst_13 = arith.constant 0.000000e+00 : f32
    %17 = vector.broadcast %cst_13 : f32 to vector<1x2xf32>
    %18 = arith.maximumf %16, %17 : vector<1x2xf32>
    %19 = vector.broadcast %18 : vector<1x2xf32> to vector<32x2xf32>
    %20 = arith.mulf %2, %19 : vector<32x2xf32>
    %cst_14 = arith.constant dense<0.000000e+00> : vector<32xf32>
    %21 = vector.multi_reduction <add>, %20, %cst_14 [1] : vector<32x2xf32> to vector<32xf32>
    %22 = vector.shape_cast %21 : vector<32xf32> to vector<32x1xf32>
    %23 = arith.addf %22, %3 : vector<32x1xf32>
    %24 = vector.broadcast %11 : vector<32x1xf32> to vector<32x2xf32>
    %25 = arith.mulf %0, %24 : vector<32x2xf32>
    %cst_15 = arith.constant dense<0.000000e+00> : vector<2xf32>
    %26 = vector.multi_reduction <add>, %25, %cst_15 [0] : vector<32x2xf32> to vector<2xf32>
    %27 = vector.shape_cast %26 : vector<2xf32> to vector<1x2xf32>
    %28 = arith.addf %27, %1 : vector<1x2xf32>
    %cst_16 = arith.constant 0.000000e+00 : f32
    %29 = vector.broadcast %cst_16 : f32 to vector<1x2xf32>
    %30 = arith.maximumf %28, %29 : vector<1x2xf32>
    %31 = vector.broadcast %30 : vector<1x2xf32> to vector<32x2xf32>
    %32 = arith.mulf %2, %31 : vector<32x2xf32>
    %cst_17 = arith.constant dense<0.000000e+00> : vector<32xf32>
    %33 = vector.multi_reduction <add>, %32, %cst_17 [1] : vector<32x2xf32> to vector<32xf32>
    %34 = vector.shape_cast %33 : vector<32xf32> to vector<32x1xf32>
    %35 = arith.addf %34, %3 : vector<32x1xf32>
    %36 = arith.addf %23, %35 : vector<32x1xf32>
    %37 = arith.negf %36 : vector<32x1xf32>
    %38 = math.exp %37 : vector<32x1xf32>
    %cst_18 = arith.constant 1.000000e+00 : f32
    %39 = vector.broadcast %cst_18 : f32 to vector<32x1xf32>
    %40 = arith.addf %39, %38 : vector<32x1xf32>
    %41 = arith.divf %39, %40 : vector<32x1xf32>
    %42 = vector.broadcast %41 : vector<32x1xf32> to vector<32x256xf32>
    %43 = arith.mulf %5, %42 : vector<32x256xf32>
    %cst_19 = arith.constant dense<0xFF800000> : vector<256xf32>
    %44 = vector.multi_reduction <maximumf>, %43, %cst_19 [0] : vector<32x256xf32> to vector<256xf32>
    %45 = vector.shape_cast %44 : vector<256xf32> to vector<1x256xf32>
    %cst_20 = arith.constant dense<0.000000e+00> : vector<256xf32>
    %46 = vector.multi_reduction <add>, %43, %cst_20 [0] : vector<32x256xf32> to vector<256xf32>
    %47 = vector.shape_cast %46 : vector<256xf32> to vector<1x256xf32>
    %cst_21 = arith.constant 3.125000e-02 : f32
    %48 = vector.broadcast %cst_21 : f32 to vector<1x256xf32>
    %49 = arith.mulf %47, %48 : vector<1x256xf32>
    %c1 = arith.constant 1 : index
    %c0_22 = arith.constant 0 : index
    %c0_23 = arith.constant 0 : index
    %50 = vector.load %arg1[%c1, %c0_22, %c0_23] : memref<2x32x256xf32, #tpu.memory_space<vmem>>, vector<1x32x256xf32>
    %51 = vector.shape_cast %50 : vector<1x32x256xf32> to vector<32x256xf32>
    %cst_24 = arith.constant dense<0.000000e+00> : vector<32xf32>
    %52 = vector.multi_reduction <add>, %51, %cst_24 [1] : vector<32x256xf32> to vector<32xf32>
    %53 = vector.shape_cast %52 : vector<32xf32> to vector<32x1xf32>
    %cst_25 = arith.constant 3.906250e-03 : f32
    %54 = vector.broadcast %cst_25 : f32 to vector<32x1xf32>
    %55 = arith.mulf %53, %54 : vector<32x1xf32>
    %cst_26 = arith.constant dense<0xFF800000> : vector<32xf32>
    %56 = vector.multi_reduction <maximumf>, %51, %cst_26 [1] : vector<32x256xf32> to vector<32xf32>
    %57 = vector.shape_cast %56 : vector<32xf32> to vector<32x1xf32>
    %58 = vector.broadcast %55 : vector<32x1xf32> to vector<32x2xf32>
    %59 = arith.mulf %0, %58 : vector<32x2xf32>
    %cst_27 = arith.constant dense<0.000000e+00> : vector<2xf32>
    %60 = vector.multi_reduction <add>, %59, %cst_27 [0] : vector<32x2xf32> to vector<2xf32>
    %61 = vector.shape_cast %60 : vector<2xf32> to vector<1x2xf32>
    %62 = arith.addf %61, %1 : vector<1x2xf32>
    %cst_28 = arith.constant 0.000000e+00 : f32
    %63 = vector.broadcast %cst_28 : f32 to vector<1x2xf32>
    %64 = arith.maximumf %62, %63 : vector<1x2xf32>
    %65 = vector.broadcast %64 : vector<1x2xf32> to vector<32x2xf32>
    %66 = arith.mulf %2, %65 : vector<32x2xf32>
    %cst_29 = arith.constant dense<0.000000e+00> : vector<32xf32>
    %67 = vector.multi_reduction <add>, %66, %cst_29 [1] : vector<32x2xf32> to vector<32xf32>
    %68 = vector.shape_cast %67 : vector<32xf32> to vector<32x1xf32>
    %69 = arith.addf %68, %3 : vector<32x1xf32>
    %70 = vector.broadcast %57 : vector<32x1xf32> to vector<32x2xf32>
    %71 = arith.mulf %0, %70 : vector<32x2xf32>
    %cst_30 = arith.constant dense<0.000000e+00> : vector<2xf32>
    %72 = vector.multi_reduction <add>, %71, %cst_30 [0] : vector<32x2xf32> to vector<2xf32>
    %73 = vector.shape_cast %72 : vector<2xf32> to vector<1x2xf32>
    %74 = arith.addf %73, %1 : vector<1x2xf32>
    %cst_31 = arith.constant 0.000000e+00 : f32
    %75 = vector.broadcast %cst_31 : f32 to vector<1x2xf32>
    %76 = arith.maximumf %74, %75 : vector<1x2xf32>
    %77 = vector.broadcast %76 : vector<1x2xf32> to vector<32x2xf32>
    %78 = arith.mulf %2, %77 : vector<32x2xf32>
    %cst_32 = arith.constant dense<0.000000e+00> : vector<32xf32>
    %79 = vector.multi_reduction <add>, %78, %cst_32 [1] : vector<32x2xf32> to vector<32xf32>
    %80 = vector.shape_cast %79 : vector<32xf32> to vector<32x1xf32>
    %81 = arith.addf %80, %3 : vector<32x1xf32>
    %82 = arith.addf %69, %81 : vector<32x1xf32>
    %83 = arith.negf %82 : vector<32x1xf32>
    %84 = math.exp %83 : vector<32x1xf32>
    %cst_33 = arith.constant 1.000000e+00 : f32
    %85 = vector.broadcast %cst_33 : f32 to vector<32x1xf32>
    %86 = arith.addf %85, %84 : vector<32x1xf32>
    %87 = arith.divf %85, %86 : vector<32x1xf32>
    %88 = vector.broadcast %87 : vector<32x1xf32> to vector<32x256xf32>
    %89 = arith.mulf %51, %88 : vector<32x256xf32>
    %cst_34 = arith.constant dense<0xFF800000> : vector<256xf32>
    %90 = vector.multi_reduction <maximumf>, %89, %cst_34 [0] : vector<32x256xf32> to vector<256xf32>
    %91 = vector.shape_cast %90 : vector<256xf32> to vector<1x256xf32>
    %cst_35 = arith.constant dense<0.000000e+00> : vector<256xf32>
    %92 = vector.multi_reduction <add>, %89, %cst_35 [0] : vector<32x256xf32> to vector<256xf32>
    %93 = vector.shape_cast %92 : vector<256xf32> to vector<1x256xf32>
    %cst_36 = arith.constant 3.125000e-02 : f32
    %94 = vector.broadcast %cst_36 : f32 to vector<1x256xf32>
    %95 = arith.mulf %93, %94 : vector<1x256xf32>
    %96 = tpu.concatenate %45, %91 in 0 : vector<1x256xf32>, vector<1x256xf32> -> vector<2x256xf32>
    %97 = tpu.concatenate %49, %95 in 0 : vector<1x256xf32>, vector<1x256xf32> -> vector<2x256xf32>
    %cst_37 = arith.constant 0.000000e+00 : f32
    %98 = vector.broadcast %cst_37 : f32 to vector<2x51xf32>
    %99 = tpu.concatenate %98, %96, %98 in 1 : vector<2x51xf32>, vector<2x256xf32>, vector<2x51xf32> -> vector<2x358xf32>
    %100 = tpu.concatenate %98, %97, %98 in 1 : vector<2x51xf32>, vector<2x256xf32>, vector<2x51xf32> -> vector<2x358xf32>
    %101 = tpu.iota {dimensions = array<i32: 1>} : vector<1x256xi32>
    %c16_i32 = arith.constant 16 : i32
    %c0_i32 = arith.constant 0 : i32
    %102 = arith.cmpi eq, %c16_i32, %c0_i32 : i32
    %c1_i32 = arith.constant 1 : i32
    %103 = arith.select %102, %c1_i32, %c16_i32 : i32
    %104 = vector.broadcast %103 : i32 to vector<1x256xi32>
    %105 = arith.remsi %101, %104 : vector<1x256xi32>
    %c0_i32_38 = arith.constant 0 : i32
    %106 = vector.broadcast %c0_i32_38 : i32 to vector<1x256xi32>
    %107 = arith.cmpi ne, %105, %106 : vector<1x256xi32>
    %c0_i32_39 = arith.constant 0 : i32
    %108 = vector.broadcast %c0_i32_39 : i32 to vector<1x256xi32>
    %109 = arith.cmpi slt, %105, %108 : vector<1x256xi32>
    %c0_i32_40 = arith.constant 0 : i32
    %110 = arith.cmpi slt, %103, %c0_i32_40 : i32
    %111 = vector.broadcast %110 : i1 to vector<1x256xi1>
    %112 = vector.broadcast %111 : vector<1x256xi1> to vector<1x256xi1>
    %113 = arith.xori %109, %112 : vector<1x256xi1>
    %114 = arith.andi %113, %107 : vector<1x256xi1>
    %115 = vector.broadcast %103 : i32 to vector<1x256xi32>
    %116 = arith.addi %105, %115 : vector<1x256xi32>
    %117 = arith.select %114, %116, %105 : vector<1x256xi1>, vector<1x256xi32>
    %cst_41 = arith.constant 0.000000e+00 : f32
    %118 = vector.broadcast %cst_41 : f32 to vector<2x256xf32>
    %cst_42 = arith.constant 0.000000e+00 : f32
    %119 = vector.broadcast %cst_42 : f32 to vector<2x256xf32>
    %120 = vector.extract_strided_slice %99 {offsets = [0, 0], sizes = [2, 256], strides = [1, 1]} : vector<2x358xf32> to vector<2x256xf32>
    %121 = vector.extract_strided_slice %100 {offsets = [0, 0], sizes = [2, 256], strides = [1, 1]} : vector<2x358xf32> to vector<2x256xf32>
    %c0_43 = arith.constant 0 : index
    %122 = memref.load %arg6[%c0_43] : memref<98xf32, #tpu.memory_space<smem>>
    %c49 = arith.constant 49 : index
    %123 = memref.load %arg6[%c49] : memref<98xf32, #tpu.memory_space<smem>>
    %124 = vector.broadcast %122 : f32 to vector<2x256xf32>
    %125 = arith.mulf %124, %120 : vector<2x256xf32>
    %126 = arith.addf %119, %125 : vector<2x256xf32>
    %127 = vector.broadcast %123 : f32 to vector<2x256xf32>
    %128 = arith.mulf %127, %121 : vector<2x256xf32>
    %129 = arith.addf %126, %128 : vector<2x256xf32>
    %130 = vector.extract_strided_slice %99 {offsets = [0, 16], sizes = [2, 256], strides = [1, 1]} : vector<2x358xf32> to vector<2x256xf32>
    %131 = vector.extract_strided_slice %100 {offsets = [0, 16], sizes = [2, 256], strides = [1, 1]} : vector<2x358xf32> to vector<2x256xf32>
    %c7 = arith.constant 7 : index
    %132 = memref.load %arg6[%c7] : memref<98xf32, #tpu.memory_space<smem>>
    %c56 = arith.constant 56 : index
    %133 = memref.load %arg6[%c56] : memref<98xf32, #tpu.memory_space<smem>>
    %134 = vector.broadcast %132 : f32 to vector<2x256xf32>
    %135 = arith.mulf %134, %130 : vector<2x256xf32>
    %136 = arith.addf %129, %135 : vector<2x256xf32>
    %137 = vector.broadcast %133 : f32 to vector<2x256xf32>
    %138 = arith.mulf %137, %131 : vector<2x256xf32>
    %139 = arith.addf %136, %138 : vector<2x256xf32>
    %140 = vector.extract_strided_slice %99 {offsets = [0, 32], sizes = [2, 256], strides = [1, 1]} : vector<2x358xf32> to vector<2x256xf32>
    %141 = vector.extract_strided_slice %100 {offsets = [0, 32], sizes = [2, 256], strides = [1, 1]} : vector<2x358xf32> to vector<2x256xf32>
    %c14 = arith.constant 14 : index
    %142 = memref.load %arg6[%c14] : memref<98xf32, #tpu.memory_space<smem>>
    %c63 = arith.constant 63 : index
    %143 = memref.load %arg6[%c63] : memref<98xf32, #tpu.memory_space<smem>>
    %144 = vector.broadcast %142 : f32 to vector<2x256xf32>
    %145 = arith.mulf %144, %140 : vector<2x256xf32>
    %146 = arith.addf %139, %145 : vector<2x256xf32>
    %147 = vector.broadcast %143 : f32 to vector<2x256xf32>
    %148 = arith.mulf %147, %141 : vector<2x256xf32>
    %149 = arith.addf %146, %148 : vector<2x256xf32>
    %150 = vector.extract_strided_slice %99 {offsets = [0, 48], sizes = [2, 256], strides = [1, 1]} : vector<2x358xf32> to vector<2x256xf32>
    %151 = vector.extract_strided_slice %100 {offsets = [0, 48], sizes = [2, 256], strides = [1, 1]} : vector<2x358xf32> to vector<2x256xf32>
    %c21 = arith.constant 21 : index
    %152 = memref.load %arg6[%c21] : memref<98xf32, #tpu.memory_space<smem>>
    %c70 = arith.constant 70 : index
    %153 = memref.load %arg6[%c70] : memref<98xf32, #tpu.memory_space<smem>>
    %154 = vector.broadcast %152 : f32 to vector<2x256xf32>
    %155 = arith.mulf %154, %150 : vector<2x256xf32>
    %156 = arith.addf %149, %155 : vector<2x256xf32>
    %157 = vector.broadcast %153 : f32 to vector<2x256xf32>
    %158 = arith.mulf %157, %151 : vector<2x256xf32>
    %159 = arith.addf %156, %158 : vector<2x256xf32>
    %160 = vector.extract_strided_slice %99 {offsets = [0, 64], sizes = [2, 256], strides = [1, 1]} : vector<2x358xf32> to vector<2x256xf32>
    %161 = vector.extract_strided_slice %100 {offsets = [0, 64], sizes = [2, 256], strides = [1, 1]} : vector<2x358xf32> to vector<2x256xf32>
    %c28 = arith.constant 28 : index
    %162 = memref.load %arg6[%c28] : memref<98xf32, #tpu.memory_space<smem>>
    %c77 = arith.constant 77 : index
    %163 = memref.load %arg6[%c77] : memref<98xf32, #tpu.memory_space<smem>>
    %164 = vector.broadcast %162 : f32 to vector<2x256xf32>
    %165 = arith.mulf %164, %160 : vector<2x256xf32>
    %166 = arith.addf %159, %165 : vector<2x256xf32>
    %167 = vector.broadcast %163 : f32 to vector<2x256xf32>
    %168 = arith.mulf %167, %161 : vector<2x256xf32>
    %169 = arith.addf %166, %168 : vector<2x256xf32>
    %170 = vector.extract_strided_slice %99 {offsets = [0, 80], sizes = [2, 256], strides = [1, 1]} : vector<2x358xf32> to vector<2x256xf32>
    %171 = vector.extract_strided_slice %100 {offsets = [0, 80], sizes = [2, 256], strides = [1, 1]} : vector<2x358xf32> to vector<2x256xf32>
    %c35 = arith.constant 35 : index
    %172 = memref.load %arg6[%c35] : memref<98xf32, #tpu.memory_space<smem>>
    %c84 = arith.constant 84 : index
    %173 = memref.load %arg6[%c84] : memref<98xf32, #tpu.memory_space<smem>>
    %174 = vector.broadcast %172 : f32 to vector<2x256xf32>
    %175 = arith.mulf %174, %170 : vector<2x256xf32>
    %176 = arith.addf %169, %175 : vector<2x256xf32>
    %177 = vector.broadcast %173 : f32 to vector<2x256xf32>
    %178 = arith.mulf %177, %171 : vector<2x256xf32>
    %179 = arith.addf %176, %178 : vector<2x256xf32>
    %180 = vector.extract_strided_slice %99 {offsets = [0, 96], sizes = [2, 256], strides = [1, 1]} : vector<2x358xf32> to vector<2x256xf32>
    %181 = vector.extract_strided_slice %100 {offsets = [0, 96], sizes = [2, 256], strides = [1, 1]} : vector<2x358xf32> to vector<2x256xf32>
    %c42 = arith.constant 42 : index
    %182 = memref.load %arg6[%c42] : memref<98xf32, #tpu.memory_space<smem>>
    %c91 = arith.constant 91 : index
    %183 = memref.load %arg6[%c91] : memref<98xf32, #tpu.memory_space<smem>>
    %184 = vector.broadcast %182 : f32 to vector<2x256xf32>
    %185 = arith.mulf %184, %180 : vector<2x256xf32>
    %186 = arith.addf %179, %185 : vector<2x256xf32>
    %187 = vector.broadcast %183 : f32 to vector<2x256xf32>
    %188 = arith.mulf %187, %181 : vector<2x256xf32>
    %189 = arith.addf %186, %188 : vector<2x256xf32>
    %c-3_i32 = arith.constant -3 : i32
    %190 = vector.broadcast %c-3_i32 : i32 to vector<1x256xi32>
    %191 = arith.addi %117, %190 : vector<1x256xi32>
    %c0_i32_44 = arith.constant 0 : i32
    %192 = vector.broadcast %c0_i32_44 : i32 to vector<1x256xi32>
    %193 = arith.cmpi sge, %191, %192 : vector<1x256xi32>
    %c-3_i32_45 = arith.constant -3 : i32
    %194 = vector.broadcast %c-3_i32_45 : i32 to vector<1x256xi32>
    %195 = arith.addi %117, %194 : vector<1x256xi32>
    %c16_i32_46 = arith.constant 16 : i32
    %196 = vector.broadcast %c16_i32_46 : i32 to vector<1x256xi32>
    %197 = arith.cmpi slt, %195, %196 : vector<1x256xi32>
    %198 = arith.andi %193, %197 : vector<1x256xi1>
    %cst_47 = arith.constant 0.000000e+00 : f32
    %199 = vector.shape_cast %198 : vector<1x256xi1> to vector<1x256xi1>
    %200 = vector.broadcast %199 : vector<1x256xi1> to vector<2x256xi1>
    %201 = vector.broadcast %cst_47 : f32 to vector<2x256xf32>
    %202 = arith.select %200, %189, %201 : vector<2x256xi1>, vector<2x256xf32>
    %203 = arith.addf %118, %202 : vector<2x256xf32>
    %cst_48 = arith.constant 0.000000e+00 : f32
    %204 = vector.broadcast %cst_48 : f32 to vector<2x256xf32>
    %205 = vector.extract_strided_slice %99 {offsets = [0, 1], sizes = [2, 256], strides = [1, 1]} : vector<2x358xf32> to vector<2x256xf32>
    %206 = vector.extract_strided_slice %100 {offsets = [0, 1], sizes = [2, 256], strides = [1, 1]} : vector<2x358xf32> to vector<2x256xf32>
    %c1_49 = arith.constant 1 : index
    %207 = memref.load %arg6[%c1_49] : memref<98xf32, #tpu.memory_space<smem>>
    %c50 = arith.constant 50 : index
    %208 = memref.load %arg6[%c50] : memref<98xf32, #tpu.memory_space<smem>>
    %209 = vector.broadcast %207 : f32 to vector<2x256xf32>
    %210 = arith.mulf %209, %205 : vector<2x256xf32>
    %211 = arith.addf %204, %210 : vector<2x256xf32>
    %212 = vector.broadcast %208 : f32 to vector<2x256xf32>
    %213 = arith.mulf %212, %206 : vector<2x256xf32>
    %214 = arith.addf %211, %213 : vector<2x256xf32>
    %215 = vector.extract_strided_slice %99 {offsets = [0, 17], sizes = [2, 256], strides = [1, 1]} : vector<2x358xf32> to vector<2x256xf32>
    %216 = vector.extract_strided_slice %100 {offsets = [0, 17], sizes = [2, 256], strides = [1, 1]} : vector<2x358xf32> to vector<2x256xf32>
    %c8 = arith.constant 8 : index
    %217 = memref.load %arg6[%c8] : memref<98xf32, #tpu.memory_space<smem>>
    %c57 = arith.constant 57 : index
    %218 = memref.load %arg6[%c57] : memref<98xf32, #tpu.memory_space<smem>>
    %219 = vector.broadcast %217 : f32 to vector<2x256xf32>
    %220 = arith.mulf %219, %215 : vector<2x256xf32>
    %221 = arith.addf %214, %220 : vector<2x256xf32>
    %222 = vector.broadcast %218 : f32 to vector<2x256xf32>
    %223 = arith.mulf %222, %216 : vector<2x256xf32>
    %224 = arith.addf %221, %223 : vector<2x256xf32>
    %225 = vector.extract_strided_slice %99 {offsets = [0, 33], sizes = [2, 256], strides = [1, 1]} : vector<2x358xf32> to vector<2x256xf32>
    %226 = vector.extract_strided_slice %100 {offsets = [0, 33], sizes = [2, 256], strides = [1, 1]} : vector<2x358xf32> to vector<2x256xf32>
    %c15 = arith.constant 15 : index
    %227 = memref.load %arg6[%c15] : memref<98xf32, #tpu.memory_space<smem>>
    %c64 = arith.constant 64 : index
    %228 = memref.load %arg6[%c64] : memref<98xf32, #tpu.memory_space<smem>>
    %229 = vector.broadcast %227 : f32 to vector<2x256xf32>
    %230 = arith.mulf %229, %225 : vector<2x256xf32>
    %231 = arith.addf %224, %230 : vector<2x256xf32>
    %232 = vector.broadcast %228 : f32 to vector<2x256xf32>
    %233 = arith.mulf %232, %226 : vector<2x256xf32>
    %234 = arith.addf %231, %233 : vector<2x256xf32>
    %235 = vector.extract_strided_slice %99 {offsets = [0, 49], sizes = [2, 256], strides = [1, 1]} : vector<2x358xf32> to vector<2x256xf32>
    %236 = vector.extract_strided_slice %100 {offsets = [0, 49], sizes = [2, 256], strides = [1, 1]} : vector<2x358xf32> to vector<2x256xf32>
    %c22 = arith.constant 22 : index
    %237 = memref.load %arg6[%c22] : memref<98xf32, #tpu.memory_space<smem>>
    %c71 = arith.constant 71 : index
    %238 = memref.load %arg6[%c71] : memref<98xf32, #tpu.memory_space<smem>>
    %239 = vector.broadcast %237 : f32 to vector<2x256xf32>
    %240 = arith.mulf %239, %235 : vector<2x256xf32>
    %241 = arith.addf %234, %240 : vector<2x256xf32>
    %242 = vector.broadcast %238 : f32 to vector<2x256xf32>
    %243 = arith.mulf %242, %236 : vector<2x256xf32>
    %244 = arith.addf %241, %243 : vector<2x256xf32>
    %245 = vector.extract_strided_slice %99 {offsets = [0, 65], sizes = [2, 256], strides = [1, 1]} : vector<2x358xf32> to vector<2x256xf32>
    %246 = vector.extract_strided_slice %100 {offsets = [0, 65], sizes = [2, 256], strides = [1, 1]} : vector<2x358xf32> to vector<2x256xf32>
    %c29 = arith.constant 29 : index
    %247 = memref.load %arg6[%c29] : memref<98xf32, #tpu.memory_space<smem>>
    %c78 = arith.constant 78 : index
    %248 = memref.load %arg6[%c78] : memref<98xf32, #tpu.memory_space<smem>>
    %249 = vector.broadcast %247 : f32 to vector<2x256xf32>
    %250 = arith.mulf %249, %245 : vector<2x256xf32>
    %251 = arith.addf %244, %250 : vector<2x256xf32>
    %252 = vector.broadcast %248 : f32 to vector<2x256xf32>
    %253 = arith.mulf %252, %246 : vector<2x256xf32>
    %254 = arith.addf %251, %253 : vector<2x256xf32>
    %255 = vector.extract_strided_slice %99 {offsets = [0, 81], sizes = [2, 256], strides = [1, 1]} : vector<2x358xf32> to vector<2x256xf32>
    %256 = vector.extract_strided_slice %100 {offsets = [0, 81], sizes = [2, 256], strides = [1, 1]} : vector<2x358xf32> to vector<2x256xf32>
    %c36 = arith.constant 36 : index
    %257 = memref.load %arg6[%c36] : memref<98xf32, #tpu.memory_space<smem>>
    %c85 = arith.constant 85 : index
    %258 = memref.load %arg6[%c85] : memref<98xf32, #tpu.memory_space<smem>>
    %259 = vector.broadcast %257 : f32 to vector<2x256xf32>
    %260 = arith.mulf %259, %255 : vector<2x256xf32>
    %261 = arith.addf %254, %260 : vector<2x256xf32>
    %262 = vector.broadcast %258 : f32 to vector<2x256xf32>
    %263 = arith.mulf %262, %256 : vector<2x256xf32>
    %264 = arith.addf %261, %263 : vector<2x256xf32>
    %265 = vector.extract_strided_slice %99 {offsets = [0, 97], sizes = [2, 256], strides = [1, 1]} : vector<2x358xf32> to vector<2x256xf32>
    %266 = vector.extract_strided_slice %100 {offsets = [0, 97], sizes = [2, 256], strides = [1, 1]} : vector<2x358xf32> to vector<2x256xf32>
    %c43 = arith.constant 43 : index
    %267 = memref.load %arg6[%c43] : memref<98xf32, #tpu.memory_space<smem>>
    %c92 = arith.constant 92 : index
    %268 = memref.load %arg6[%c92] : memref<98xf32, #tpu.memory_space<smem>>
    %269 = vector.broadcast %267 : f32 to vector<2x256xf32>
    %270 = arith.mulf %269, %265 : vector<2x256xf32>
    %271 = arith.addf %264, %270 : vector<2x256xf32>
    %272 = vector.broadcast %268 : f32 to vector<2x256xf32>
    %273 = arith.mulf %272, %266 : vector<2x256xf32>
    %274 = arith.addf %271, %273 : vector<2x256xf32>
    %c-2_i32 = arith.constant -2 : i32
    %275 = vector.broadcast %c-2_i32 : i32 to vector<1x256xi32>
    %276 = arith.addi %117, %275 : vector<1x256xi32>
    %c0_i32_50 = arith.constant 0 : i32
    %277 = vector.broadcast %c0_i32_50 : i32 to vector<1x256xi32>
    %278 = arith.cmpi sge, %276, %277 : vector<1x256xi32>
    %c-2_i32_51 = arith.constant -2 : i32
    %279 = vector.broadcast %c-2_i32_51 : i32 to vector<1x256xi32>
    %280 = arith.addi %117, %279 : vector<1x256xi32>
    %c16_i32_52 = arith.constant 16 : i32
    %281 = vector.broadcast %c16_i32_52 : i32 to vector<1x256xi32>
    %282 = arith.cmpi slt, %280, %281 : vector<1x256xi32>
    %283 = arith.andi %278, %282 : vector<1x256xi1>
    %cst_53 = arith.constant 0.000000e+00 : f32
    %284 = vector.shape_cast %283 : vector<1x256xi1> to vector<1x256xi1>
    %285 = vector.broadcast %284 : vector<1x256xi1> to vector<2x256xi1>
    %286 = vector.broadcast %cst_53 : f32 to vector<2x256xf32>
    %287 = arith.select %285, %274, %286 : vector<2x256xi1>, vector<2x256xf32>
    %288 = arith.addf %203, %287 : vector<2x256xf32>
    %cst_54 = arith.constant 0.000000e+00 : f32
    %289 = vector.broadcast %cst_54 : f32 to vector<2x256xf32>
    %290 = vector.extract_strided_slice %99 {offsets = [0, 2], sizes = [2, 256], strides = [1, 1]} : vector<2x358xf32> to vector<2x256xf32>
    %291 = vector.extract_strided_slice %100 {offsets = [0, 2], sizes = [2, 256], strides = [1, 1]} : vector<2x358xf32> to vector<2x256xf32>
    %c2 = arith.constant 2 : index
    %292 = memref.load %arg6[%c2] : memref<98xf32, #tpu.memory_space<smem>>
    %c51 = arith.constant 51 : index
    %293 = memref.load %arg6[%c51] : memref<98xf32, #tpu.memory_space<smem>>
    %294 = vector.broadcast %292 : f32 to vector<2x256xf32>
    %295 = arith.mulf %294, %290 : vector<2x256xf32>
    %296 = arith.addf %289, %295 : vector<2x256xf32>
    %297 = vector.broadcast %293 : f32 to vector<2x256xf32>
    %298 = arith.mulf %297, %291 : vector<2x256xf32>
    %299 = arith.addf %296, %298 : vector<2x256xf32>
    %300 = vector.extract_strided_slice %99 {offsets = [0, 18], sizes = [2, 256], strides = [1, 1]} : vector<2x358xf32> to vector<2x256xf32>
    %301 = vector.extract_strided_slice %100 {offsets = [0, 18], sizes = [2, 256], strides = [1, 1]} : vector<2x358xf32> to vector<2x256xf32>
    %c9 = arith.constant 9 : index
    %302 = memref.load %arg6[%c9] : memref<98xf32, #tpu.memory_space<smem>>
    %c58 = arith.constant 58 : index
    %303 = memref.load %arg6[%c58] : memref<98xf32, #tpu.memory_space<smem>>
    %304 = vector.broadcast %302 : f32 to vector<2x256xf32>
    %305 = arith.mulf %304, %300 : vector<2x256xf32>
    %306 = arith.addf %299, %305 : vector<2x256xf32>
    %307 = vector.broadcast %303 : f32 to vector<2x256xf32>
    %308 = arith.mulf %307, %301 : vector<2x256xf32>
    %309 = arith.addf %306, %308 : vector<2x256xf32>
    %310 = vector.extract_strided_slice %99 {offsets = [0, 34], sizes = [2, 256], strides = [1, 1]} : vector<2x358xf32> to vector<2x256xf32>
    %311 = vector.extract_strided_slice %100 {offsets = [0, 34], sizes = [2, 256], strides = [1, 1]} : vector<2x358xf32> to vector<2x256xf32>
    %c16 = arith.constant 16 : index
    %312 = memref.load %arg6[%c16] : memref<98xf32, #tpu.memory_space<smem>>
    %c65 = arith.constant 65 : index
    %313 = memref.load %arg6[%c65] : memref<98xf32, #tpu.memory_space<smem>>
    %314 = vector.broadcast %312 : f32 to vector<2x256xf32>
    %315 = arith.mulf %314, %310 : vector<2x256xf32>
    %316 = arith.addf %309, %315 : vector<2x256xf32>
    %317 = vector.broadcast %313 : f32 to vector<2x256xf32>
    %318 = arith.mulf %317, %311 : vector<2x256xf32>
    %319 = arith.addf %316, %318 : vector<2x256xf32>
    %320 = vector.extract_strided_slice %99 {offsets = [0, 50], sizes = [2, 256], strides = [1, 1]} : vector<2x358xf32> to vector<2x256xf32>
    %321 = vector.extract_strided_slice %100 {offsets = [0, 50], sizes = [2, 256], strides = [1, 1]} : vector<2x358xf32> to vector<2x256xf32>
    %c23 = arith.constant 23 : index
    %322 = memref.load %arg6[%c23] : memref<98xf32, #tpu.memory_space<smem>>
    %c72 = arith.constant 72 : index
    %323 = memref.load %arg6[%c72] : memref<98xf32, #tpu.memory_space<smem>>
    %324 = vector.broadcast %322 : f32 to vector<2x256xf32>
    %325 = arith.mulf %324, %320 : vector<2x256xf32>
    %326 = arith.addf %319, %325 : vector<2x256xf32>
    %327 = vector.broadcast %323 : f32 to vector<2x256xf32>
    %328 = arith.mulf %327, %321 : vector<2x256xf32>
    %329 = arith.addf %326, %328 : vector<2x256xf32>
    %330 = vector.extract_strided_slice %99 {offsets = [0, 66], sizes = [2, 256], strides = [1, 1]} : vector<2x358xf32> to vector<2x256xf32>
    %331 = vector.extract_strided_slice %100 {offsets = [0, 66], sizes = [2, 256], strides = [1, 1]} : vector<2x358xf32> to vector<2x256xf32>
    %c30 = arith.constant 30 : index
    %332 = memref.load %arg6[%c30] : memref<98xf32, #tpu.memory_space<smem>>
    %c79 = arith.constant 79 : index
    %333 = memref.load %arg6[%c79] : memref<98xf32, #tpu.memory_space<smem>>
    %334 = vector.broadcast %332 : f32 to vector<2x256xf32>
    %335 = arith.mulf %334, %330 : vector<2x256xf32>
    %336 = arith.addf %329, %335 : vector<2x256xf32>
    %337 = vector.broadcast %333 : f32 to vector<2x256xf32>
    %338 = arith.mulf %337, %331 : vector<2x256xf32>
    %339 = arith.addf %336, %338 : vector<2x256xf32>
    %340 = vector.extract_strided_slice %99 {offsets = [0, 82], sizes = [2, 256], strides = [1, 1]} : vector<2x358xf32> to vector<2x256xf32>
    %341 = vector.extract_strided_slice %100 {offsets = [0, 82], sizes = [2, 256], strides = [1, 1]} : vector<2x358xf32> to vector<2x256xf32>
    %c37 = arith.constant 37 : index
    %342 = memref.load %arg6[%c37] : memref<98xf32, #tpu.memory_space<smem>>
    %c86 = arith.constant 86 : index
    %343 = memref.load %arg6[%c86] : memref<98xf32, #tpu.memory_space<smem>>
    %344 = vector.broadcast %342 : f32 to vector<2x256xf32>
    %345 = arith.mulf %344, %340 : vector<2x256xf32>
    %346 = arith.addf %339, %345 : vector<2x256xf32>
    %347 = vector.broadcast %343 : f32 to vector<2x256xf32>
    %348 = arith.mulf %347, %341 : vector<2x256xf32>
    %349 = arith.addf %346, %348 : vector<2x256xf32>
    %350 = vector.extract_strided_slice %99 {offsets = [0, 98], sizes = [2, 256], strides = [1, 1]} : vector<2x358xf32> to vector<2x256xf32>
    %351 = vector.extract_strided_slice %100 {offsets = [0, 98], sizes = [2, 256], strides = [1, 1]} : vector<2x358xf32> to vector<2x256xf32>
    %c44 = arith.constant 44 : index
    %352 = memref.load %arg6[%c44] : memref<98xf32, #tpu.memory_space<smem>>
    %c93 = arith.constant 93 : index
    %353 = memref.load %arg6[%c93] : memref<98xf32, #tpu.memory_space<smem>>
    %354 = vector.broadcast %352 : f32 to vector<2x256xf32>
    %355 = arith.mulf %354, %350 : vector<2x256xf32>
    %356 = arith.addf %349, %355 : vector<2x256xf32>
    %357 = vector.broadcast %353 : f32 to vector<2x256xf32>
    %358 = arith.mulf %357, %351 : vector<2x256xf32>
    %359 = arith.addf %356, %358 : vector<2x256xf32>
    %c-1_i32 = arith.constant -1 : i32
    %360 = vector.broadcast %c-1_i32 : i32 to vector<1x256xi32>
    %361 = arith.addi %117, %360 : vector<1x256xi32>
    %c0_i32_55 = arith.constant 0 : i32
    %362 = vector.broadcast %c0_i32_55 : i32 to vector<1x256xi32>
    %363 = arith.cmpi sge, %361, %362 : vector<1x256xi32>
    %c-1_i32_56 = arith.constant -1 : i32
    %364 = vector.broadcast %c-1_i32_56 : i32 to vector<1x256xi32>
    %365 = arith.addi %117, %364 : vector<1x256xi32>
    %c16_i32_57 = arith.constant 16 : i32
    %366 = vector.broadcast %c16_i32_57 : i32 to vector<1x256xi32>
    %367 = arith.cmpi slt, %365, %366 : vector<1x256xi32>
    %368 = arith.andi %363, %367 : vector<1x256xi1>
    %cst_58 = arith.constant 0.000000e+00 : f32
    %369 = vector.shape_cast %368 : vector<1x256xi1> to vector<1x256xi1>
    %370 = vector.broadcast %369 : vector<1x256xi1> to vector<2x256xi1>
    %371 = vector.broadcast %cst_58 : f32 to vector<2x256xf32>
    %372 = arith.select %370, %359, %371 : vector<2x256xi1>, vector<2x256xf32>
    %373 = arith.addf %288, %372 : vector<2x256xf32>
    %cst_59 = arith.constant 0.000000e+00 : f32
    %374 = vector.broadcast %cst_59 : f32 to vector<2x256xf32>
    %375 = vector.extract_strided_slice %99 {offsets = [0, 3], sizes = [2, 256], strides = [1, 1]} : vector<2x358xf32> to vector<2x256xf32>
    %376 = vector.extract_strided_slice %100 {offsets = [0, 3], sizes = [2, 256], strides = [1, 1]} : vector<2x358xf32> to vector<2x256xf32>
    %c3 = arith.constant 3 : index
    %377 = memref.load %arg6[%c3] : memref<98xf32, #tpu.memory_space<smem>>
    %c52 = arith.constant 52 : index
    %378 = memref.load %arg6[%c52] : memref<98xf32, #tpu.memory_space<smem>>
    %379 = vector.broadcast %377 : f32 to vector<2x256xf32>
    %380 = arith.mulf %379, %375 : vector<2x256xf32>
    %381 = arith.addf %374, %380 : vector<2x256xf32>
    %382 = vector.broadcast %378 : f32 to vector<2x256xf32>
    %383 = arith.mulf %382, %376 : vector<2x256xf32>
    %384 = arith.addf %381, %383 : vector<2x256xf32>
    %385 = vector.extract_strided_slice %99 {offsets = [0, 19], sizes = [2, 256], strides = [1, 1]} : vector<2x358xf32> to vector<2x256xf32>
    %386 = vector.extract_strided_slice %100 {offsets = [0, 19], sizes = [2, 256], strides = [1, 1]} : vector<2x358xf32> to vector<2x256xf32>
    %c10 = arith.constant 10 : index
    %387 = memref.load %arg6[%c10] : memref<98xf32, #tpu.memory_space<smem>>
    %c59 = arith.constant 59 : index
    %388 = memref.load %arg6[%c59] : memref<98xf32, #tpu.memory_space<smem>>
    %389 = vector.broadcast %387 : f32 to vector<2x256xf32>
    %390 = arith.mulf %389, %385 : vector<2x256xf32>
    %391 = arith.addf %384, %390 : vector<2x256xf32>
    %392 = vector.broadcast %388 : f32 to vector<2x256xf32>
    %393 = arith.mulf %392, %386 : vector<2x256xf32>
    %394 = arith.addf %391, %393 : vector<2x256xf32>
    %395 = vector.extract_strided_slice %99 {offsets = [0, 35], sizes = [2, 256], strides = [1, 1]} : vector<2x358xf32> to vector<2x256xf32>
    %396 = vector.extract_strided_slice %100 {offsets = [0, 35], sizes = [2, 256], strides = [1, 1]} : vector<2x358xf32> to vector<2x256xf32>
    %c17 = arith.constant 17 : index
    %397 = memref.load %arg6[%c17] : memref<98xf32, #tpu.memory_space<smem>>
    %c66 = arith.constant 66 : index
    %398 = memref.load %arg6[%c66] : memref<98xf32, #tpu.memory_space<smem>>
    %399 = vector.broadcast %397 : f32 to vector<2x256xf32>
    %400 = arith.mulf %399, %395 : vector<2x256xf32>
    %401 = arith.addf %394, %400 : vector<2x256xf32>
    %402 = vector.broadcast %398 : f32 to vector<2x256xf32>
    %403 = arith.mulf %402, %396 : vector<2x256xf32>
    %404 = arith.addf %401, %403 : vector<2x256xf32>
    %405 = vector.extract_strided_slice %99 {offsets = [0, 51], sizes = [2, 256], strides = [1, 1]} : vector<2x358xf32> to vector<2x256xf32>
    %406 = vector.extract_strided_slice %100 {offsets = [0, 51], sizes = [2, 256], strides = [1, 1]} : vector<2x358xf32> to vector<2x256xf32>
    %c24 = arith.constant 24 : index
    %407 = memref.load %arg6[%c24] : memref<98xf32, #tpu.memory_space<smem>>
    %c73 = arith.constant 73 : index
    %408 = memref.load %arg6[%c73] : memref<98xf32, #tpu.memory_space<smem>>
    %409 = vector.broadcast %407 : f32 to vector<2x256xf32>
    %410 = arith.mulf %409, %405 : vector<2x256xf32>
    %411 = arith.addf %404, %410 : vector<2x256xf32>
    %412 = vector.broadcast %408 : f32 to vector<2x256xf32>
    %413 = arith.mulf %412, %406 : vector<2x256xf32>
    %414 = arith.addf %411, %413 : vector<2x256xf32>
    %415 = vector.extract_strided_slice %99 {offsets = [0, 67], sizes = [2, 256], strides = [1, 1]} : vector<2x358xf32> to vector<2x256xf32>
    %416 = vector.extract_strided_slice %100 {offsets = [0, 67], sizes = [2, 256], strides = [1, 1]} : vector<2x358xf32> to vector<2x256xf32>
    %c31 = arith.constant 31 : index
    %417 = memref.load %arg6[%c31] : memref<98xf32, #tpu.memory_space<smem>>
    %c80 = arith.constant 80 : index
    %418 = memref.load %arg6[%c80] : memref<98xf32, #tpu.memory_space<smem>>
    %419 = vector.broadcast %417 : f32 to vector<2x256xf32>
    %420 = arith.mulf %419, %415 : vector<2x256xf32>
    %421 = arith.addf %414, %420 : vector<2x256xf32>
    %422 = vector.broadcast %418 : f32 to vector<2x256xf32>
    %423 = arith.mulf %422, %416 : vector<2x256xf32>
    %424 = arith.addf %421, %423 : vector<2x256xf32>
    %425 = vector.extract_strided_slice %99 {offsets = [0, 83], sizes = [2, 256], strides = [1, 1]} : vector<2x358xf32> to vector<2x256xf32>
    %426 = vector.extract_strided_slice %100 {offsets = [0, 83], sizes = [2, 256], strides = [1, 1]} : vector<2x358xf32> to vector<2x256xf32>
    %c38 = arith.constant 38 : index
    %427 = memref.load %arg6[%c38] : memref<98xf32, #tpu.memory_space<smem>>
    %c87 = arith.constant 87 : index
    %428 = memref.load %arg6[%c87] : memref<98xf32, #tpu.memory_space<smem>>
    %429 = vector.broadcast %427 : f32 to vector<2x256xf32>
    %430 = arith.mulf %429, %425 : vector<2x256xf32>
    %431 = arith.addf %424, %430 : vector<2x256xf32>
    %432 = vector.broadcast %428 : f32 to vector<2x256xf32>
    %433 = arith.mulf %432, %426 : vector<2x256xf32>
    %434 = arith.addf %431, %433 : vector<2x256xf32>
    %435 = vector.extract_strided_slice %99 {offsets = [0, 99], sizes = [2, 256], strides = [1, 1]} : vector<2x358xf32> to vector<2x256xf32>
    %436 = vector.extract_strided_slice %100 {offsets = [0, 99], sizes = [2, 256], strides = [1, 1]} : vector<2x358xf32> to vector<2x256xf32>
    %c45 = arith.constant 45 : index
    %437 = memref.load %arg6[%c45] : memref<98xf32, #tpu.memory_space<smem>>
    %c94 = arith.constant 94 : index
    %438 = memref.load %arg6[%c94] : memref<98xf32, #tpu.memory_space<smem>>
    %439 = vector.broadcast %437 : f32 to vector<2x256xf32>
    %440 = arith.mulf %439, %435 : vector<2x256xf32>
    %441 = arith.addf %434, %440 : vector<2x256xf32>
    %442 = vector.broadcast %438 : f32 to vector<2x256xf32>
    %443 = arith.mulf %442, %436 : vector<2x256xf32>
    %444 = arith.addf %441, %443 : vector<2x256xf32>
    %445 = arith.addf %373, %444 : vector<2x256xf32>
    %cst_60 = arith.constant 0.000000e+00 : f32
    %446 = vector.broadcast %cst_60 : f32 to vector<2x256xf32>
    %447 = vector.extract_strided_slice %99 {offsets = [0, 4], sizes = [2, 256], strides = [1, 1]} : vector<2x358xf32> to vector<2x256xf32>
    %448 = vector.extract_strided_slice %100 {offsets = [0, 4], sizes = [2, 256], strides = [1, 1]} : vector<2x358xf32> to vector<2x256xf32>
    %c4 = arith.constant 4 : index
    %449 = memref.load %arg6[%c4] : memref<98xf32, #tpu.memory_space<smem>>
    %c53 = arith.constant 53 : index
    %450 = memref.load %arg6[%c53] : memref<98xf32, #tpu.memory_space<smem>>
    %451 = vector.broadcast %449 : f32 to vector<2x256xf32>
    %452 = arith.mulf %451, %447 : vector<2x256xf32>
    %453 = arith.addf %446, %452 : vector<2x256xf32>
    %454 = vector.broadcast %450 : f32 to vector<2x256xf32>
    %455 = arith.mulf %454, %448 : vector<2x256xf32>
    %456 = arith.addf %453, %455 : vector<2x256xf32>
    %457 = vector.extract_strided_slice %99 {offsets = [0, 20], sizes = [2, 256], strides = [1, 1]} : vector<2x358xf32> to vector<2x256xf32>
    %458 = vector.extract_strided_slice %100 {offsets = [0, 20], sizes = [2, 256], strides = [1, 1]} : vector<2x358xf32> to vector<2x256xf32>
    %c11 = arith.constant 11 : index
    %459 = memref.load %arg6[%c11] : memref<98xf32, #tpu.memory_space<smem>>
    %c60 = arith.constant 60 : index
    %460 = memref.load %arg6[%c60] : memref<98xf32, #tpu.memory_space<smem>>
    %461 = vector.broadcast %459 : f32 to vector<2x256xf32>
    %462 = arith.mulf %461, %457 : vector<2x256xf32>
    %463 = arith.addf %456, %462 : vector<2x256xf32>
    %464 = vector.broadcast %460 : f32 to vector<2x256xf32>
    %465 = arith.mulf %464, %458 : vector<2x256xf32>
    %466 = arith.addf %463, %465 : vector<2x256xf32>
    %467 = vector.extract_strided_slice %99 {offsets = [0, 36], sizes = [2, 256], strides = [1, 1]} : vector<2x358xf32> to vector<2x256xf32>
    %468 = vector.extract_strided_slice %100 {offsets = [0, 36], sizes = [2, 256], strides = [1, 1]} : vector<2x358xf32> to vector<2x256xf32>
    %c18 = arith.constant 18 : index
    %469 = memref.load %arg6[%c18] : memref<98xf32, #tpu.memory_space<smem>>
    %c67 = arith.constant 67 : index
    %470 = memref.load %arg6[%c67] : memref<98xf32, #tpu.memory_space<smem>>
    %471 = vector.broadcast %469 : f32 to vector<2x256xf32>
    %472 = arith.mulf %471, %467 : vector<2x256xf32>
    %473 = arith.addf %466, %472 : vector<2x256xf32>
    %474 = vector.broadcast %470 : f32 to vector<2x256xf32>
    %475 = arith.mulf %474, %468 : vector<2x256xf32>
    %476 = arith.addf %473, %475 : vector<2x256xf32>
    %477 = vector.extract_strided_slice %99 {offsets = [0, 52], sizes = [2, 256], strides = [1, 1]} : vector<2x358xf32> to vector<2x256xf32>
    %478 = vector.extract_strided_slice %100 {offsets = [0, 52], sizes = [2, 256], strides = [1, 1]} : vector<2x358xf32> to vector<2x256xf32>
    %c25 = arith.constant 25 : index
    %479 = memref.load %arg6[%c25] : memref<98xf32, #tpu.memory_space<smem>>
    %c74 = arith.constant 74 : index
    %480 = memref.load %arg6[%c74] : memref<98xf32, #tpu.memory_space<smem>>
    %481 = vector.broadcast %479 : f32 to vector<2x256xf32>
    %482 = arith.mulf %481, %477 : vector<2x256xf32>
    %483 = arith.addf %476, %482 : vector<2x256xf32>
    %484 = vector.broadcast %480 : f32 to vector<2x256xf32>
    %485 = arith.mulf %484, %478 : vector<2x256xf32>
    %486 = arith.addf %483, %485 : vector<2x256xf32>
    %487 = vector.extract_strided_slice %99 {offsets = [0, 68], sizes = [2, 256], strides = [1, 1]} : vector<2x358xf32> to vector<2x256xf32>
    %488 = vector.extract_strided_slice %100 {offsets = [0, 68], sizes = [2, 256], strides = [1, 1]} : vector<2x358xf32> to vector<2x256xf32>
    %c32 = arith.constant 32 : index
    %489 = memref.load %arg6[%c32] : memref<98xf32, #tpu.memory_space<smem>>
    %c81 = arith.constant 81 : index
    %490 = memref.load %arg6[%c81] : memref<98xf32, #tpu.memory_space<smem>>
    %491 = vector.broadcast %489 : f32 to vector<2x256xf32>
    %492 = arith.mulf %491, %487 : vector<2x256xf32>
    %493 = arith.addf %486, %492 : vector<2x256xf32>
    %494 = vector.broadcast %490 : f32 to vector<2x256xf32>
    %495 = arith.mulf %494, %488 : vector<2x256xf32>
    %496 = arith.addf %493, %495 : vector<2x256xf32>
    %497 = vector.extract_strided_slice %99 {offsets = [0, 84], sizes = [2, 256], strides = [1, 1]} : vector<2x358xf32> to vector<2x256xf32>
    %498 = vector.extract_strided_slice %100 {offsets = [0, 84], sizes = [2, 256], strides = [1, 1]} : vector<2x358xf32> to vector<2x256xf32>
    %c39 = arith.constant 39 : index
    %499 = memref.load %arg6[%c39] : memref<98xf32, #tpu.memory_space<smem>>
    %c88 = arith.constant 88 : index
    %500 = memref.load %arg6[%c88] : memref<98xf32, #tpu.memory_space<smem>>
    %501 = vector.broadcast %499 : f32 to vector<2x256xf32>
    %502 = arith.mulf %501, %497 : vector<2x256xf32>
    %503 = arith.addf %496, %502 : vector<2x256xf32>
    %504 = vector.broadcast %500 : f32 to vector<2x256xf32>
    %505 = arith.mulf %504, %498 : vector<2x256xf32>
    %506 = arith.addf %503, %505 : vector<2x256xf32>
    %507 = vector.extract_strided_slice %99 {offsets = [0, 100], sizes = [2, 256], strides = [1, 1]} : vector<2x358xf32> to vector<2x256xf32>
    %508 = vector.extract_strided_slice %100 {offsets = [0, 100], sizes = [2, 256], strides = [1, 1]} : vector<2x358xf32> to vector<2x256xf32>
    %c46 = arith.constant 46 : index
    %509 = memref.load %arg6[%c46] : memref<98xf32, #tpu.memory_space<smem>>
    %c95 = arith.constant 95 : index
    %510 = memref.load %arg6[%c95] : memref<98xf32, #tpu.memory_space<smem>>
    %511 = vector.broadcast %509 : f32 to vector<2x256xf32>
    %512 = arith.mulf %511, %507 : vector<2x256xf32>
    %513 = arith.addf %506, %512 : vector<2x256xf32>
    %514 = vector.broadcast %510 : f32 to vector<2x256xf32>
    %515 = arith.mulf %514, %508 : vector<2x256xf32>
    %516 = arith.addf %513, %515 : vector<2x256xf32>
    %c1_i32_61 = arith.constant 1 : i32
    %517 = vector.broadcast %c1_i32_61 : i32 to vector<1x256xi32>
    %518 = arith.addi %117, %517 : vector<1x256xi32>
    %c0_i32_62 = arith.constant 0 : i32
    %519 = vector.broadcast %c0_i32_62 : i32 to vector<1x256xi32>
    %520 = arith.cmpi sge, %518, %519 : vector<1x256xi32>
    %c1_i32_63 = arith.constant 1 : i32
    %521 = vector.broadcast %c1_i32_63 : i32 to vector<1x256xi32>
    %522 = arith.addi %117, %521 : vector<1x256xi32>
    %c16_i32_64 = arith.constant 16 : i32
    %523 = vector.broadcast %c16_i32_64 : i32 to vector<1x256xi32>
    %524 = arith.cmpi slt, %522, %523 : vector<1x256xi32>
    %525 = arith.andi %520, %524 : vector<1x256xi1>
    %cst_65 = arith.constant 0.000000e+00 : f32
    %526 = vector.shape_cast %525 : vector<1x256xi1> to vector<1x256xi1>
    %527 = vector.broadcast %526 : vector<1x256xi1> to vector<2x256xi1>
    %528 = vector.broadcast %cst_65 : f32 to vector<2x256xf32>
    %529 = arith.select %527, %516, %528 : vector<2x256xi1>, vector<2x256xf32>
    %530 = arith.addf %445, %529 : vector<2x256xf32>
    %cst_66 = arith.constant 0.000000e+00 : f32
    %531 = vector.broadcast %cst_66 : f32 to vector<2x256xf32>
    %532 = vector.extract_strided_slice %99 {offsets = [0, 5], sizes = [2, 256], strides = [1, 1]} : vector<2x358xf32> to vector<2x256xf32>
    %533 = vector.extract_strided_slice %100 {offsets = [0, 5], sizes = [2, 256], strides = [1, 1]} : vector<2x358xf32> to vector<2x256xf32>
    %c5 = arith.constant 5 : index
    %534 = memref.load %arg6[%c5] : memref<98xf32, #tpu.memory_space<smem>>
    %c54 = arith.constant 54 : index
    %535 = memref.load %arg6[%c54] : memref<98xf32, #tpu.memory_space<smem>>
    %536 = vector.broadcast %534 : f32 to vector<2x256xf32>
    %537 = arith.mulf %536, %532 : vector<2x256xf32>
    %538 = arith.addf %531, %537 : vector<2x256xf32>
    %539 = vector.broadcast %535 : f32 to vector<2x256xf32>
    %540 = arith.mulf %539, %533 : vector<2x256xf32>
    %541 = arith.addf %538, %540 : vector<2x256xf32>
    %542 = vector.extract_strided_slice %99 {offsets = [0, 21], sizes = [2, 256], strides = [1, 1]} : vector<2x358xf32> to vector<2x256xf32>
    %543 = vector.extract_strided_slice %100 {offsets = [0, 21], sizes = [2, 256], strides = [1, 1]} : vector<2x358xf32> to vector<2x256xf32>
    %c12 = arith.constant 12 : index
    %544 = memref.load %arg6[%c12] : memref<98xf32, #tpu.memory_space<smem>>
    %c61 = arith.constant 61 : index
    %545 = memref.load %arg6[%c61] : memref<98xf32, #tpu.memory_space<smem>>
    %546 = vector.broadcast %544 : f32 to vector<2x256xf32>
    %547 = arith.mulf %546, %542 : vector<2x256xf32>
    %548 = arith.addf %541, %547 : vector<2x256xf32>
    %549 = vector.broadcast %545 : f32 to vector<2x256xf32>
    %550 = arith.mulf %549, %543 : vector<2x256xf32>
    %551 = arith.addf %548, %550 : vector<2x256xf32>
    %552 = vector.extract_strided_slice %99 {offsets = [0, 37], sizes = [2, 256], strides = [1, 1]} : vector<2x358xf32> to vector<2x256xf32>
    %553 = vector.extract_strided_slice %100 {offsets = [0, 37], sizes = [2, 256], strides = [1, 1]} : vector<2x358xf32> to vector<2x256xf32>
    %c19 = arith.constant 19 : index
    %554 = memref.load %arg6[%c19] : memref<98xf32, #tpu.memory_space<smem>>
    %c68 = arith.constant 68 : index
    %555 = memref.load %arg6[%c68] : memref<98xf32, #tpu.memory_space<smem>>
    %556 = vector.broadcast %554 : f32 to vector<2x256xf32>
    %557 = arith.mulf %556, %552 : vector<2x256xf32>
    %558 = arith.addf %551, %557 : vector<2x256xf32>
    %559 = vector.broadcast %555 : f32 to vector<2x256xf32>
    %560 = arith.mulf %559, %553 : vector<2x256xf32>
    %561 = arith.addf %558, %560 : vector<2x256xf32>
    %562 = vector.extract_strided_slice %99 {offsets = [0, 53], sizes = [2, 256], strides = [1, 1]} : vector<2x358xf32> to vector<2x256xf32>
    %563 = vector.extract_strided_slice %100 {offsets = [0, 53], sizes = [2, 256], strides = [1, 1]} : vector<2x358xf32> to vector<2x256xf32>
    %c26 = arith.constant 26 : index
    %564 = memref.load %arg6[%c26] : memref<98xf32, #tpu.memory_space<smem>>
    %c75 = arith.constant 75 : index
    %565 = memref.load %arg6[%c75] : memref<98xf32, #tpu.memory_space<smem>>
    %566 = vector.broadcast %564 : f32 to vector<2x256xf32>
    %567 = arith.mulf %566, %562 : vector<2x256xf32>
    %568 = arith.addf %561, %567 : vector<2x256xf32>
    %569 = vector.broadcast %565 : f32 to vector<2x256xf32>
    %570 = arith.mulf %569, %563 : vector<2x256xf32>
    %571 = arith.addf %568, %570 : vector<2x256xf32>
    %572 = vector.extract_strided_slice %99 {offsets = [0, 69], sizes = [2, 256], strides = [1, 1]} : vector<2x358xf32> to vector<2x256xf32>
    %573 = vector.extract_strided_slice %100 {offsets = [0, 69], sizes = [2, 256], strides = [1, 1]} : vector<2x358xf32> to vector<2x256xf32>
    %c33 = arith.constant 33 : index
    %574 = memref.load %arg6[%c33] : memref<98xf32, #tpu.memory_space<smem>>
    %c82 = arith.constant 82 : index
    %575 = memref.load %arg6[%c82] : memref<98xf32, #tpu.memory_space<smem>>
    %576 = vector.broadcast %574 : f32 to vector<2x256xf32>
    %577 = arith.mulf %576, %572 : vector<2x256xf32>
    %578 = arith.addf %571, %577 : vector<2x256xf32>
    %579 = vector.broadcast %575 : f32 to vector<2x256xf32>
    %580 = arith.mulf %579, %573 : vector<2x256xf32>
    %581 = arith.addf %578, %580 : vector<2x256xf32>
    %582 = vector.extract_strided_slice %99 {offsets = [0, 85], sizes = [2, 256], strides = [1, 1]} : vector<2x358xf32> to vector<2x256xf32>
    %583 = vector.extract_strided_slice %100 {offsets = [0, 85], sizes = [2, 256], strides = [1, 1]} : vector<2x358xf32> to vector<2x256xf32>
    %c40 = arith.constant 40 : index
    %584 = memref.load %arg6[%c40] : memref<98xf32, #tpu.memory_space<smem>>
    %c89 = arith.constant 89 : index
    %585 = memref.load %arg6[%c89] : memref<98xf32, #tpu.memory_space<smem>>
    %586 = vector.broadcast %584 : f32 to vector<2x256xf32>
    %587 = arith.mulf %586, %582 : vector<2x256xf32>
    %588 = arith.addf %581, %587 : vector<2x256xf32>
    %589 = vector.broadcast %585 : f32 to vector<2x256xf32>
    %590 = arith.mulf %589, %583 : vector<2x256xf32>
    %591 = arith.addf %588, %590 : vector<2x256xf32>
    %592 = vector.extract_strided_slice %99 {offsets = [0, 101], sizes = [2, 256], strides = [1, 1]} : vector<2x358xf32> to vector<2x256xf32>
    %593 = vector.extract_strided_slice %100 {offsets = [0, 101], sizes = [2, 256], strides = [1, 1]} : vector<2x358xf32> to vector<2x256xf32>
    %c47 = arith.constant 47 : index
    %594 = memref.load %arg6[%c47] : memref<98xf32, #tpu.memory_space<smem>>
    %c96 = arith.constant 96 : index
    %595 = memref.load %arg6[%c96] : memref<98xf32, #tpu.memory_space<smem>>
    %596 = vector.broadcast %594 : f32 to vector<2x256xf32>
    %597 = arith.mulf %596, %592 : vector<2x256xf32>
    %598 = arith.addf %591, %597 : vector<2x256xf32>
    %599 = vector.broadcast %595 : f32 to vector<2x256xf32>
    %600 = arith.mulf %599, %593 : vector<2x256xf32>
    %601 = arith.addf %598, %600 : vector<2x256xf32>
    %c2_i32 = arith.constant 2 : i32
    %602 = vector.broadcast %c2_i32 : i32 to vector<1x256xi32>
    %603 = arith.addi %117, %602 : vector<1x256xi32>
    %c0_i32_67 = arith.constant 0 : i32
    %604 = vector.broadcast %c0_i32_67 : i32 to vector<1x256xi32>
    %605 = arith.cmpi sge, %603, %604 : vector<1x256xi32>
    %c2_i32_68 = arith.constant 2 : i32
    %606 = vector.broadcast %c2_i32_68 : i32 to vector<1x256xi32>
    %607 = arith.addi %117, %606 : vector<1x256xi32>
    %c16_i32_69 = arith.constant 16 : i32
    %608 = vector.broadcast %c16_i32_69 : i32 to vector<1x256xi32>
    %609 = arith.cmpi slt, %607, %608 : vector<1x256xi32>
    %610 = arith.andi %605, %609 : vector<1x256xi1>
    %cst_70 = arith.constant 0.000000e+00 : f32
    %611 = vector.shape_cast %610 : vector<1x256xi1> to vector<1x256xi1>
    %612 = vector.broadcast %611 : vector<1x256xi1> to vector<2x256xi1>
    %613 = vector.broadcast %cst_70 : f32 to vector<2x256xf32>
    %614 = arith.select %612, %601, %613 : vector<2x256xi1>, vector<2x256xf32>
    %615 = arith.addf %530, %614 : vector<2x256xf32>
    %cst_71 = arith.constant 0.000000e+00 : f32
    %616 = vector.broadcast %cst_71 : f32 to vector<2x256xf32>
    %617 = vector.extract_strided_slice %99 {offsets = [0, 6], sizes = [2, 256], strides = [1, 1]} : vector<2x358xf32> to vector<2x256xf32>
    %618 = vector.extract_strided_slice %100 {offsets = [0, 6], sizes = [2, 256], strides = [1, 1]} : vector<2x358xf32> to vector<2x256xf32>
    %c6 = arith.constant 6 : index
    %619 = memref.load %arg6[%c6] : memref<98xf32, #tpu.memory_space<smem>>
    %c55 = arith.constant 55 : index
    %620 = memref.load %arg6[%c55] : memref<98xf32, #tpu.memory_space<smem>>
    %621 = vector.broadcast %619 : f32 to vector<2x256xf32>
    %622 = arith.mulf %621, %617 : vector<2x256xf32>
    %623 = arith.addf %616, %622 : vector<2x256xf32>
    %624 = vector.broadcast %620 : f32 to vector<2x256xf32>
    %625 = arith.mulf %624, %618 : vector<2x256xf32>
    %626 = arith.addf %623, %625 : vector<2x256xf32>
    %627 = vector.extract_strided_slice %99 {offsets = [0, 22], sizes = [2, 256], strides = [1, 1]} : vector<2x358xf32> to vector<2x256xf32>
    %628 = vector.extract_strided_slice %100 {offsets = [0, 22], sizes = [2, 256], strides = [1, 1]} : vector<2x358xf32> to vector<2x256xf32>
    %c13 = arith.constant 13 : index
    %629 = memref.load %arg6[%c13] : memref<98xf32, #tpu.memory_space<smem>>
    %c62 = arith.constant 62 : index
    %630 = memref.load %arg6[%c62] : memref<98xf32, #tpu.memory_space<smem>>
    %631 = vector.broadcast %629 : f32 to vector<2x256xf32>
    %632 = arith.mulf %631, %627 : vector<2x256xf32>
    %633 = arith.addf %626, %632 : vector<2x256xf32>
    %634 = vector.broadcast %630 : f32 to vector<2x256xf32>
    %635 = arith.mulf %634, %628 : vector<2x256xf32>
    %636 = arith.addf %633, %635 : vector<2x256xf32>
    %637 = vector.extract_strided_slice %99 {offsets = [0, 38], sizes = [2, 256], strides = [1, 1]} : vector<2x358xf32> to vector<2x256xf32>
    %638 = vector.extract_strided_slice %100 {offsets = [0, 38], sizes = [2, 256], strides = [1, 1]} : vector<2x358xf32> to vector<2x256xf32>
    %c20 = arith.constant 20 : index
    %639 = memref.load %arg6[%c20] : memref<98xf32, #tpu.memory_space<smem>>
    %c69 = arith.constant 69 : index
    %640 = memref.load %arg6[%c69] : memref<98xf32, #tpu.memory_space<smem>>
    %641 = vector.broadcast %639 : f32 to vector<2x256xf32>
    %642 = arith.mulf %641, %637 : vector<2x256xf32>
    %643 = arith.addf %636, %642 : vector<2x256xf32>
    %644 = vector.broadcast %640 : f32 to vector<2x256xf32>
    %645 = arith.mulf %644, %638 : vector<2x256xf32>
    %646 = arith.addf %643, %645 : vector<2x256xf32>
    %647 = vector.extract_strided_slice %99 {offsets = [0, 54], sizes = [2, 256], strides = [1, 1]} : vector<2x358xf32> to vector<2x256xf32>
    %648 = vector.extract_strided_slice %100 {offsets = [0, 54], sizes = [2, 256], strides = [1, 1]} : vector<2x358xf32> to vector<2x256xf32>
    %c27 = arith.constant 27 : index
    %649 = memref.load %arg6[%c27] : memref<98xf32, #tpu.memory_space<smem>>
    %c76 = arith.constant 76 : index
    %650 = memref.load %arg6[%c76] : memref<98xf32, #tpu.memory_space<smem>>
    %651 = vector.broadcast %649 : f32 to vector<2x256xf32>
    %652 = arith.mulf %651, %647 : vector<2x256xf32>
    %653 = arith.addf %646, %652 : vector<2x256xf32>
    %654 = vector.broadcast %650 : f32 to vector<2x256xf32>
    %655 = arith.mulf %654, %648 : vector<2x256xf32>
    %656 = arith.addf %653, %655 : vector<2x256xf32>
    %657 = vector.extract_strided_slice %99 {offsets = [0, 70], sizes = [2, 256], strides = [1, 1]} : vector<2x358xf32> to vector<2x256xf32>
    %658 = vector.extract_strided_slice %100 {offsets = [0, 70], sizes = [2, 256], strides = [1, 1]} : vector<2x358xf32> to vector<2x256xf32>
    %c34 = arith.constant 34 : index
    %659 = memref.load %arg6[%c34] : memref<98xf32, #tpu.memory_space<smem>>
    %c83 = arith.constant 83 : index
    %660 = memref.load %arg6[%c83] : memref<98xf32, #tpu.memory_space<smem>>
    %661 = vector.broadcast %659 : f32 to vector<2x256xf32>
    %662 = arith.mulf %661, %657 : vector<2x256xf32>
    %663 = arith.addf %656, %662 : vector<2x256xf32>
    %664 = vector.broadcast %660 : f32 to vector<2x256xf32>
    %665 = arith.mulf %664, %658 : vector<2x256xf32>
    %666 = arith.addf %663, %665 : vector<2x256xf32>
    %667 = vector.extract_strided_slice %99 {offsets = [0, 86], sizes = [2, 256], strides = [1, 1]} : vector<2x358xf32> to vector<2x256xf32>
    %668 = vector.extract_strided_slice %100 {offsets = [0, 86], sizes = [2, 256], strides = [1, 1]} : vector<2x358xf32> to vector<2x256xf32>
    %c41 = arith.constant 41 : index
    %669 = memref.load %arg6[%c41] : memref<98xf32, #tpu.memory_space<smem>>
    %c90 = arith.constant 90 : index
    %670 = memref.load %arg6[%c90] : memref<98xf32, #tpu.memory_space<smem>>
    %671 = vector.broadcast %669 : f32 to vector<2x256xf32>
    %672 = arith.mulf %671, %667 : vector<2x256xf32>
    %673 = arith.addf %666, %672 : vector<2x256xf32>
    %674 = vector.broadcast %670 : f32 to vector<2x256xf32>
    %675 = arith.mulf %674, %668 : vector<2x256xf32>
    %676 = arith.addf %673, %675 : vector<2x256xf32>
    %677 = vector.extract_strided_slice %99 {offsets = [0, 102], sizes = [2, 256], strides = [1, 1]} : vector<2x358xf32> to vector<2x256xf32>
    %678 = vector.extract_strided_slice %100 {offsets = [0, 102], sizes = [2, 256], strides = [1, 1]} : vector<2x358xf32> to vector<2x256xf32>
    %c48 = arith.constant 48 : index
    %679 = memref.load %arg6[%c48] : memref<98xf32, #tpu.memory_space<smem>>
    %c97 = arith.constant 97 : index
    %680 = memref.load %arg6[%c97] : memref<98xf32, #tpu.memory_space<smem>>
    %681 = vector.broadcast %679 : f32 to vector<2x256xf32>
    %682 = arith.mulf %681, %677 : vector<2x256xf32>
    %683 = arith.addf %676, %682 : vector<2x256xf32>
    %684 = vector.broadcast %680 : f32 to vector<2x256xf32>
    %685 = arith.mulf %684, %678 : vector<2x256xf32>
    %686 = arith.addf %683, %685 : vector<2x256xf32>
    %c3_i32 = arith.constant 3 : i32
    %687 = vector.broadcast %c3_i32 : i32 to vector<1x256xi32>
    %688 = arith.addi %117, %687 : vector<1x256xi32>
    %c0_i32_72 = arith.constant 0 : i32
    %689 = vector.broadcast %c0_i32_72 : i32 to vector<1x256xi32>
    %690 = arith.cmpi sge, %688, %689 : vector<1x256xi32>
    %c3_i32_73 = arith.constant 3 : i32
    %691 = vector.broadcast %c3_i32_73 : i32 to vector<1x256xi32>
    %692 = arith.addi %117, %691 : vector<1x256xi32>
    %c16_i32_74 = arith.constant 16 : i32
    %693 = vector.broadcast %c16_i32_74 : i32 to vector<1x256xi32>
    %694 = arith.cmpi slt, %692, %693 : vector<1x256xi32>
    %695 = arith.andi %690, %694 : vector<1x256xi1>
    %cst_75 = arith.constant 0.000000e+00 : f32
    %696 = vector.shape_cast %695 : vector<1x256xi1> to vector<1x256xi1>
    %697 = vector.broadcast %696 : vector<1x256xi1> to vector<2x256xi1>
    %698 = vector.broadcast %cst_75 : f32 to vector<2x256xf32>
    %699 = arith.select %697, %686, %698 : vector<2x256xi1>, vector<2x256xf32>
    %700 = arith.addf %615, %699 : vector<2x256xf32>
    %701 = arith.negf %700 : vector<2x256xf32>
    %702 = math.exp %701 : vector<2x256xf32>
    %cst_76 = arith.constant 1.000000e+00 : f32
    %703 = vector.broadcast %cst_76 : f32 to vector<2x256xf32>
    %704 = arith.addf %703, %702 : vector<2x256xf32>
    %705 = arith.divf %703, %704 : vector<2x256xf32>
    %c0_77 = arith.constant 0 : index
    %c0_78 = arith.constant 0 : index
    %c0_79 = arith.constant 0 : index
    %706 = vector.load %arg1[%c0_77, %c0_78, %c0_79] : memref<2x32x256xf32, #tpu.memory_space<vmem>>, vector<1x32x256xf32>
    %707 = vector.shape_cast %706 : vector<1x32x256xf32> to vector<32x256xf32>
    %708 = vector.broadcast %41 : vector<32x1xf32> to vector<32x256xf32>
    %709 = arith.mulf %707, %708 : vector<32x256xf32>
    %710 = vector.extract_strided_slice %705 {offsets = [0, 0], sizes = [1, 256], strides = [1, 1]} : vector<2x256xf32> to vector<1x256xf32>
    %711 = vector.broadcast %710 : vector<1x256xf32> to vector<32x256xf32>
    %712 = arith.mulf %709, %711 : vector<32x256xf32>
    %c0_80 = arith.constant 0 : index
    %c0_81 = arith.constant 0 : index
    %c0_82 = arith.constant 0 : index
    %713 = vector.load %arg7[%c0_80, %c0_81, %c0_82] : memref<2x32x256xf32, #tpu.memory_space<vmem>>, vector<1x32x256xf32>
    %714 = vector.shape_cast %713 : vector<1x32x256xf32> to vector<32x256xf32>
    %715 = vector.shape_cast %712 : vector<32x256xf32> to vector<1x32x256xf32>
    tpu.vector_store %arg7[%c0_80, %c0_81, %c0_82], %715 {strides = array<i32>} : memref<2x32x256xf32, #tpu.memory_space<vmem>>, vector<1x32x256xf32>,
    %c1_83 = arith.constant 1 : index
    %c0_84 = arith.constant 0 : index
    %c0_85 = arith.constant 0 : index
    %716 = vector.load %arg1[%c1_83, %c0_84, %c0_85] : memref<2x32x256xf32, #tpu.memory_space<vmem>>, vector<1x32x256xf32>
    %717 = vector.shape_cast %716 : vector<1x32x256xf32> to vector<32x256xf32>
    %718 = vector.broadcast %87 : vector<32x1xf32> to vector<32x256xf32>
    %719 = arith.mulf %717, %718 : vector<32x256xf32>
    %720 = vector.extract_strided_slice %705 {offsets = [1, 0], sizes = [1, 256], strides = [1, 1]} : vector<2x256xf32> to vector<1x256xf32>
    %721 = vector.broadcast %720 : vector<1x256xf32> to vector<32x256xf32>
    %722 = arith.mulf %719, %721 : vector<32x256xf32>
    %c1_86 = arith.constant 1 : index
    %c0_87 = arith.constant 0 : index
    %c0_88 = arith.constant 0 : index
    %723 = vector.load %arg7[%c1_86, %c0_87, %c0_88] : memref<2x32x256xf32, #tpu.memory_space<vmem>>, vector<1x32x256xf32>
    %724 = vector.shape_cast %723 : vector<1x32x256xf32> to vector<32x256xf32>
    %725 = vector.shape_cast %722 : vector<32x256xf32> to vector<1x32x256xf32>
    tpu.vector_store %arg7[%c1_86, %c0_87, %c0_88], %725 {strides = array<i32>} : memref<2x32x256xf32, #tpu.memory_space<vmem>>, vector<1x32x256xf32>,
    return
  }
  func.func @transform_0(%arg0: i32) -> (i32, i32, i32) {
    %c0_i32 = arith.constant 0 : i32
    %c0_i32_0 = arith.constant 0 : i32
    %c0_i32_1 = arith.constant 0 : i32
    return %arg0, %c0_i32, %c0_i32_0 : i32, i32, i32
  }
  func.func @transform_1(%arg0: i32) -> (i32, i32) {
    %c0_i32 = arith.constant 0 : i32
    %c0_i32_0 = arith.constant 0 : i32
    %c0_i32_1 = arith.constant 0 : i32
    return %c0_i32, %c0_i32_0 : i32, i32
  }
  func.func @transform_2(%arg0: i32) -> (i32, i32) {
    %c0_i32 = arith.constant 0 : i32
    %c0_i32_0 = arith.constant 0 : i32
    %c0_i32_1 = arith.constant 0 : i32
    return %c0_i32, %c0_i32_0 : i32, i32
  }
  func.func @transform_3(%arg0: i32) -> (i32, i32) {
    %c0_i32 = arith.constant 0 : i32
    %c0_i32_0 = arith.constant 0 : i32
    %c0_i32_1 = arith.constant 0 : i32
    return %c0_i32, %c0_i32_0 : i32, i32
  }
  func.func @transform_4(%arg0: i32) -> (i32, i32) {
    %c0_i32 = arith.constant 0 : i32
    %c0_i32_0 = arith.constant 0 : i32
    %c0_i32_1 = arith.constant 0 : i32
    return %c0_i32, %c0_i32_0 : i32, i32
  }
  func.func @transform_5(%arg0: i32) -> i32 {
    %c0_i32 = arith.constant 0 : i32
    %c0_i32_0 = arith.constant 0 : i32
    return %c0_i32 : i32
  }
  func.func @transform_6(%arg0: i32) -> (i32, i32, i32) {
    %c0_i32 = arith.constant 0 : i32
    %c0_i32_0 = arith.constant 0 : i32
    %c0_i32_1 = arith.constant 0 : i32
    return %arg0, %c0_i32, %c0_i32_0 : i32, i32, i32
  }
}

</mosaic_0001>

<bundles_post_ra>
// kernel: tpu_custom_call.1
= control target key start
LH: loop header
LB: loop body
LE: loop exit
PB: predicated region body
PF: predicated region fallthrough
CT: control target
= control target key end

     0   :  { %11 = vsyncpa [#allocation3], 0  ;;  %s5057_s0 = inlined_call_operand.hbm [shape: f32[2,32,256], index: 0, kind: input, shape index: {}]   ;;  %s5058_s1 = inlined_call_operand.vmem [shape: f32[32,2], index: 1, kind: input, shape index: {}]   ;;  %s5059_s2 = inlined_call_operand.vmem [shape: f32[1,2], index: 2, kind: input, shape index: {}]   ;;  %s5060_s3 = inlined_call_operand.vmem [shape: f32[32,2], index: 3, kind: input, shape index: {}]   ;;  %s5061_s4 = inlined_call_operand.vmem [shape: f32[32,1], index: 4, kind: input, shape index: {}]   ;;  %s5062_s5 = inlined_call_operand.vmem [shape: f32[98], index: 5, kind: input, shape index: {}]   ;;  %s5063_s6 = inlined_call_operand.hbm [shape: f32[2,32,256], index: 6, kind: output, shape index: {}]  }
   0x1   :  { %12 = vsyncpa [#allocation5], 0 }
   0x2   :  { %13 = vsyncpa [#allocation4], 0  ;;  %s18_s23 = sshll.u32 %s5057_s0, 4  ;;  %s3123_s24 = smov [#allocation2]   ;;  %s19_s23 = int_to_ptr.hbm [resolvable:$true] %s18_s23 }
   0x3   :  { %s20_s25 = sshll.u32 %s3123_s24, 4  ;;  %s40_s28 = sshll.u32 %s5062_s5, 4  ;;  %s21_s25 = int_to_ptr.vmem [resolvable:$true] %s20_s25  ;;  %s41_s28 = int_to_ptr.vmem [resolvable:$true] %s40_s28 }
   0x4   :  { %s3124_s29 = smov 256   ;;  %s3125_s30 = smov 16  }
   0x5   :  { %26 = dma.hbm_to_vmem [thread:$0]  %s19_s23, 2048, %s21_s25, [#allocation3], %s3124_s29, %s3124_s29, %s3125_s30  }
   0x6   :  { %s3126_s7 = smov [#allocation6]  }
   0x7   :  { %43 = dma.vmem_to_smem %s41_s28, 16, %s3126_s7, [#allocation5]  }
   0x8   :  { %3117 = dma.done.wait [#allocation3], 2048  }
   0x9   :  { %3118 = vsyncadd [#allocation3], 4294965248 }
   0xa   :  { %3119 = dma.done.wait [#allocation5], 16  }
   0xb   :  { %3120 = vsyncadd [#allocation5], 4294967280 }
   0xc   :  { %52 = sfence }
   0xd   :  { %v3186_v0 = vld [vmem:[#allocation2 + $0x20] sm:$0xff]  ;;  %v3188_v1 = vld [vmem:[#allocation2 + $0x28] sm:$0xff]  ;;  %v3200_v7 = vld [vmem:[#allocation2 + $0x30] sm:$0xff]  ;;  %vm106_vm0 = vcmask 15360   ;;  %s2889_s7 = sld [smem:[#allocation6 + $0x7]]  ;;  %s3129_s5 = smov 112  }
   0xe   :  { %v3190_v2 = vld [vmem:[#allocation2] sm:$0xff]  ;;  %v80_v3 = vadd.f32 %v3188_v1, %v3186_v0  ;;  %v3194_v4 = vld [vmem:[#allocation2 + $0x8] sm:$0xff]  ;;  %v3202_v8 = vld [vmem:[#allocation2 + $0x38] sm:$0xff]  ;;  %v96_v17 = vmax.f32 %v3186_v0, %v3188_v1  ;;  %s2891_s0 = sld [smem:[#allocation6 + $0xe]]  ;;  %s3130_s9 = smov 96  }
   0xf   :  { %v74_v5 = vadd.f32 %v3194_v4, %v3190_v2  ;;  %v90_v6 = vmax.f32 %v3190_v2, %v3194_v4  ;;  %v3204_v9 = vld [vmem:[#allocation2 + $0x10] sm:$0xff]  ;;  %v3206_v10 = vld [vmem:[#allocation2 + $0x18] sm:$0xff]  ;;  %v83_v11 = vadd.f32 %v3202_v8, %v3200_v7  ;;  %v99_v16 = vmax.f32 %v3200_v7, %v3202_v8  ;;  %v3224_v19 = vld [vmem:[#allocation2 + $0x40] sm:$0xff]  ;;  %s2893_s8 = sld [smem:[#allocation6 + $0x15]]  ;;  %s3131_s11 = smov 80  }
  0x10   :  { %81 = vadd.xlane.f32.xlu1 %v80_v3  ;;  %v77_v12 = vadd.f32 %v3206_v10, %v3204_v9  ;;  %v93_v13 = vmax.f32 %v3204_v9, %v3206_v10  ;;  %v3214_v14 = vld [vmem:[#allocation2 + $0x50] sm:$0xff]  ;;  %v3216_v15 = vld [vmem:[#allocation2 + $0x58] sm:$0xff]  ;;  %v3226_v20 = vld [vmem:[#allocation2 + $0x48] sm:$0xff]  ;;  %s2895_s10 = sld [smem:[#allocation6 + $0x1c]]  ;;  %s3132_s13 = smov 64  }
  0x11   :  { %75 = vadd.xlane.f32.xlu0 %v74_v5  ;;  %91 = vmax.xlane.f32.xlu2 %v90_v6  ;;  %v341_v18 = vadd.f32 %v3216_v15, %v3214_v14  ;;  %v3228_v21 = vld [vmem:[#allocation2 + $0x60] sm:$0xff]  ;;  %v3230_v22 = vld [vmem:[#allocation2 + $0x68] sm:$0xff]  ;;  %v338_v23 = vadd.f32 %v3226_v20, %v3224_v19  ;;  %v354_v25 = vmax.f32 %v3224_v19, %v3226_v20  ;;  %v3238_v26 = vld [vmem:[#allocation2 + $0x70] sm:$0xff]  ;;  %s2897_s12 = sld [smem:[#allocation6 + $0x23]]  ;;  %s3133_s14 = smov 48  }
  0x12   :  { %v344_v24 = vadd.f32 %v3230_v22, %v3228_v21  ;;  %v3240_v27 = vld [vmem:[#allocation2 + $0x78] sm:$0xff]  ;;  %v360_v29 = vmax.f32 %v3228_v21, %v3230_v22  ;;  %v357_v30 = vmax.f32 %v3214_v14, %v3216_v15  ;;  %v3253_v36 = vld [vmem:[%s5058_s1] sm:$0xff]  ;;  %v3258_v38 = vld [vmem:[%s5058_s1 + $0x8] sm:$0xff]  ;;  %s3134_s15 = smov 32   ;;  %s2905_s16 = sld [smem:[#allocation6 + $0xf]] }
  0x13   :  { %v347_v28 = vadd.f32 %v3240_v27, %v3238_v26  ;;  %v363_v31 = vmax.f32 %v3238_v26, %v3240_v27  ;;  %v55_v45 = vld [vmem:[%s5058_s1 + $0x10] sm:$0xff]  ;;  %v3270_v47 = vld [vmem:[%s5058_s1 + $0x18] sm:$0xff]  ;;  %s2899_s1 = sld [smem:[#allocation6 + $0x2a]] }
  0x14   :  { %s2907_s17 = sld [smem:[#allocation6 + $0x16]] }
  0x15   :  { %s2909_s18 = sld [smem:[#allocation6 + $0x1d]] }
  0x16   :  { %s2911_s19 = sld [smem:[#allocation6 + $0x24]] }
  0x17   :  { %s2913_s20 = sld [smem:[#allocation6 + $0x2b]] }
  0x18   :  { %84 = vadd.xlane.f32.xlu1 %v83_v11  ;;  %s2917_s21 = sld [smem:[#allocation6 + $0x9]] }
  0x19   :  { %78 = vadd.xlane.f32.xlu0 %v77_v12  ;;  %94 = vmax.xlane.f32.xlu2 %v93_v13  ;;  %s2921_s22 = sld [smem:[#allocation6 + $0x17]] }
  0x1a   :  { %s2923_s23 = sld [smem:[#allocation6 + $0x1e]] }
  0x1b   :  { %s2925_s24 = sld [smem:[#allocation6 + $0x25]] }
  0x1c   :  { %s2927_s25 = sld [smem:[#allocation6 + $0x2c]] }
  0x1d   :  { %s2931_s26 = sld [smem:[#allocation6 + $0xa]] }
  0x1e   :  { %s2933_s27 = sld [smem:[#allocation6 + $0x11]] }
  0x1f   :  { %s2935_s28 = sld [smem:[#allocation6 + $0x18]] }
  0x20   :  { %100 = vmax.xlane.f32.xlu1 %v99_v16 }
  0x21   :  { %97 = vmax.xlane.f32.xlu0 %v96_v17  ;;  %342 = vadd.xlane.f32.xlu2 %v341_v18 }
  0x28   :  { %339 = vadd.xlane.f32.xlu1 %v338_v23 }
  0x29   :  { %345 = vadd.xlane.f32.xlu0 %v344_v24  ;;  %355 = vmax.xlane.f32.xlu2 %v354_v25 }
  0x30   :  { %348 = vadd.xlane.f32.xlu1 %v347_v28 }
  0x31   :  { %361 = vmax.xlane.f32.xlu2 %v360_v29 }
  0x38   :  { %358 = vmax.xlane.f32.xlu1 %v357_v30 }
  0x40   :  { %364 = vmax.xlane.f32.xlu1 %v363_v31 }
  0x83   :  { %v82_v32 = vpop.xlane.xlu1 %81 }
  0x84   :  { %v76_v33 = vpop.xlane.xlu0 %75  ;;  %v92_v34 = vpop.xlane.xlu2 %91  ;;  %v88_v59 = vmul.f32 0.00390625, %v82_v32 }
  0x85   :  { %v143_v40 = vmul.f32 %v92_v34, %v3253_v36  ;;  %v86_v46 = vmul.f32 0.00390625, %v76_v33 }
  0x86   :  { %v104_v5 = vmul.f32 %v88_v59, %v55_v45 }
  0x87   :  { %v147_v42 = vsel %vm106_vm0, %v143_v40, 0.0  ;;  %v102_v54 = vmul.f32 %v86_v46, %v3253_v36 }
  0x88   :  { %v110_v24 = vsel %vm106_vm0, %v104_v5, 0.0 }
  0x89   :  { %v107_v62 = vsel %vm106_vm0, %v102_v54, 0.0 }
  0x8b   :  { %v85_v35 = vpop.xlane.xlu1 %84 }
  0x8c   :  { %v79_v37 = vpop.xlane.xlu0 %78  ;;  %v95_v39 = vpop.xlane.xlu2 %94  ;;  %v89_v6 = vmul.f32 0.00390625, %v85_v35 }
  0x8d   :  { %v144_v41 = vmul.f32 %v95_v39, %v3258_v38  ;;  %v87_v48 = vmul.f32 0.00390625, %v79_v37 }
  0x8e   :  { %v105_v25 = vmul.f32 %v89_v6, %v3270_v47 }
  0x8f   :  { %v148_v43 = vsel %vm106_vm0, %v144_v41, 0.0  ;;  %v103_v55 = vmul.f32 %v87_v48, %v3258_v38  ;;  %v3287_v41 = vld [vmem:[%s5059_s2] sm:$0x1]  ;;  %s2903_s2 = sld [smem:[#allocation6 + $0x8]] }
  0x90   :  { %v149_v49 = vadd.f32 %v148_v43, %v147_v42  ;;  %v112_v37 = vsel %vm106_vm0, %v105_v25, 0.0 }
  0x91   :  { %v108_v63 = vsel %vm106_vm0, %v103_v55, 0.0 }
  0x92   :  { %v109_v12 = vadd.f32 %v108_v63, %v107_v62 }
  0x93   :  { %v101_v44 = vpop.xlane.xlu1 %100 }
  0x94   :  { %v98_v50 = vpop.xlane.xlu0 %97  ;;  %v146_v51 = vmul.f32 %v101_v44, %v3270_v47  ;;  %v343_v57 = vpop.xlane.xlu2 %342  ;;  %v111_v29 = vadd.f32 %v110_v24, %v109_v12 }
  0x95   :  { %v145_v52 = vmul.f32 %v98_v50, %v55_v45  ;;  %v351_v17 = vmul.f32 0.00390625, %v343_v57 }
  0x96   :  { %v152_v58 = vsel %vm106_vm0, %v146_v51, 0.0  ;;  %v113_v40 = vadd.f32 %v112_v37, %v111_v29 }
  0x97   :  { %v150_v53 = vsel %vm106_vm0, %v145_v52, 0.0  ;;  %v367_v33 = vmul.f32 %v351_v17, %v3258_v38 }
  0x98   :  { %v151_v56 = vadd.f32 %v150_v53, %v149_v49  ;;  %v114_v51 = vrot.slane %v113_v40, 4 }
  0x99   :  { %v371_v43 = vsel %vm106_vm0, %v367_v33, 0.0 }
  0x9a   :  { %v153_v60 = vadd.f32 %v152_v58, %v151_v56 }
  0x9b   :  { %v340_v61 = vpop.xlane.xlu1 %339 }
  0x9c   :  { %v154_v3 = vrot.slane %v153_v60, 4  ;;  %v350_v16 = vmul.f32 0.00390625, %v340_v61  ;;  %v356_v18 = vpop.xlane.xlu2 %355  ;;  %v346_v23 = vpop.xlane.xlu0 %345  ;;  %v3305_v61 = vld [vmem:[%s5060_s3 + $0x8] sm:$0xff] }
  0x9d   :  { %v352_v34 = vmul.f32 0.00390625, %v346_v23  ;;  %v406_v55 = vmul.f32 %v356_v18, %v3253_v36 }
  0x9e   :  { %v155_v11 = vadd.f32 %v154_v3, %v153_v60  ;;  %v366_v32 = vmul.f32 %v350_v16, %v3253_v36  ;;  %v3300_v60 = vld [vmem:[%s5060_s3 + $0x10] sm:$0xff]  ;;  %v3310_v36 = vld [vmem:[%s5060_s3] sm:$0xff]  ;;  %v115_v3 = vadd.f32 %v114_v51, %v113_v40 }
  0x9f   :  { %v368_v44 = vmul.f32 %v352_v34, %v55_v45  ;;  %v410_v6 = vsel %vm106_vm0, %v406_v55, 0.0 }
  0xa0   :  { %v156_v13 = vrot.slane %v155_v11, 2  ;;  %v370_v42 = vsel %vm106_vm0, %v366_v32, 0.0  ;;  %v116_v24 = vrot.slane %v115_v3, 2 }
  0xa1   :  { %v372_v52 = vadd.f32 %v371_v43, %v370_v42  ;;  %v373_v54 = vsel %vm106_vm0, %v368_v44, 0.0 }
  0xa2   :  { %v157_v28 = vadd.f32 %v156_v13, %v155_v11  ;;  %v117_v34 = vadd.f32 %v116_v24, %v115_v3 }
  0xa3   :  { %v349_v30 = vpop.xlane.xlu1 %348  ;;  %v374_v5 = vadd.f32 %v373_v54, %v372_v52 }
  0xa4   :  { %v158_v31 = vrot.slane %v157_v28, 1  ;;  %v353_v35 = vmul.f32 0.00390625, %v349_v30  ;;  %v362_v49 = vpop.xlane.xlu2 %361 }
  0xa5   :  { %v408_v59 = vmul.f32 %v362_v49, %v55_v45 }
  0xa6   :  { %v159_v39 = vadd.f32 %v158_v31, %v157_v28  ;;  %v369_v48 = vmul.f32 %v353_v35, %v3270_v47  ;;  %v3325_v28 = vld [vmem:[%s5060_s3 + $0x18] sm:$0xff]  ;;  %s2919_s3 = sld [smem:[#allocation6 + $0x10]] }
  0xa7   :  { %v413_v18 = vsel %vm106_vm0, %v408_v59, 0.0 }
  0xa8   :  { %v160_v46 = vadd.f32 %v159_v39, %v3287_v41  ;;  %v375_v58 = vsel %vm106_vm0, %v369_v48, 0.0 }
  0xa9   :  { %v376_v16 = vadd.f32 %v375_v58, %v374_v5 }
  0xaa   :  { %v161_v50 = vmax.f32 %v160_v46, 0.0 }
  0xab   :  { %v359_v53 = vpop.xlane.xlu1 %358  ;;  %v377_v29 = vrot.slane %v376_v16, 4 }
  0xac   :  { %v407_v56 = vmul.f32 %v359_v53, %v3258_v38  ;;  %v162_v57 = vperm.slane %v161_v50, 0 }
  0xad   :  { %v378_v35 = vadd.f32 %v377_v29, %v376_v16 }
  0xae   :  { %v411_v38 = vsel %vm106_vm0, %v407_v56, 0.0  ;;  %v165_v62 = vmul.f32 %v162_v57, %v3300_v60  ;;  %v164_v45 = vmul.f32 %v162_v57, %v3305_v61  ;;  %v163_v63 = vmul.f32 %v162_v57, %v3310_v36 }
  0xaf   :  { %v412_v17 = vadd.f32 %v411_v38, %v410_v6  ;;  %v166_v31 = vmul.f32 %v162_v57, %v3325_v28  ;;  %v379_v42 = vrot.slane %v378_v35, 2 }
  0xb0   :  { %v173_v11 = vsel %vm106_vm0, %v165_v62, 0.0  ;;  %v170_v12 = vsel %vm106_vm0, %v164_v45, 0.0  ;;  %v167_v13 = vsel %vm106_vm0, %v163_v63, 0.0 }
  0xb1   :  { %174 = vadd.xlane.f32.xlu2 %v173_v11  ;;  %171 = vadd.xlane.f32.xlu1 %v170_v12  ;;  %v414_v30 = vadd.f32 %v413_v18, %v412_v17  ;;  %v176_v39 = vsel %vm106_vm0, %v166_v31, 0.0  ;;  %v380_v48 = vadd.f32 %v379_v42, %v378_v35 }
  0xb2   :  { %168 = vadd.xlane.f32.xlu0 %v167_v13 }
  0xb3   :  { %v365_v23 = vpop.xlane.xlu1 %364  ;;  %v381_v52 = vrot.slane %v380_v48, 1 }
  0xb4   :  { %v409_v25 = vmul.f32 %v365_v23, %v3270_v47  ;;  %v118_v47 = vrot.slane %v117_v34, 1 }
  0xb5   :  { %v382_v56 = vadd.f32 %v381_v52, %v380_v48 }
  0xb6   :  { %v415_v32 = vsel %vm106_vm0, %v409_v25, 0.0  ;;  %v119_v46 = vadd.f32 %v118_v47, %v117_v34 }
  0xb7   :  { %v416_v33 = vadd.f32 %v415_v32, %v414_v30  ;;  %v383_v5 = vadd.f32 %v382_v56, %v3287_v41  ;;  %v3127_v56 = vmov 0  }
  0xb8   :  { %v120_v51 = vadd.f32 %v119_v46, %v3287_v41  ;;  %v62_v46 = vld [vmem:[%s5061_s4] sm:$0xff]  ;;  %3008 = vset.pattern.permute.xlu0 %v3127_v56  ;;  %3006 = vset.pattern.permute.xlu1 %v3127_v56 }
  0xb9   :  { %v417_v37 = vrot.slane %v416_v33, 4  ;;  %v384_v12 = vmax.f32 %v383_v5, 0.0  ;;  %3007 = vset.pattern.permute.xlu2 %v3127_v56 }
  0xba   :  { %177 = vadd.xlane.f32.xlu0 %v176_v39  ;;  %v121_v55 = vmax.f32 %v120_v51, 0.0 }
  0xbb   :  { %v418_v40 = vadd.f32 %v417_v37, %v416_v33  ;;  %v385_v18 = vperm.slane %v384_v12, 0 }
  0xbc   :  { %v122_v62 = vperm.slane %v121_v55, 0 }
  0xbd   :  { %v419_v43 = vrot.slane %v418_v40, 2  ;;  %v386_v32 = vmul.f32 %v385_v18, %v3310_v36  ;;  %v387_v33 = vmul.f32 %v385_v18, %v3305_v61  ;;  %v389_v35 = vmul.f32 %v385_v18, %v3325_v28 }
  0xbe   :  { %v125_v6 = vmul.f32 %v122_v62, %v3300_v60  ;;  %v123_v11 = vmul.f32 %v122_v62, %v3310_v36  ;;  %v126_v24 = vmul.f32 %v122_v62, %v3325_v28  ;;  %v124_v25 = vmul.f32 %v122_v62, %v3305_v61 }
  0xbf   :  { %v420_v44 = vadd.f32 %v419_v43, %v418_v40  ;;  %v390_v34 = vsel %vm106_vm0, %v386_v32, 0.0  ;;  %v399_v37 = vsel %vm106_vm0, %v389_v35, 0.0 }
  0xc0   :  { %v133_v16 = vsel %vm106_vm0, %v125_v6, 0.0  ;;  %v127_v17 = vsel %vm106_vm0, %v123_v11, 0.0  ;;  %v136_v30 = vsel %vm106_vm0, %v126_v24, 0.0  ;;  %v130_v31 = vsel %vm106_vm0, %v124_v25, 0.0 }
  0xc1   :  { %v421_v49 = vrot.slane %v420_v44, 1 }
  0xc3   :  { %v422_v50 = vadd.f32 %v421_v49, %v420_v44 }
  0xc5   :  { %v423_v53 = vadd.f32 %v422_v50, %v3287_v41  ;;  %v388_v41 = vmul.f32 %v385_v18, %v3300_v60 }
  0xc7   :  { %v424_v54 = vmax.f32 %v423_v53, 0.0  ;;  %v396_v29 = vsel %vm106_vm0, %v388_v41, 0.0 }
  0xc9   :  { %v425_v57 = vperm.slane %v424_v54, 0 }
  0xcb   :  { %v428_v58 = vmul.f32 %v425_v57, %v3300_v60  ;;  %v427_v59 = vmul.f32 %v425_v57, %v3305_v61  ;;  %v426_v38 = vmul.f32 %v425_v57, %v3310_v36  ;;  %v429_v13 = vmul.f32 %v425_v57, %v3325_v28  ;;  %v64_v61 = vld [vmem:[%s5061_s4 + $0x10] sm:$0xff] }
  0xcc   :  { %v393_v60 = vsel %vm106_vm0, %v387_v33, 0.0 }
  0xcd   :  { %v436_v45 = vsel %vm106_vm0, %v428_v58, 0.0  ;;  %v433_v63 = vsel %vm106_vm0, %v427_v59, 0.0  ;;  %v430_v3 = vsel %vm106_vm0, %v426_v38, 0.0  ;;  %v439_v23 = vsel %vm106_vm0, %v429_v13, 0.0  ;;  %v65_v59 = vld [vmem:[%s5061_s4 + $0x18] sm:$0xff]  ;;  %v63_v38 = vld [vmem:[%s5061_s4 + $0x8] sm:$0xff] }
  0xce   :  { %437 = vadd.xlane.f32.xlu2 %v436_v45  ;;  %434 = vadd.xlane.f32.xlu1 %v433_v63  ;;  %s3128_s4 = smov 51  }
  0xcf   :  { %431 = vadd.xlane.f32.xlu0 %v430_v3 }
  0xd6   :  { %134 = vadd.xlane.f32.xlu1 %v133_v16  ;;  %128 = vadd.xlane.f32.xlu2 %v127_v17 }
  0xd7   :  { %440 = vadd.xlane.f32.xlu0 %v439_v23 }
  0xde   :  { %397 = vadd.xlane.f32.xlu1 %v396_v29  ;;  %137 = vadd.xlane.f32.xlu2 %v136_v30 }
  0xdf   :  { %131 = vadd.xlane.f32.xlu0 %v130_v31 }
  0xe6   :  { %391 = vadd.xlane.f32.xlu2 %v390_v34 }
  0xe7   :  { %394 = vadd.xlane.f32.xlu0 %v393_v60 }
  0xee   :  { %400 = vadd.xlane.f32.xlu2 %v399_v37 }
 0x124   :  { %v175_v40 = vpop.xlane.xlu2 %174  ;;  %v172_v47 = vpop.xlane.xlu1 %171 }
 0x125   :  { %v169_v39 = vpop.xlane.xlu0 %168  ;;  %v181_v49 = vadd.f32 %v175_v40, %v64_v61  ;;  %v180_v12 = vadd.f32 %v172_v47, %v63_v38 }
 0x126   :  { %v179_v50 = vadd.f32 %v169_v39, %v62_v46 }
 0x12d   :  { %v178_v42 = vpop.xlane.xlu0 %177 }
 0x12e   :  { %v182_v63 = vadd.f32 %v178_v42, %v65_v59 }
 0x141   :  { %v438_v43 = vpop.xlane.xlu2 %437  ;;  %v435_v44 = vpop.xlane.xlu1 %434 }
 0x142   :  { %v432_v36 = vpop.xlane.xlu0 %431  ;;  %v444_v3 = vadd.f32 %v438_v43, %v64_v61  ;;  %v443_v35 = vadd.f32 %v435_v44, %v63_v38 }
 0x143   :  { %v442_v33 = vadd.f32 %v432_v36, %v62_v46 }
 0x149   :  { %v135_v48 = vpop.xlane.xlu1 %134  ;;  %v129_v28 = vpop.xlane.xlu2 %128 }
 0x14a   :  { %v441_v51 = vpop.xlane.xlu0 %440  ;;  %v141_v52 = vadd.f32 %v135_v48, %v64_v61  ;;  %v139_v53 = vadd.f32 %v129_v28, %v62_v46 }
 0x14c   :  { %v185_v54 = vadd.f32 %v181_v49, %v141_v52  ;;  %v183_v55 = vadd.f32 %v179_v50, %v139_v53  ;;  %v445_v49 = vadd.f32 %v441_v51, %v65_v59 }
 0x14e   :  { %v2882_v57 = vmul.f32 -1.442695, %v185_v54  ;;  %v2880_v58 = vmul.f32 -1.442695, %v183_v55 }
 0x150   :  { %3009 = vpow2.f32 %v2882_v57 }
 0x151   :  { %3011 = vpow2.f32 %v2880_v58  ;;  %v398_v62 = vpop.xlane.xlu1 %397  ;;  %v138_v45 = vpop.xlane.xlu2 %137 }
 0x152   :  { %v404_v5 = vadd.f32 %v398_v62, %v64_v61  ;;  %v132_v6 = vpop.xlane.xlu0 %131  ;;  %v142_v11 = vadd.f32 %v138_v45, %v65_v59 }
 0x153   :  { %v140_v13 = vadd.f32 %v132_v6, %v63_v38 }
 0x154   :  { %v448_v16 = vadd.f32 %v444_v3, %v404_v5  ;;  %v186_v17 = vadd.f32 %v182_v63, %v142_v11 }
 0x155   :  { %v184_v18 = vadd.f32 %v180_v12, %v140_v13 }
 0x156   :  { %v3010_v23 = vpop.eup %3009  ;;  %v2886_v41 = vmul.f32 -1.442695, %v448_v16  ;;  %v2883_v31 = vmul.f32 -1.442695, %v186_v17 }
 0x157   :  { %v3012_v24 = vpop.eup %3011  ;;  %v201_v25 = vadd.f32 1.0, %v3010_v23  ;;  %v2881_v29 = vmul.f32 -1.442695, %v184_v18 }
 0x158   :  { %v199_v30 = vadd.f32 1.0, %v3012_v24  ;;  %3013 = vpow2.f32 %v2886_v41 }
 0x159   :  { %3015 = vrcp.f32 %v201_v25  ;;  %v392_v32 = vpop.xlane.xlu2 %391  ;;  %v242_v44 = vand.u32 2147483647, %v201_v25  ;;  %v244_v52 = vand.u32 2147483648, %v201_v25  ;;  %vm238_vm2 = vweird.f32 %v201_v25 }
 0x15a   :  { %3017 = vrcp.f32 %v199_v30  ;;  %v395_v34 = vpop.xlane.xlu0 %394  ;;  %v402_v60 = vadd.f32 %v392_v32, %v62_v46  ;;  %v212_v62 = vand.u32 2147483647, %v199_v30  ;;  %v214_v51 = vand.u32 2147483648, %v199_v30 }
 0x15b   :  { %3019 = vpow2.f32 %v2881_v29  ;;  %v403_v37 = vadd.f32 %v395_v34, %v63_v38  ;;  %vm3378_vm4 = vcmp.eq.f32.partialorder %v242_v44, 8.507059e+37  ;;  %vm208_vm5 = vweird.f32 %v199_v30 }
 0x15c   :  { %3021 = vpow2.f32 %v2883_v31  ;;  %v446_v39 = vadd.f32 %v442_v33, %v402_v60  ;;  %v245_v16 = vor.u32 1.1754944e-38, %v244_v52  ;;  %vm213_vm7 = vcmp.eq.f32.partialorder %v212_v62, 8.507059e+37 }
 0x15d   :  { %v447_v40 = vadd.f32 %v443_v35, %v403_v37  ;;  %v215_v41 = vor.u32 1.1754944e-38, %v214_v51 }
 0x15e   :  { %v3014_v47 = vpop.eup %3013  ;;  %v2884_v42 = vmul.f32 -1.442695, %v446_v39 }
 0x15f   :  { %v3016_v43 = vpop.eup %3015  ;;  %v3369_v61 = vadd.f32 1.0, %v3014_v47  ;;  %v2885_v48 = vmul.f32 -1.442695, %v447_v40 }
 0x160   :  { %v3018_v28 = vpop.eup %3017  ;;  %3023 = vpow2.f32 %v2884_v42  ;;  %v234_v50 = vmul.f32 %v3016_v43, %v201_v25  ;;  %vm239_vm1 = vweird.f32 %v3016_v43 }
 0x161   :  { %v3020_v36 = vpop.eup %3019  ;;  %3025 = vrcp.f32 %v3369_v61  ;;  %v401_v46 = vpop.xlane.xlu2 %400  ;;  %v204_v53 = vmul.f32 %v3018_v28, %v199_v30  ;;  %vm209_vm3 = vweird.f32 %v3018_v28  ;;  %vm240_vm6 = vmor %vm238_vm2, %vm239_vm1  ;;  %v507_v34 = vand.u32 2147483648, %v3369_v61 }
 0x162   :  { %v3022_v54 = vpop.eup %3021  ;;  %v3372_v55 = vadd.f32 1.0, %v3020_v36  ;;  %3027 = vpow2.f32 %v2885_v48  ;;  %v405_v56 = vadd.f32 %v401_v46, %v65_v59  ;;  %v235_v57 = vsub.f32 1.0, %v234_v50  ;;  %vm210_vm8 = vmor %vm208_vm5, %vm209_vm3 }
 0x163   :  { %v3374_v58 = vadd.f32 1.0, %v3022_v54  ;;  %v205_v38 = vsub.f32 1.0, %v204_v53  ;;  %v505_v39 = vand.u32 2147483647, %v3369_v61  ;;  %vm501_vm10 = vweird.f32 %v3369_v61 }
 0x164   :  { %3029 = vrcp.f32 %v3372_v55  ;;  %v449_v45 = vadd.f32 %v445_v49, %v405_v56  ;;  %v236_v63 = vmul.f32 %v3016_v43, %v235_v57  ;;  %v508_v48 = vor.u32 1.1754944e-38, %v507_v34 }
 0x165   :  { %3031 = vrcp.f32 %v3374_v58  ;;  %v206_v3 = vmul.f32 %v3018_v28, %v205_v38  ;;  %v227_v44 = vand.u32 2147483647, %v3372_v55  ;;  %vm506_vm13 = vcmp.eq.f32.partialorder %v505_v39, 8.507059e+37 }
 0x166   :  { %v3024_v5 = vpop.eup %3023  ;;  %v2887_v6 = vmul.f32 -1.442695, %v449_v45  ;;  %v237_v11 = vadd.f32 %v3016_v43, %v236_v63  ;;  %vm223_vm14 = vweird.f32 %v3372_v55  ;;  %v259_v59 = vand.u32 2147483648, %v3374_v58 }
 0x167   :  { %v3026_v12 = vpop.eup %3025  ;;  %v3382_v13 = vadd.f32 1.0, %v3024_v5  ;;  %v207_v17 = vadd.f32 %v3018_v28, %v206_v3  ;;  %vm228_vm0 = vcmp.eq.f32.partialorder %v227_v44, 8.507059e+37 }
 0x168   :  { %v3028_v18 = vpop.eup %3027  ;;  %3033 = vpow2.f32 %v2887_v6  ;;  %v241_v23 = vsel %vm240_vm6, %v3016_v43, %v237_v11  ;;  %v497_v24 = vmul.f32 %v3026_v12, %v3369_v61  ;;  %vm502_vm9 = vweird.f32 %v3026_v12 }
 0x169   :  { %v3386_v25 = vadd.f32 1.0, %v3028_v18  ;;  %3035 = vrcp.f32 %v3382_v13  ;;  %v246_v29 = vsel %vm3378_vm4, %v245_v16, %v241_v23  ;;  %v211_v30 = vsel %vm210_vm8, %v3018_v28, %v207_v17  ;;  %vm503_vm11 = vmor %vm501_vm10, %vm502_vm9 }
 0x16a   :  { %v3030_v31 = vpop.eup %3029  ;;  %275 = vperm.xlu0 %3008, %v246_v29   ;;  %v216_v32 = vsel %vm213_vm7, %v215_v41, %v211_v30  ;;  %v498_v33 = vsub.f32 1.0, %v497_v24  ;;  %v229_v28 = vand.u32 2147483648, %v3372_v55  ;;  %v475_v5 = vand.u32 2147483647, %v3382_v13 }
 0x16b   :  { %v3392_v60 = vpop.eup %3031  ;;  %3037 = vrcp.f32 %v3386_v25  ;;  %265 = vperm.xlu1 %3006, %v216_v32   ;;  %v219_v35 = vmul.f32 %v3030_v31, %v3372_v55  ;;  %vm224_vm12 = vweird.f32 %v3030_v31  ;;  %v477_v55 = vand.u32 2147483648, %v3382_v13 }
 0x16c   :  { %v499_v37 = vmul.f32 %v3026_v12, %v498_v33  ;;  %v249_v40 = vmul.f32 %v3392_v60, %v3374_v58  ;;  %vm225_vm15 = vmor %vm223_vm14, %vm224_vm12  ;;  %v230_v38 = vor.u32 1.1754944e-38, %v229_v28  ;;  %vm254_vm2 = vweird.f32 %v3392_v60 }
 0x16d   :  { %v220_v47 = vsub.f32 1.0, %v219_v35  ;;  %vm471_vm3 = vweird.f32 %v3382_v13  ;;  %vm253_vm4 = vweird.f32 %v3374_v58  ;;  %v257_v17 = vand.u32 2147483647, %v3374_v58 }
 0x16e   :  { %v3034_v42 = vpop.eup %3033  ;;  %v500_v43 = vadd.f32 %v3026_v12, %v499_v37  ;;  %v250_v49 = vsub.f32 1.0, %v249_v40  ;;  %v478_v18 = vor.u32 1.1754944e-38, %v477_v55  ;;  %vm255_vm6 = vmor %vm253_vm4, %vm254_vm2  ;;  %vm476_vm7 = vcmp.eq.f32.partialorder %v475_v5, 8.507059e+37 }
 0x16f   :  { %v3036_v50 = vpop.eup %3035  ;;  %v3401_v36 = vadd.f32 1.0, %v3034_v42  ;;  %v221_v46 = vmul.f32 %v3030_v31, %v220_v47  ;;  %vm258_vm8 = vcmp.eq.f32.partialorder %v257_v17, 8.507059e+37  ;;  %vm486_vm12 = vweird.f32 %v3386_v25 }
 0x170   :  { %v504_v52 = vsel %vm503_vm11, %v3026_v12, %v500_v43  ;;  %v467_v61 = vmul.f32 %v3036_v50, %v3382_v13  ;;  %v251_v57 = vmul.f32 %v3392_v60, %v250_v49  ;;  %vm472_vm1 = vweird.f32 %v3036_v50 }
 0x171   :  { %v3406_v53 = vpop.eup %3037  ;;  %3039 = vrcp.f32 %v3401_v36  ;;  %v509_v54 = vsel %vm506_vm13, %v508_v48, %v504_v52  ;;  %v222_v56 = vadd.f32 %v3030_v31, %v221_v46  ;;  %vm473_vm5 = vmor %vm471_vm3, %vm472_vm1  ;;  %v522_v32 = vand.u32 2147483648, %v3401_v36 }
 0x172   :  { %538 = vperm.xlu0 %3008, %v509_v54   ;;  %v468_v62 = vsub.f32 1.0, %v467_v61  ;;  %v482_v51 = vmul.f32 %v3406_v53, %v3386_v25  ;;  %v252_v6 = vadd.f32 %v3392_v60, %v251_v57  ;;  %v520_v34 = vand.u32 2147483647, %v3401_v36 }
 0x173   :  { %v226_v45 = vsel %vm225_vm15, %v3030_v31, %v222_v56  ;;  %v260_v31 = vor.u32 1.1754944e-38, %v259_v59  ;;  %vm487_vm10 = vweird.f32 %v3406_v53  ;;  %vm516_vm11 = vweird.f32 %v3401_v36 }
 0x174   :  { %v231_v63 = vsel %vm228_vm0, %v230_v38, %v226_v45  ;;  %v469_v3 = vmul.f32 %v3036_v50, %v468_v62  ;;  %v483_v11 = vsub.f32 1.0, %v482_v51  ;;  %v256_v24 = vsel %vm255_vm6, %v3392_v60, %v252_v6  ;;  %vm488_vm14 = vmor %vm486_vm12, %vm487_vm10 }
 0x175   :  { %270 = vperm.xlu2 %3007, %v231_v63   ;;  %v261_v33 = vsel %vm258_vm8, %v260_v31, %v256_v24  ;;  %v492_v60 = vand.u32 2147483648, %v3386_v25  ;;  %v490_v39 = vand.u32 2147483647, %v3386_v25  ;;  %v523_v40 = vor.u32 1.1754944e-38, %v522_v32 }
 0x176   :  { %v470_v12 = vadd.f32 %v3036_v50, %v469_v3  ;;  %v484_v30 = vmul.f32 %v3406_v53, %v483_v11  ;;  %vm521_vm15 = vcmp.eq.f32.partialorder %v520_v34, 8.507059e+37  ;;  %vm592_vm1 = vcmask 1040384  }
 0x177   :  { %v3040_v16 = vpop.eup %3039  ;;  %v493_v48 = vor.u32 1.1754944e-38, %v492_v60  ;;  %vm491_vm0 = vcmp.eq.f32.partialorder %v490_v39, 8.507059e+37  ;;  %vm603_vm2 = vcmask 416768   ;;  %vm676_vm3 = vcmask 916480  }
 0x178   :  { %v474_v23 = vsel %vm473_vm5, %v3036_v50, %v470_v12  ;;  %v512_v41 = vmul.f32 %v3040_v16, %v3401_v36  ;;  %vm517_vm9 = vweird.f32 %v3040_v16  ;;  %v485_v35 = vadd.f32 %v3406_v53, %v484_v30 }
 0x179   :  { %v479_v29 = vsel %vm476_vm7, %v478_v18, %v474_v23  ;;  %vm518_vm13 = vmor %vm516_vm11, %vm517_vm9  ;;  %vm717_vm4 = vcmask 785408   ;;  %vm758_vm5 = vcmask 654336   ;;  %vm799_vm6 = vcmask 523264  }
 0x17a   :  { %528 = vperm.xlu1 %3006, %v479_v29   ;;  %v513_v13 = vsub.f32 1.0, %v512_v41  ;;  %v489_v42 = vsel %vm488_vm14, %v3406_v53, %v485_v35  ;;  %vm840_vm7 = vcmask 392192   ;;  %vm881_vm8 = vcmask 261120  }
 0x17b   :  { %v494_v28 = vsel %vm491_vm0, %v493_v48, %v489_v42  ;;  %vm1224_vm9 = vcmask 1039360   ;;  %vm1534_vm14 = vcmask 1031168  }
 0x17c   :  { %v514_v58 = vmul.f32 %v3040_v16, %v513_v13 }
 0x17d   :  { %280 = vperm.xlu2 %3007, %v261_v33  }
 0x17e   :  { %v515_v37 = vadd.f32 %v3040_v16, %v514_v58 }
 0x180   :  { %v519_v47 = vsel %vm518_vm13, %v3040_v16, %v515_v37 }
 0x181   :  { %v524_v43 = vsel %vm521_vm15, %v523_v40, %v519_v47 }
 0x182   :  { %543 = vperm.xlu1 %3006, %v524_v43  }
 0x185   :  { %533 = vperm.xlu2 %3007, %v494_v28  }
 0x1cf   :  { %v271_v49 = vpop.permute.xlu2 %270 }
 0x1d0   :  { %v3433_v36 = vmul.f32 %v271_v49, %v3204_v9  ;;  %v3457_v57 = vmul.f32 %v271_v49, %v3206_v10 }
 0x1d2   :  { %5139 = vst [vmem:[#allocation11_spill] sm:$0xff] %v3433_v36 }
 0x1d3   :  { %5146 = vst [vmem:[#allocation18_spill] sm:$0xff] %v3457_v57 }
 0x1d7   :  { %v281_v52 = vpop.permute.xlu2 %280 }
 0x1d8   :  { %v3451_v56 = vmul.f32 %v281_v52, %v3200_v7 }
 0x1da   :  { %5144 = vst [vmem:[#allocation16_spill] sm:$0xff] %v3451_v56  ;;  %v292_v38 = vmax.f32 %v3433_v36, %v3451_v56 }
 0x1dc   :  { %v276_v46 = vpop.permute.xlu0 %275 }
 0x1dd   :  { %v266_v50 = vpop.permute.xlu1 %265  ;;  %v3441_v61 = vmul.f32 %v276_v46, %v3186_v0  ;;  %v3444_v53 = vmul.f32 %v276_v46, %v3188_v1 }
 0x1de   :  { %v3436_v25 = vmul.f32 %v266_v50, %v3190_v2  ;;  %v3447_v54 = vmul.f32 %v266_v50, %v3194_v4  ;;  %v3454_v2 = vmul.f32 %v281_v52, %v3202_v8 }
 0x1df   :  { %5141 = vst [vmem:[#allocation13_spill] sm:$0xff] %v3441_v61  ;;  %v3470_v51 = vpop.permute.xlu2 %533 }
 0x1e0   :  { %5140 = vst [vmem:[#allocation12_spill] sm:$0xff] %v3436_v25  ;;  %v309_v44 = vadd.f32 %v3433_v36, %v3436_v25  ;;  %v291_v0 = vmax.f32 %v3436_v25, %v3441_v61  ;;  %v300_v1 = vmax.f32 %v3447_v54, %v3444_v53  ;;  %v301_v7 = vmax.f32 %v3457_v57, %v3454_v2 }
 0x1e1   :  { %5142 = vst [vmem:[#allocation14_spill] sm:$0xff] %v3444_v53  ;;  %v318_v8 = vadd.f32 %v3457_v57, %v3447_v54  ;;  %v548_v6 = vmul.f32 %v3470_v51, %v3214_v14  ;;  %v549_v11 = vmul.f32 %v3470_v51, %v3216_v15 }
 0x1e2   :  { %5143 = vst [vmem:[#allocation15_spill] sm:$0xff] %v3447_v54  ;;  %v310_v9 = vadd.f32 %v309_v44, %v3441_v61  ;;  %v293_v62 = vmax.f32 %v291_v0, %v292_v38  ;;  %v302_v10 = vmax.f32 %v300_v1, %v301_v7 }
 0x1e3   :  { %5145 = vst [vmem:[#allocation17_spill] sm:$0xff] %v3454_v2  ;;  %v319_v5 = vadd.f32 %v318_v8, %v3444_v53 }
 0x1e4   :  { %v311_v4 = vadd.f32 %v310_v9, %v3451_v56  ;;  %5147 = vst [vmem:[#allocation19_spill] sm:$0xff] %v3470_v51  ;;  %v294_v59 = vrot.slane %v293_v62, 4  ;;  %v303_v12 = vrot.slane %v302_v10, 4  ;;  %v3483_v16 = vpop.permute.xlu0 %538 }
 0x1e5   :  { %5149 = vst [vmem:[#allocation21_spill] sm:$0xff] %v3483_v16  ;;  %v551_v41 = vmul.f32 %v3483_v16, %v3230_v22 }
 0x1e6   :  { %v312_v55 = vrot.slane %v311_v4, 4  ;;  %v304_v14 = vmax.f32 %v302_v10, %v303_v12  ;;  %v295_v15 = vmax.f32 %v293_v62, %v294_v59 }
 0x1e8   :  { %v313_v17 = vadd.f32 %v312_v55, %v311_v4  ;;  %v305_v37 = vrot.slane %v304_v14, 2  ;;  %v296_v40 = vrot.slane %v295_v15, 2 }
 0x1ea   :  { %v314_v29 = vrot.slane %v313_v17, 2  ;;  %v306_v46 = vmax.f32 %v304_v14, %v305_v37  ;;  %v297_v52 = vmax.f32 %v295_v15, %v296_v40  ;;  %v704_v40 = vstv %s2891_s0  ;;  %s2890_s0 = sld [smem:[#allocation6 + $0x38]] }
 0x1ec   :  { %v3472_v45 = vpop.permute.xlu1 %528  ;;  %v315_v39 = vadd.f32 %v314_v29, %v313_v17  ;;  %v307_v10 = vrot.slane %v306_v46, 1  ;;  %v298_v55 = vrot.slane %v297_v52, 1 }
 0x1ed   :  { %5148 = vst [vmem:[#allocation20_spill] sm:$0xff] %v3472_v45  ;;  %v546_v63 = vmul.f32 %v3472_v45, %v3224_v19  ;;  %v547_v3 = vmul.f32 %v3472_v45, %v3226_v20  ;;  %v320_v19 = vadd.f32 %v319_v5, %v3454_v2  ;;  %v550_v20 = vmul.f32 %v3483_v16, %v3228_v21 }
 0x1ee   :  { %v316_v44 = vrot.slane %v315_v39, 1 }
 0x1ef   :  { %v572_v18 = vadd.f32 %v548_v6, %v546_v63  ;;  %v581_v23 = vadd.f32 %v549_v11, %v547_v3  ;;  %v554_v33 = vmax.f32 %v546_v63, %v550_v20  ;;  %v563_v58 = vmax.f32 %v547_v3, %v551_v41 }
 0x1f0   :  { %v321_v34 = vrot.slane %v320_v19, 4  ;;  %v317_v5 = vadd.f32 %v316_v44, %v315_v39  ;;  %v827_v44 = vstv %s2897_s12  ;;  %s2896_s12 = sld [smem:[#allocation6 + $0x4d]] }
 0x1f1   :  { %v573_v13 = vadd.f32 %v572_v18, %v550_v20  ;;  %v582_v32 = vadd.f32 %v581_v23, %v551_v41  ;;  %v308_v23 = vmax.f32 %v306_v46, %v307_v10 }
 0x1f2   :  { %v327_v14 = vmul.f32 0.03125, %v317_v5 }
 0x1f4   :  { %v3490_v24 = vpop.permute.xlu1 %543 }
 0x1f5   :  { %5150 = vst [vmem:[#allocation22_spill] sm:$0xff] %v3490_v24  ;;  %v552_v30 = vmul.f32 %v3490_v24, %v3238_v26  ;;  %v553_v31 = vmul.f32 %v3490_v24, %v3240_v27  ;;  %v322_v26 = vadd.f32 %v321_v34, %v320_v19  ;;  %v299_v19 = vmax.f32 %v297_v52, %v298_v55 }
 0x1f7   :  { %v555_v21 = vmax.f32 %v548_v6, %v552_v30  ;;  %v564_v35 = vmax.f32 %v549_v11, %v553_v31  ;;  %v574_v60 = vadd.f32 %v573_v13, %v552_v30  ;;  %v583_v22 = vadd.f32 %v582_v32, %v553_v31 }
 0x1f8   :  { %v323_v38 = vrot.slane %v322_v26, 2 }
 0x1f9   :  { %v575_v47 = vrot.slane %v574_v60, 4  ;;  %v584_v42 = vrot.slane %v583_v22, 4  ;;  %v565_v43 = vmax.f32 %v563_v58, %v564_v35  ;;  %v556_v48 = vmax.f32 %v554_v33, %v555_v21 }
 0x1fa   :  { %v324_v59 = vadd.f32 %v323_v38, %v322_v26 }
 0x1fb   :  { %v566_v28 = vrot.slane %v565_v43, 4  ;;  %v576_v49 = vadd.f32 %v575_v47, %v574_v60  ;;  %v557_v27 = vrot.slane %v556_v48, 4  ;;  %v585_v50 = vadd.f32 %v584_v42, %v583_v22 }
 0x1fc   :  { %v325_v30 = vrot.slane %v324_v59, 1  ;;  %v663_v60 = vstv %s2889_s7  ;;  %v745_v42 = vstv %s2893_s8  ;;  %s2939_s7 = sld [smem:[#allocation6 + $0x26]] }
 0x1fd   :  { %v567_v9 = vmax.f32 %v565_v43, %v566_v28  ;;  %v577_v0 = vrot.slane %v576_v49, 2  ;;  %v558_v1 = vmax.f32 %v556_v48, %v557_v27  ;;  %v586_v4 = vrot.slane %v585_v50, 2  ;;  %s2892_s8 = sld [smem:[#allocation6 + $0x3f]] }
 0x1fe   :  { %v326_v58 = vadd.f32 %v325_v30, %v324_v59  ;;  %v786_v48 = vstv %s2895_s10  ;;  %v1161_v30 = vstv %s2913_s20  ;;  %s2894_s10 = sld [smem:[#allocation6 + $0x46]] }
 0x1ff   :  { %v568_v7 = vrot.slane %v567_v9, 2  ;;  %v578_v8 = vadd.f32 %v577_v0, %v576_v49  ;;  %v559_v62 = vrot.slane %v558_v1, 2  ;;  %v587_v63 = vadd.f32 %v586_v4, %v585_v50  ;;  %s2910_s20 = sld [smem:[#allocation6 + $0x4e]] }
 0x200   :  { %v328_v21 = vmul.f32 0.03125, %v326_v58 }
 0x201   :  { %v569_v3 = vmax.f32 %v567_v9, %v568_v7  ;;  %v579_v6 = vrot.slane %v578_v8, 1  ;;  %v560_v11 = vmax.f32 %v558_v1, %v559_v62  ;;  %v588_v20 = vrot.slane %v587_v63, 1 }
 0x202   :  { %v868_v1 = vstv %s2899_s1  ;;  %s2941_s1 = sld [smem:[#allocation6 + $0x2d]] }
 0x203   :  { %v570_v12 = vrot.slane %v569_v3, 1  ;;  %v580_v17 = vadd.f32 %v579_v6, %v578_v8  ;;  %v561_v18 = vrot.slane %v560_v11, 1  ;;  %v589_v33 = vadd.f32 %v588_v20, %v587_v63 }
 0x204   :  { %v941_v8 = vstv %s2903_s2  ;;  %v985_v63 = vstv %s2905_s16  ;;  %s2898_s2 = sld [smem:[#allocation6 + $0x54]] }
 0x205   :  { %v571_v41 = vmax.f32 %v569_v3, %v570_v12  ;;  %v590_v29 = vmul.f32 0.03125, %v580_v17  ;;  %v562_v15 = vmax.f32 %v560_v11, %v561_v18  ;;  %v591_v34 = vmul.f32 0.03125, %v589_v33  ;;  %s2900_s16 = sld [smem:[#allocation6 + $0x5b]] }
 0x206   :  { %v1029_v11 = vstv %s2907_s17  ;;  %v1073_v18 = vstv %s2909_s18  ;;  %v1251_v33 = vstv %s2917_s21  ;;  %s2904_s17 = sld [smem:[#allocation6 + $0x39]] }
 0x207   :  { %v594_v31 = vsel %vm592_vm1, %v308_v23, %v571_v41  ;;  %v595_v13 = vsel %vm592_vm1, %v327_v14, %v590_v29  ;;  %v593_v32 = vsel %vm592_vm1, %v299_v19, %v562_v15  ;;  %v596_v35 = vsel %vm592_vm1, %v328_v21, %v591_v34  ;;  %s2906_s18 = sld [smem:[#allocation6 + $0x40]] }
 0x208   :  { %601 = vrot.lane.b32.xlu2 %v594_v31, %s3128_s4  ;;  %612 = vrot.lane.b32.xlu1 %v595_v13, %s3128_s4  ;;  %v1117_v41 = vstv %s2911_s19  ;;  %s2908_s19 = sld [smem:[#allocation6 + $0x47]]  ;;  %vm1832_vm1 = vcmask 1022976  }
 0x209   :  { %599 = vrot.lane.b32.xlu0 %v593_v32, %s3128_s4  ;;  %s2912_s21 = sld [smem:[#allocation6 + $0x55]] }
 0x20b   :  { %v888_v51 = vstv %s2900_s16  ;;  %s2948_s16 = sld [smem:[#allocation6 + $0x43]] }
 0x20c   :  { %v962_v45 = vstv %s2904_s17  ;;  %s2949_s17 = sld [smem:[#allocation6 + $0x19]] }
 0x20d   :  { %v1006_v57 = vstv %s2906_s18  ;;  %s2950_s18 = sld [smem:[#allocation6 + $0x4a]] }
 0x20e   :  { %v1050_v25 = vstv %s2908_s19  ;;  %s2951_s19 = sld [smem:[#allocation6 + $0x20]] }
 0x211   :  { %614 = vrot.lane.b32.xlu0 %v596_v35, %s3128_s4  ;;  %v1295_v35 = vstv %s2919_s3  ;;  %s2937_s4 = sld [smem:[#allocation6 + $0x1f]] }
 0x212   :  { %s2914_s3 = sld [smem:[#allocation6 + $0x5c]] }
 0x262   :  { %v602_v22 = vpop.permute.xlu2 %601 }
 0x263   :  { %v3501_v37 = vsel %vm603_vm2, %v602_v22, 0.0 }
 0x264   :  { %5151 = vst [vmem:[#allocation23_spill] sm:$0xff] %v3501_v37  ;;  %v666_v39 = vmul.f32 %v663_v60, %v3501_v37  ;;  %v707_v47 = vmul.f32 %v704_v40, %v3501_v37  ;;  %v748_v43 = vmul.f32 %v745_v42, %v3501_v37  ;;  %v789_v27 = vmul.f32 %v786_v48, %v3501_v37 }
 0x265   :  { %v830_v52 = vmul.f32 %v827_v44, %v3501_v37  ;;  %v871_v4 = vmul.f32 %v868_v1, %v3501_v37  ;;  %v944_v62 = vmul.f32 %v941_v8, %v3501_v37  ;;  %v988_v3 = vmul.f32 %v985_v63, %v3501_v37 }
 0x266   :  { %674 = vrot.lane.b32.xlu0 %v666_v39, %s3129_s5  ;;  %v1032_v59 = vmul.f32 %v1029_v11, %v3501_v37  ;;  %v1076_v23 = vmul.f32 %v1073_v18, %v3501_v37  ;;  %v1120_v14 = vmul.f32 %v1117_v41, %v3501_v37  ;;  %v1164_v31 = vmul.f32 %v1161_v30, %v3501_v37 }
 0x267   :  { %v1254_v58 = vmul.f32 %v1251_v33, %v3501_v37 }
 0x26e   :  { %715 = vrot.lane.b32.xlu0 %v707_v47, %s3130_s9  ;;  %v1339_v47 = vstv %s2921_s22  ;;  %s2918_s22 = sld [smem:[#allocation6 + $0x3a]] }
 0x276   :  { %756 = vrot.lane.b32.xlu0 %v748_v43, %s3131_s11 }
 0x27b   :  { %v600_v26 = vpop.permute.xlu0 %599 }
 0x27c   :  { %v3510_v28 = vsel %vm603_vm2, %v600_v26, %v602_v22  ;;  %v3513_v49 = vsel %vm603_vm2, 0.0, %v600_v26 }
 0x27d   :  { %5152 = vst [vmem:[#allocation24_spill] sm:$0xff] %v3513_v49  ;;  %v664_v50 = vmul.f32 %v663_v60, %v3513_v49  ;;  %v665_v46 = vmul.f32 %v663_v60, %v3510_v28  ;;  %v705_v9 = vmul.f32 %v704_v40, %v3513_v49  ;;  %v706_v0 = vmul.f32 %v704_v40, %v3510_v28 }
 0x27e   :  { %797 = vrot.lane.b32.xlu0 %v789_v27, %s3132_s13  ;;  %v746_v38 = vmul.f32 %v745_v42, %v3513_v49  ;;  %v747_v7 = vmul.f32 %v745_v42, %v3510_v28  ;;  %v787_v10 = vmul.f32 %v786_v48, %v3513_v49  ;;  %v788_v55 = vmul.f32 %v786_v48, %v3510_v28 }
 0x27f   :  { %670 = vrot.lane.b32.xlu2 %v664_v50, %s3129_s5  ;;  %672 = vrot.lane.b32.xlu1 %v665_v46, %s3129_s5  ;;  %v828_v5 = vmul.f32 %v827_v44, %v3513_v49  ;;  %v829_v6 = vmul.f32 %v827_v44, %v3510_v28  ;;  %v869_v12 = vmul.f32 %v868_v1, %v3513_v49  ;;  %v1383_v50 = vstv %s2923_s23  ;;  %s2920_s23 = sld [smem:[#allocation6 + $0x41]] }
 0x280   :  { %v870_v17 = vmul.f32 %v868_v1, %v3510_v28  ;;  %v942_v19 = vmul.f32 %v941_v8, %v3513_v49  ;;  %v943_v20 = vmul.f32 %v941_v8, %v3510_v28  ;;  %v986_v29 = vmul.f32 %v985_v63, %v3513_v49 }
 0x281   :  { %v987_v15 = vmul.f32 %v985_v63, %v3510_v28  ;;  %v1030_v13 = vmul.f32 %v1029_v11, %v3513_v49  ;;  %v1031_v32 = vmul.f32 %v1029_v11, %v3510_v28  ;;  %v1074_v34 = vmul.f32 %v1073_v18, %v3513_v49 }
 0x282   :  { %v1075_v21 = vmul.f32 %v1073_v18, %v3510_v28  ;;  %v1298_v60 = vmul.f32 %v1295_v35, %v3501_v37  ;;  %v1118_v22 = vmul.f32 %v1117_v41, %v3513_v49  ;;  %v1119_v39 = vmul.f32 %v1117_v41, %v3510_v28 }
 0x283   :  { %v3581_v40 = vpop.permute.xlu0 %614  ;;  %v1342_v42 = vmul.f32 %v1339_v47, %v3501_v37  ;;  %v1162_v43 = vmul.f32 %v1161_v30, %v3513_v49  ;;  %v1163_v48 = vmul.f32 %v1161_v30, %v3510_v28  ;;  %v1386_v46 = vmul.f32 %v1383_v50, %v3501_v37 }
 0x284   :  { %v1252_v44 = vmul.f32 %v1251_v33, %v3513_v49  ;;  %v1427_v1 = vstv %s2925_s24  ;;  %v1384_v18 = vmul.f32 %v1383_v50, %v3513_v49  ;;  %s2922_s24 = sld [smem:[#allocation6 + $0x48]] }
 0x285   :  { %v1429_v30 = vmul.f32 %v1427_v1, %v3510_v28 }
 0x286   :  { %838 = vrot.lane.b32.xlu0 %v830_v52, %s3133_s14  ;;  %v1253_v52 = vmul.f32 %v1251_v33, %v3510_v28  ;;  %v1649_v33 = vstv %s2935_s28  ;;  %s2932_s28 = sld [smem:[#allocation6 + $0x3b]] }
 0x287   :  { %711 = vrot.lane.b32.xlu2 %v705_v9, %s3130_s9  ;;  %713 = vrot.lane.b32.xlu1 %v706_v0, %s3130_s9 }
 0x28e   :  { %879 = vrot.lane.b32.xlu0 %v871_v4, %s3134_s15  ;;  %v1430_v4 = vmul.f32 %v1427_v1, %v3501_v37 }
 0x28f   :  { %752 = vrot.lane.b32.xlu2 %v746_v38, %s3131_s11  ;;  %754 = vrot.lane.b32.xlu1 %v747_v7, %s3131_s11  ;;  %v1296_v38 = vmul.f32 %v1295_v35, %v3513_v49  ;;  %v1297_v7 = vmul.f32 %v1295_v35, %v3510_v28 }
 0x296   :  { %952 = vrot.lane.b32.xlu0 %v944_v62, %s3129_s5  ;;  %v3611_v62 = vpop.permute.xlu1 %612 }
 0x297   :  { %793 = vrot.lane.b32.xlu2 %v787_v10, %s3132_s13  ;;  %795 = vrot.lane.b32.xlu1 %v788_v55, %s3132_s13  ;;  %v1471_v55 = vstv %s2927_s25  ;;  %s2924_s25 = sld [smem:[#allocation6 + $0x4f]] }
 0x298   :  { %v1474_v63 = vmul.f32 %v1471_v55, %v3501_v37 }
 0x29e   :  { %996 = vrot.lane.b32.xlu0 %v988_v3, %s3130_s9  ;;  %v1340_v3 = vmul.f32 %v1339_v47, %v3513_v49 }
 0x29f   :  { %834 = vrot.lane.b32.xlu2 %v828_v5, %s3133_s14  ;;  %836 = vrot.lane.b32.xlu1 %v829_v6, %s3133_s14  ;;  %v1341_v5 = vmul.f32 %v1339_v47, %v3510_v28 }
 0x2a6   :  { %1040 = vrot.lane.b32.xlu0 %v1032_v59, %s3131_s11 }
 0x2a7   :  { %875 = vrot.lane.b32.xlu2 %v869_v12, %s3134_s15  ;;  %877 = vrot.lane.b32.xlu1 %v870_v17, %s3134_s15  ;;  %v1561_v12 = vstv %s2931_s26  ;;  %s2926_s26 = sld [smem:[#allocation6 + $0x56]] }
 0x2a8   :  { %v1564_v17 = vmul.f32 %v1561_v12, %v3501_v37 }
 0x2ae   :  { %1084 = vrot.lane.b32.xlu0 %v1076_v23, %s3132_s13  ;;  %v1385_v23 = vmul.f32 %v1383_v50, %v3510_v28 }
 0x2af   :  { %948 = vrot.lane.b32.xlu2 %v942_v19, %s3129_s5  ;;  %950 = vrot.lane.b32.xlu1 %v943_v20, %s3129_s5 }
 0x2b6   :  { %1128 = vrot.lane.b32.xlu0 %v1120_v14, %s3133_s14  ;;  %v1605_v14 = vstv %s2933_s27  ;;  %s2928_s27 = sld [smem:[#allocation6 + $0x5d]] }
 0x2b7   :  { %992 = vrot.lane.b32.xlu2 %v986_v29, %s3130_s9  ;;  %994 = vrot.lane.b32.xlu1 %v987_v15, %s3130_s9  ;;  %v1608_v29 = vmul.f32 %v1605_v14, %v3501_v37  ;;  %v1428_v15 = vmul.f32 %v1427_v1, %v3513_v49  ;;  %v1606_v1 = vmul.f32 %v1605_v14, %v3513_v49 }
 0x2be   :  { %1172 = vrot.lane.b32.xlu0 %v1164_v31, %s3134_s15 }
 0x2bf   :  { %1036 = vrot.lane.b32.xlu2 %v1030_v13, %s3131_s11  ;;  %1038 = vrot.lane.b32.xlu1 %v1031_v32, %s3131_s11 }
 0x2c6   :  { %1262 = vrot.lane.b32.xlu0 %v1254_v58, %s3129_s5  ;;  %v1652_v58 = vmul.f32 %v1649_v33, %v3501_v37 }
 0x2c7   :  { %1080 = vrot.lane.b32.xlu2 %v1074_v34, %s3132_s13  ;;  %1082 = vrot.lane.b32.xlu1 %v1075_v21, %s3132_s13  ;;  %v1472_v34 = vmul.f32 %v1471_v55, %v3513_v49  ;;  %v1473_v21 = vmul.f32 %v1471_v55, %v3510_v28 }
 0x2ce   :  { %1306 = vrot.lane.b32.xlu0 %v1298_v60, %s3130_s9 }
 0x2cf   :  { %1124 = vrot.lane.b32.xlu2 %v1118_v22, %s3133_s14  ;;  %1126 = vrot.lane.b32.xlu1 %v1119_v39, %s3133_s14  ;;  %v1693_v39 = vstv %s2937_s4  ;;  %s2934_s4 = sld [smem:[#allocation6 + $0x42]] }
 0x2d0   :  { %v1696_v47 = vmul.f32 %v1693_v39, %v3501_v37 }
 0x2d6   :  { %1350 = vrot.lane.b32.xlu0 %v1342_v42, %s3131_s11  ;;  %v1562_v42 = vmul.f32 %v1561_v12, %v3513_v49 }
 0x2d7   :  { %1168 = vrot.lane.b32.xlu2 %v1162_v43, %s3134_s15  ;;  %1170 = vrot.lane.b32.xlu1 %v1163_v48, %s3134_s15  ;;  %v1563_v43 = vmul.f32 %v1561_v12, %v3510_v28  ;;  %v1650_v12 = vmul.f32 %v1649_v33, %v3513_v49 }
 0x2d8   :  { %v3589_v26 = vpop.permute.xlu0 %674 }
 0x2d9   :  { %5153 = vst [vmem:[#allocation25_spill] sm:$0xff] %v3589_v26  ;;  %v3591_v27 = vpop.permute.xlu2 %670 }
 0x2da   :  { %5154 = vst [vmem:[#allocation26_spill] sm:$0xff] %v3591_v27 }
 0x2de   :  { %1394 = vrot.lane.b32.xlu0 %v1386_v46, %s3132_s13 }
 0x2df   :  { %1258 = vrot.lane.b32.xlu2 %v1252_v44, %s3129_s5  ;;  %1260 = vrot.lane.b32.xlu1 %v1253_v52, %s3129_s5  ;;  %v1737_v44 = vstv %s2939_s7  ;;  %s2936_s7 = sld [smem:[#allocation6 + $0x49]] }
 0x2e0   :  { %v3599_v9 = vpop.permute.xlu0 %715  ;;  %v1740_v52 = vmul.f32 %v1737_v44, %v3501_v37 }
 0x2e1   :  { %5155 = vst [vmem:[#allocation27_spill] sm:$0xff] %v3599_v9  ;;  %v3601_v0 = vpop.permute.xlu2 %711 }
 0x2e2   :  { %5156 = vst [vmem:[#allocation28_spill] sm:$0xff] %v3601_v0 }
 0x2e6   :  { %1438 = vrot.lane.b32.xlu0 %v1430_v4, %s3133_s14  ;;  %v1607_v4 = vmul.f32 %v1605_v14, %v3510_v28 }
 0x2e7   :  { %1302 = vrot.lane.b32.xlu2 %v1296_v38, %s3130_s9  ;;  %1304 = vrot.lane.b32.xlu1 %v1297_v7, %s3130_s9  ;;  %v3685_v7 = vsel %vm603_vm2, %v3581_v40, 0.0 }
 0x2e8   :  { %v3609_v8 = vpop.permute.xlu0 %756  ;;  %5171 = vst [vmem:[#allocation43_spill] sm:$0xff] %v3685_v7  ;;  %v891_v2 = vmul.f32 %v888_v51, %v3685_v7  ;;  %v965_v53 = vmul.f32 %v962_v45, %v3685_v7  ;;  %v1009_v54 = vmul.f32 %v1006_v57, %v3685_v7 }
 0x2e9   :  { %5157 = vst [vmem:[#allocation29_spill] sm:$0xff] %v3609_v8  ;;  %v3613_v10 = vpop.permute.xlu2 %752 }
 0x2ea   :  { %5158 = vst [vmem:[#allocation30_spill] sm:$0xff] %v3613_v10 }
 0x2ee   :  { %1482 = vrot.lane.b32.xlu0 %v1474_v63, %s3134_s15 }
 0x2ef   :  { %1346 = vrot.lane.b32.xlu2 %v1340_v3, %s3131_s11  ;;  %1348 = vrot.lane.b32.xlu1 %v1341_v5, %s3131_s11  ;;  %v683_v3 = vstv %s2890_s0  ;;  %s2938_s0 = sld [smem:[#allocation6 + $0x50]] }
 0x2f0   :  { %v3621_v6 = vpop.permute.xlu0 %797  ;;  %v686_v5 = vmul.f32 %v683_v3, %v3685_v7 }
 0x2f1   :  { %5159 = vst [vmem:[#allocation31_spill] sm:$0xff] %v3621_v6  ;;  %v3623_v11 = vpop.permute.xlu2 %793  ;;  %v3625_v59 = vpop.permute.xlu1 %672 }
 0x2f2   :  { %5160 = vst [vmem:[#allocation32_spill] sm:$0xff] %v3623_v11 }
 0x2f3   :  { %5161 = vst [vmem:[#allocation33_spill] sm:$0xff] %v3625_v59  ;;  %v1360_v59 = vstv %s2922_s24  ;;  %s2916_s24 = sld [smem:[#allocation6 + $0x33]] }
 0x2f6   :  { %1572 = vrot.lane.b32.xlu0 %v1564_v17, %s3129_s5  ;;  %v1651_v17 = vmul.f32 %v1649_v33, %v3510_v28  ;;  %v1695_v33 = vmul.f32 %v1693_v39, %v3510_v28 }
 0x2f7   :  { %1390 = vrot.lane.b32.xlu2 %v1384_v18, %s3132_s13  ;;  %1392 = vrot.lane.b32.xlu1 %v1385_v23, %s3132_s13 }
 0x2f8   :  { %v3633_v19 = vpop.permute.xlu0 %838 }
 0x2f9   :  { %5162 = vst [vmem:[#allocation34_spill] sm:$0xff] %v3633_v19  ;;  %v3635_v20 = vpop.permute.xlu2 %834  ;;  %v3637_v41 = vpop.permute.xlu1 %713 }
 0x2fa   :  { %5163 = vst [vmem:[#allocation35_spill] sm:$0xff] %v3635_v20 }
 0x2fb   :  { %5164 = vst [vmem:[#allocation36_spill] sm:$0xff] %v3637_v41  ;;  %v1316_v41 = vstv %s2920_s23  ;;  %s2915_s23 = sld [smem:[#allocation6 + $0x2]] }
 0x2fc   :  { %v1319_v26 = vmul.f32 %v1316_v41, %v3685_v7 }
 0x2fe   :  { %1616 = vrot.lane.b32.xlu0 %v1608_v29, %s3130_s9  ;;  %v724_v29 = vstv %s2892_s8  ;;  %s2940_s8 = sld [smem:[#allocation6 + $0x57]] }
 0x2ff   :  { %1434 = vrot.lane.b32.xlu2 %v1428_v15, %s3133_s14  ;;  %1436 = vrot.lane.b32.xlu1 %v1429_v30, %s3133_s14  ;;  %v727_v15 = vmul.f32 %v724_v29, %v3685_v7  ;;  %v1694_v30 = vmul.f32 %v1693_v39, %v3513_v49  ;;  %v1739_v39 = vmul.f32 %v1737_v44, %v3510_v28 }
 0x300   :  { %v3645_v31 = vpop.permute.xlu0 %879 }
 0x301   :  { %5165 = vst [vmem:[#allocation37_spill] sm:$0xff] %v3645_v31  ;;  %v3647_v13 = vpop.permute.xlu2 %875  ;;  %v3649_v32 = vpop.permute.xlu1 %754  ;;  %v1053_v31 = vmul.f32 %v1050_v25, %v3685_v7 }
 0x302   :  { %5166 = vst [vmem:[#allocation38_spill] sm:$0xff] %v3647_v13 }
 0x303   :  { %5167 = vst [vmem:[#allocation39_spill] sm:$0xff] %v3649_v32  ;;  %v1272_v32 = vstv %s2918_s22  ;;  %s2953_s22 = sld [smem:[#allocation6 + $0x27]] }
 0x304   :  { %v1275_v9 = vmul.f32 %v1272_v32, %v3685_v7 }
 0x306   :  { %1660 = vrot.lane.b32.xlu0 %v1652_v58, %s3131_s11 }
 0x307   :  { %1478 = vrot.lane.b32.xlu2 %v1472_v34, %s3134_s15  ;;  %1480 = vrot.lane.b32.xlu1 %v1473_v21, %s3134_s15 }
 0x308   :  { %v3657_v35 = vpop.permute.xlu0 %952 }
 0x309   :  { %v3659_v60 = vpop.permute.xlu2 %948  ;;  %v3661_v22 = vpop.permute.xlu1 %795 }
 0x30a   :  { %5168 = vst [vmem:[#allocation40_spill] sm:$0xff] %v3661_v22  ;;  %v1182_v22 = vstv %s2914_s3  ;;  %s2902_s3 = sld [smem:[#allocation6 + $0x32]] }
 0x30b   :  { %v1185_v8 = vmul.f32 %v1182_v22, %v3685_v7 }
 0x30e   :  { %1704 = vrot.lane.b32.xlu0 %v1696_v47, %s3132_s13  ;;  %v765_v47 = vstv %s2894_s10  ;;  %s2942_s10 = sld [smem:[#allocation6 + $0x5e]] }
 0x30f   :  { %1568 = vrot.lane.b32.xlu2 %v1562_v42, %s3129_s5  ;;  %1570 = vrot.lane.b32.xlu1 %v1563_v43, %s3129_s5  ;;  %v768_v42 = vmul.f32 %v765_v47, %v3685_v7  ;;  %v1738_v43 = vmul.f32 %v1737_v44, %v3513_v49  ;;  %v3732_v44 = vstv %s2941_s1  ;;  %s2946_s1 = sld [smem:[#allocation6 + $0x3c]] }
 0x310   :  { %v3669_v48 = vpop.permute.xlu0 %996 }
 0x311   :  { %v3671_v50 = vpop.permute.xlu2 %992  ;;  %v3673_v46 = vpop.permute.xlu1 %836 }
 0x312   :  { %5169 = vst [vmem:[#allocation41_spill] sm:$0xff] %v3673_v46  ;;  %v1138_v46 = vstv %s2912_s21  ;;  %s2901_s21 = sld [smem:[#allocation6 + $0x1]] }
 0x313   :  { %v1141_v6 = vmul.f32 %v1138_v46, %v3685_v7 }
 0x316   :  { %1748 = vrot.lane.b32.xlu0 %v1740_v52, %s3133_s14 }
 0x317   :  { %1612 = vrot.lane.b32.xlu2 %v1606_v1, %s3130_s9  ;;  %1614 = vrot.lane.b32.xlu1 %v1607_v4, %s3130_s9 }
 0x318   :  { %v3681_v38 = vpop.permute.xlu0 %1040 }
 0x319   :  { %5170 = vst [vmem:[#allocation42_spill] sm:$0xff] %v3681_v38  ;;  %v3687_v55 = vpop.permute.xlu2 %1036  ;;  %v3689_v63 = vpop.permute.xlu1 %877 }
 0x31a   :  { %5172 = vst [vmem:[#allocation44_spill] sm:$0xff] %v3687_v55 }
 0x31b   :  { %5173 = vst [vmem:[#allocation45_spill] sm:$0xff] %v3689_v63  ;;  %v1094_v63 = vstv %s2910_s20  ;;  %s2952_s20 = sld [smem:[#allocation6 + $0x51]] }
 0x31c   :  { %v1097_v19 = vmul.f32 %v1094_v63, %v3685_v7 }
 0x31e   :  { %694 = vrot.lane.b32.xlu0 %v686_v5, %s3129_s5  ;;  %v3730_v5 = vsel %vm603_vm2, %v3611_v62, %v3581_v40 }
 0x31f   :  { %1656 = vrot.lane.b32.xlu2 %v1650_v12, %s3131_s11  ;;  %1658 = vrot.lane.b32.xlu1 %v1651_v17, %s3131_s11  ;;  %v806_v12 = vstv %s2896_s12  ;;  %v767_v56 = vmul.f32 %v765_v47, %v3730_v5  ;;  %v890_v13 = vmul.f32 %v888_v51, %v3730_v5  ;;  %v964_v20 = vmul.f32 %v962_v45, %v3730_v5  ;;  %s2945_s12 = sld [smem:[#allocation6 + $0xb]] }
 0x320   :  { %v3697_v18 = vpop.permute.xlu0 %1084  ;;  %v809_v17 = vmul.f32 %v806_v12, %v3685_v7  ;;  %v808_v61 = vmul.f32 %v806_v12, %v3730_v5  ;;  %v1008_v11 = vmul.f32 %v1006_v57, %v3730_v5  ;;  %v1052_v10 = vmul.f32 %v1050_v25, %v3730_v5 }
 0x321   :  { %v3699_v23 = vpop.permute.xlu2 %1080  ;;  %v3701_v14 = vpop.permute.xlu1 %950  ;;  %v1096_v0 = vmul.f32 %v1094_v63, %v3730_v5  ;;  %v1140_v27 = vmul.f32 %v1138_v46, %v3730_v5 }
 0x322   :  { %5174 = vst [vmem:[#allocation46_spill] sm:$0xff] %v3699_v23 }
 0x326   :  { %735 = vrot.lane.b32.xlu0 %v727_v15, %s3130_s9  ;;  %v1782_v15 = vmul.f32 %v3732_v44, %v3513_v49 }
 0x327   :  { %1700 = vrot.lane.b32.xlu2 %v1694_v30, %s3132_s13  ;;  %1702 = vrot.lane.b32.xlu1 %v1695_v33, %s3132_s13  ;;  %v685_v30 = vmul.f32 %v683_v3, %v3730_v5 }
 0x328   :  { %v3709_v58 = vpop.permute.xlu0 %1128 }
 0x329   :  { %v3711_v34 = vpop.permute.xlu2 %1124  ;;  %v3713_v21 = vpop.permute.xlu1 %994 }
 0x32a   :  { %5175 = vst [vmem:[#allocation47_spill] sm:$0xff] %v3711_v34 }
 0x32e   :  { %776 = vrot.lane.b32.xlu0 %v768_v42, %s3131_s11 }
 0x32f   :  { %1744 = vrot.lane.b32.xlu2 %v1738_v43, %s3133_s14  ;;  %1746 = vrot.lane.b32.xlu1 %v1739_v39, %s3133_s14  ;;  %v3749_v43 = vsel %vm603_vm2, 0.0, %v3611_v62  ;;  %v847_v39 = vstv %s2898_s2  ;;  %s2947_s2 = sld [smem:[#allocation6 + $0x12]]  ;;  %vm2140_vm2 = vcmask 1014784  }
 0x330   :  { %v3721_v52 = vpop.permute.xlu0 %1172  ;;  %5181 = vst [vmem:[#allocation53_spill] sm:$0xff] %v3749_v43  ;;  %v850_v24 = vmul.f32 %v847_v39, %v3685_v7  ;;  %v849_v36 = vmul.f32 %v847_v39, %v3730_v5 }
 0x331   :  { %5176 = vst [vmem:[#allocation48_spill] sm:$0xff] %v3721_v52  ;;  %v3723_v1 = vpop.permute.xlu2 %1168  ;;  %v3725_v4 = vpop.permute.xlu1 %1038 }
 0x332   :  { %5177 = vst [vmem:[#allocation49_spill] sm:$0xff] %v3723_v1 }
 0x333   :  { %5178 = vst [vmem:[#allocation50_spill] sm:$0xff] %v3725_v4 }
 0x336   :  { %817 = vrot.lane.b32.xlu0 %v809_v17, %s3132_s13  ;;  %v684_v17 = vmul.f32 %v683_v3, %v3749_v43  ;;  %v725_v3 = vmul.f32 %v724_v29, %v3749_v43 }
 0x337   :  { %1788 = vrot.lane.b32.xlu2 %v1782_v15, %s3134_s15  ;;  %692 = vrot.lane.b32.xlu1 %v685_v30, %s3129_s5  ;;  %v726_v15 = vmul.f32 %v724_v29, %v3730_v5  ;;  %v766_v29 = vmul.f32 %v765_v47, %v3749_v43  ;;  %v807_v47 = vmul.f32 %v806_v12, %v3749_v43 }
 0x338   :  { %v3741_v33 = vpop.permute.xlu0 %1262  ;;  %v848_v12 = vmul.f32 %v847_v39, %v3749_v43  ;;  %v889_v39 = vmul.f32 %v888_v51, %v3749_v43  ;;  %v963_v51 = vmul.f32 %v962_v45, %v3749_v43  ;;  %v1007_v45 = vmul.f32 %v1006_v57, %v3749_v43 }
 0x339   :  { %5179 = vst [vmem:[#allocation51_spill] sm:$0xff] %v3741_v33  ;;  %v3743_v40 = vpop.permute.xlu2 %1258  ;;  %v3745_v42 = vpop.permute.xlu1 %1082  ;;  %v1051_v57 = vmul.f32 %v1050_v25, %v3749_v43  ;;  %v1095_v25 = vmul.f32 %v1094_v63, %v3749_v43  ;;  %v1139_v63 = vmul.f32 %v1138_v46, %v3749_v43  ;;  %v1183_v46 = vmul.f32 %v1182_v22, %v3749_v43 }
 0x33a   :  { %5180 = vst [vmem:[#allocation52_spill] sm:$0xff] %v3745_v42 }
 0x33e   :  { %858 = vrot.lane.b32.xlu0 %v850_v24, %s3133_s14 }
 0x33f   :  { %690 = vrot.lane.b32.xlu2 %v684_v17, %s3129_s5  ;;  %733 = vrot.lane.b32.xlu1 %v726_v15, %s3130_s9 }
 0x340   :  { %v3757_v30 = vpop.permute.xlu0 %1306 }
 0x341   :  { %v3759_v16 = vpop.permute.xlu2 %1302  ;;  %v3761_v62 = vpop.permute.xlu1 %1126 }
 0x342   :  { %5182 = vst [vmem:[#allocation54_spill] sm:$0xff] %v3759_v16 }
 0x343   :  { %5183 = vst [vmem:[#allocation55_spill] sm:$0xff] %v3761_v62  ;;  %v4106_v62 = vstv %s2953_s22  ;;  %s2965_s22 = sld [smem:[#allocation6 + $0x21]] }
 0x346   :  { %899 = vrot.lane.b32.xlu0 %v891_v2, %s3134_s15 }
 0x347   :  { %731 = vrot.lane.b32.xlu2 %v725_v3, %s3130_s9  ;;  %774 = vrot.lane.b32.xlu1 %v767_v56, %s3131_s11 }
 0x348   :  { %v3769_v24 = vpop.permute.xlu0 %1350 }
 0x349   :  { %v3771_v17 = vpop.permute.xlu2 %1346  ;;  %v3773_v15 = vpop.permute.xlu1 %1170 }
 0x34a   :  { %5184 = vst [vmem:[#allocation56_spill] sm:$0xff] %v3771_v17 }
 0x34b   :  { %5185 = vst [vmem:[#allocation57_spill] sm:$0xff] %v3773_v15 }
 0x34e   :  { %973 = vrot.lane.b32.xlu0 %v965_v53, %s3129_s5 }
 0x34f   :  { %772 = vrot.lane.b32.xlu2 %v766_v29, %s3131_s11  ;;  %815 = vrot.lane.b32.xlu1 %v808_v61, %s3132_s13 }
 0x350   :  { %v3781_v56 = vpop.permute.xlu0 %1394 }
 0x351   :  { %v3783_v2 = vpop.permute.xlu2 %1390  ;;  %v3785_v3 = vpop.permute.xlu1 %1260 }
 0x352   :  { %5186 = vst [vmem:[#allocation58_spill] sm:$0xff] %v3783_v2 }
 0x356   :  { %1017 = vrot.lane.b32.xlu0 %v1009_v54, %s3130_s9 }
 0x357   :  { %813 = vrot.lane.b32.xlu2 %v807_v47, %s3132_s13  ;;  %856 = vrot.lane.b32.xlu1 %v849_v36, %s3133_s14 }
 0x358   :  { %v3793_v61 = vpop.permute.xlu0 %1438 }
 0x359   :  { %5187 = vst [vmem:[#allocation59_spill] sm:$0xff] %v3793_v61  ;;  %v3795_v53 = vpop.permute.xlu2 %1434  ;;  %v3797_v29 = vpop.permute.xlu1 %1304 }
 0x35a   :  { %5188 = vst [vmem:[#allocation60_spill] sm:$0xff] %v3795_v53  ;;  %v1274_v53 = vmul.f32 %v1272_v32, %v3730_v5 }
 0x35b   :  { %5189 = vst [vmem:[#allocation61_spill] sm:$0xff] %v3797_v29  ;;  %v932_v29 = vstv %s2902_s3  ;;  %s2964_s3 = sld [smem:[#allocation6 + $0x4b]] }
 0x35e   :  { %1061 = vrot.lane.b32.xlu0 %v1053_v31, %s3131_s11 }
 0x35f   :  { %854 = vrot.lane.b32.xlu2 %v848_v12, %s3133_s14  ;;  %897 = vrot.lane.b32.xlu1 %v890_v13, %s3134_s15 }
 0x360   :  { %v3805_v36 = vpop.permute.xlu0 %1482 }
 0x361   :  { %5190 = vst [vmem:[#allocation62_spill] sm:$0xff] %v3805_v36  ;;  %v3807_v54 = vpop.permute.xlu2 %1478  ;;  %v3809_v47 = vpop.permute.xlu1 %1348 }
 0x362   :  { %5191 = vst [vmem:[#allocation63_spill] sm:$0xff] %v3807_v54  ;;  %v1363_v54 = vmul.f32 %v1360_v59, %v3685_v7 }
 0x363   :  { %5192 = vst [vmem:[#allocation64_spill] sm:$0xff] %v3809_v47 }
 0x366   :  { %1105 = vrot.lane.b32.xlu0 %v1097_v19, %s3132_s13 }
 0x367   :  { %895 = vrot.lane.b32.xlu2 %v889_v39, %s3134_s15  ;;  %971 = vrot.lane.b32.xlu1 %v964_v20, %s3129_s5 }
 0x368   :  { %v3817_v31 = vpop.permute.xlu0 %1572 }
 0x369   :  { %v3819_v13 = vpop.permute.xlu2 %1568  ;;  %v3821_v12 = vpop.permute.xlu1 %1392 }
 0x36a   :  { %5193 = vst [vmem:[#allocation65_spill] sm:$0xff] %v3819_v13 }
 0x36b   :  { %5194 = vst [vmem:[#allocation66_spill] sm:$0xff] %v3821_v12  ;;  %v1878_v12 = vstv %s2946_s1  ;;  %s649_s1 = sld [smem:[#allocation6]] }
 0x36c   :  { %v1879_v13 = vmul.f32 %v1878_v12, %v3749_v43 }
 0x36e   :  { %1149 = vrot.lane.b32.xlu0 %v1141_v6, %s3133_s14 }
 0x36f   :  { %969 = vrot.lane.b32.xlu2 %v963_v51, %s3129_s5  ;;  %1015 = vrot.lane.b32.xlu1 %v1008_v11, %s3130_s9 }
 0x370   :  { %v3829_v19 = vpop.permute.xlu0 %1616 }
 0x371   :  { %v3831_v20 = vpop.permute.xlu2 %1612  ;;  %v3833_v39 = vpop.permute.xlu1 %1436 }
 0x372   :  { %5195 = vst [vmem:[#allocation67_spill] sm:$0xff] %v3831_v20  ;;  %v1857_v20 = vstv %s2945_s12  ;;  %s2943_s12 = sld [smem:[#allocation6 + $0x4]] }
 0x373   :  { %5196 = vst [vmem:[#allocation68_spill] sm:$0xff] %v3833_v39  ;;  %v1318_v39 = vmul.f32 %v1316_v41, %v3730_v5  ;;  %v1858_v47 = vmul.f32 %v1857_v20, %v3513_v49 }
 0x376   :  { %1193 = vrot.lane.b32.xlu0 %v1185_v8, %s3134_s15 }
 0x377   :  { %1013 = vrot.lane.b32.xlu2 %v1007_v45, %s3130_s9  ;;  %1059 = vrot.lane.b32.xlu1 %v1052_v10, %s3131_s11 }
 0x378   :  { %v3841_v6 = vpop.permute.xlu0 %1660 }
 0x379   :  { %5197 = vst [vmem:[#allocation69_spill] sm:$0xff] %v3841_v6  ;;  %v3843_v11 = vpop.permute.xlu2 %1656  ;;  %v3845_v51 = vpop.permute.xlu1 %1480 }
 0x37a   :  { %5198 = vst [vmem:[#allocation70_spill] sm:$0xff] %v3843_v11 }
 0x37b   :  { %5199 = vst [vmem:[#allocation71_spill] sm:$0xff] %v3845_v51  ;;  %v1184_v51 = vmul.f32 %v1182_v22, %v3730_v5  ;;  %v1273_v22 = vmul.f32 %v1272_v32, %v3749_v43  ;;  %v1317_v32 = vmul.f32 %v1316_v41, %v3749_v43  ;;  %v1361_v41 = vmul.f32 %v1360_v59, %v3749_v43 }
 0x37e   :  { %1283 = vrot.lane.b32.xlu0 %v1275_v9, %s3129_s5 }
 0x37f   :  { %1057 = vrot.lane.b32.xlu2 %v1051_v57, %s3131_s11  ;;  %1103 = vrot.lane.b32.xlu1 %v1096_v0, %s3132_s13 }
 0x380   :  { %v3853_v8 = vpop.permute.xlu0 %1704 }
 0x381   :  { %5200 = vst [vmem:[#allocation72_spill] sm:$0xff] %v3853_v8  ;;  %v3855_v10 = vpop.permute.xlu2 %1700  ;;  %v3857_v45 = vpop.permute.xlu1 %1570 }
 0x382   :  { %5201 = vst [vmem:[#allocation73_spill] sm:$0xff] %v3855_v10 }
 0x383   :  { %5202 = vst [vmem:[#allocation74_spill] sm:$0xff] %v3857_v45 }
 0x386   :  { %1327 = vrot.lane.b32.xlu0 %v1319_v26, %s3130_s9 }
 0x387   :  { %1101 = vrot.lane.b32.xlu2 %v1095_v25, %s3132_s13  ;;  %1147 = vrot.lane.b32.xlu1 %v1140_v27, %s3133_s14 }
 0x388   :  { %v3865_v9 = vpop.permute.xlu0 %1748 }
 0x389   :  { %5203 = vst [vmem:[#allocation75_spill] sm:$0xff] %v3865_v9  ;;  %v3867_v0 = vpop.permute.xlu2 %1744  ;;  %v3869_v57 = vpop.permute.xlu1 %1614  ;;  %v1881_v9 = vmul.f32 %v1878_v12, %v3685_v7 }
 0x38a   :  { %5204 = vst [vmem:[#allocation76_spill] sm:$0xff] %v3867_v0  ;;  %v1404_v0 = vstv %s2924_s25  ;;  %s2954_s25 = sld [smem:[#allocation6 + $0x58]] }
 0x38b   :  { %5205 = vst [vmem:[#allocation77_spill] sm:$0xff] %v3869_v57  ;;  %v1407_v10 = vmul.f32 %v1404_v0, %v3685_v7  ;;  %v1860_v57 = vmul.f32 %v1857_v20, %v3501_v37 }
 0x38e   :  { %1371 = vrot.lane.b32.xlu0 %v1363_v54, %s3131_s11 }
 0x38f   :  { %1145 = vrot.lane.b32.xlu2 %v1139_v63, %s3133_s14  ;;  %1191 = vrot.lane.b32.xlu1 %v1184_v51, %s3134_s15 }
 0x390   :  { %v3877_v26 = vpop.permute.xlu0 %694 }
 0x391   :  { %5206 = vst [vmem:[#allocation78_spill] sm:$0xff] %v3877_v26  ;;  %v3879_v27 = vpop.permute.xlu2 %1788  ;;  %v3881_v25 = vpop.permute.xlu1 %1658  ;;  %v1448_v26 = vstv %s2926_s26  ;;  %s2929_s26 = sld [smem:[#allocation6 + $0x3]] }
 0x392   :  { %5207 = vst [vmem:[#allocation79_spill] sm:$0xff] %v3879_v27  ;;  %v1451_v27 = vmul.f32 %v1448_v26, %v3685_v7 }
 0x393   :  { %5208 = vst [vmem:[#allocation80_spill] sm:$0xff] %v3881_v25 }
 0x396   :  { %1415 = vrot.lane.b32.xlu0 %v1407_v10, %s3132_s13 }
 0x397   :  { %1189 = vrot.lane.b32.xlu2 %v1183_v46, %s3134_s15  ;;  %1281 = vrot.lane.b32.xlu1 %v1274_v53, %s3129_s5 }
 0x398   :  { %v3889_v54 = vpop.permute.xlu0 %735 }
 0x399   :  { %5209 = vst [vmem:[#allocation81_spill] sm:$0xff] %v3889_v54  ;;  %v3891_v51 = vpop.permute.xlu2 %690  ;;  %v3893_v63 = vpop.permute.xlu1 %1702  ;;  %v1492_v54 = vstv %s2928_s27  ;;  %s2930_s27 = sld [smem:[#allocation6 + $0x34]] }
 0x39a   :  { %5210 = vst [vmem:[#allocation82_spill] sm:$0xff] %v3891_v51  ;;  %v1495_v51 = vmul.f32 %v1492_v54, %v3685_v7 }
 0x39b   :  { %5211 = vst [vmem:[#allocation83_spill] sm:$0xff] %v3893_v63  ;;  %v1362_v63 = vmul.f32 %v1360_v59, %v3730_v5  ;;  %v1405_v59 = vmul.f32 %v1404_v0, %v3749_v43 }
 0x39e   :  { %1459 = vrot.lane.b32.xlu0 %v1451_v27, %s3133_s14 }
 0x39f   :  { %1279 = vrot.lane.b32.xlu2 %v1273_v22, %s3129_s5  ;;  %1325 = vrot.lane.b32.xlu1 %v1318_v39, %s3130_s9 }
 0x3a0   :  { %v3901_v53 = vpop.permute.xlu0 %776 }
 0x3a1   :  { %5212 = vst [vmem:[#allocation84_spill] sm:$0xff] %v3901_v53  ;;  %v3903_v10 = vpop.permute.xlu2 %731  ;;  %v3905_v46 = vpop.permute.xlu1 %1746  ;;  %v1582_v53 = vstv %s2932_s28  ;;  %s2955_s28 = sld [smem:[#allocation6 + $0x2e]] }
 0x3a2   :  { %5213 = vst [vmem:[#allocation85_spill] sm:$0xff] %v3903_v10  ;;  %v1585_v10 = vmul.f32 %v1582_v53, %v3685_v7  ;;  %v1583_v11 = vmul.f32 %v1582_v53, %v3749_v43 }
 0x3a3   :  { %5214 = vst [vmem:[#allocation86_spill] sm:$0xff] %v3905_v46  ;;  %v1406_v46 = vmul.f32 %v1404_v0, %v3730_v5  ;;  %v1449_v0 = vmul.f32 %v1448_v26, %v3749_v43 }
 0x3a6   :  { %1503 = vrot.lane.b32.xlu0 %v1495_v51, %s3134_s15 }
 0x3a7   :  { %1323 = vrot.lane.b32.xlu2 %v1317_v32, %s3130_s9  ;;  %1369 = vrot.lane.b32.xlu1 %v1362_v63, %s3131_s11 }
 0x3a8   :  { %v3913_v39 = vpop.permute.xlu0 %817 }
 0x3a9   :  { %5215 = vst [vmem:[#allocation87_spill] sm:$0xff] %v3913_v39  ;;  %v3915_v27 = vpop.permute.xlu2 %772  ;;  %v3917_v22 = vpop.permute.xlu1 %692  ;;  %v1626_v39 = vstv %s2934_s4  ;;  %s4155_s4 = sld [smem:[#allocation6 + $0x5f]] }
 0x3aa   :  { %5216 = vst [vmem:[#allocation88_spill] sm:$0xff] %v3915_v27  ;;  %v1629_v27 = vmul.f32 %v1626_v39, %v3685_v7 }
 0x3ab   :  { %5217 = vst [vmem:[#allocation89_spill] sm:$0xff] %v3917_v22  ;;  %v1450_v22 = vmul.f32 %v1448_v26, %v3730_v5  ;;  %v1493_v26 = vmul.f32 %v1492_v54, %v3749_v43 }
 0x3ae   :  { %1593 = vrot.lane.b32.xlu0 %v1585_v10, %s3129_s5 }
 0x3af   :  { %1367 = vrot.lane.b32.xlu2 %v1361_v41, %s3131_s11  ;;  %1413 = vrot.lane.b32.xlu1 %v1406_v46, %s3132_s13 }
 0x3b0   :  { %v3925_v51 = vpop.permute.xlu0 %858 }
 0x3b1   :  { %5218 = vst [vmem:[#allocation90_spill] sm:$0xff] %v3925_v51  ;;  %v3927_v63 = vpop.permute.xlu2 %813  ;;  %v3929_v32 = vpop.permute.xlu1 %733  ;;  %v1670_v51 = vstv %s2936_s7  ;;  %s3135_s7 = smov 127  }
 0x3b2   :  { %5219 = vst [vmem:[#allocation91_spill] sm:$0xff] %v3927_v63  ;;  %v1673_v63 = vmul.f32 %v1670_v51, %v3685_v7  ;;  %v1672_v25 = vmul.f32 %v1670_v51, %v3730_v5 }
 0x3b3   :  { %5220 = vst [vmem:[#allocation92_spill] sm:$0xff] %v3929_v32  ;;  %v1494_v32 = vmul.f32 %v1492_v54, %v3730_v5  ;;  %v1628_v54 = vmul.f32 %v1626_v39, %v3730_v5 }
 0x3b6   :  { %1637 = vrot.lane.b32.xlu0 %v1629_v27, %s3130_s9 }
 0x3b7   :  { %1411 = vrot.lane.b32.xlu2 %v1405_v59, %s3132_s13  ;;  %1457 = vrot.lane.b32.xlu1 %v1450_v22, %s3133_s14 }
 0x3b8   :  { %v3937_v10 = vpop.permute.xlu0 %899 }
 0x3b9   :  { %5221 = vst [vmem:[#allocation93_spill] sm:$0xff] %v3937_v10  ;;  %v3939_v46 = vpop.permute.xlu2 %854  ;;  %v3941_v41 = vpop.permute.xlu1 %774  ;;  %v1714_v10 = vstv %s2938_s0  ;;  %s3136_s0 = smov 126  }
 0x3ba   :  { %5222 = vst [vmem:[#allocation94_spill] sm:$0xff] %v3939_v46  ;;  %v1717_v46 = vmul.f32 %v1714_v10, %v3685_v7  ;;  %v1716_v15 = vmul.f32 %v1714_v10, %v3730_v5 }
 0x3bb   :  { %5223 = vst [vmem:[#allocation95_spill] sm:$0xff] %v3941_v41  ;;  %v1584_v41 = vmul.f32 %v1582_v53, %v3730_v5  ;;  %v1627_v53 = vmul.f32 %v1626_v39, %v3749_v43  ;;  %v1671_v39 = vmul.f32 %v1670_v51, %v3749_v43  ;;  %v1715_v51 = vmul.f32 %v1714_v10, %v3749_v43 }
 0x3be   :  { %1681 = vrot.lane.b32.xlu0 %v1673_v63, %s3131_s11 }
 0x3bf   :  { %1455 = vrot.lane.b32.xlu2 %v1449_v0, %s3133_s14  ;;  %1501 = vrot.lane.b32.xlu1 %v1494_v32, %s3134_s15 }
 0x3c0   :  { %v3949_v27 = vpop.permute.xlu0 %973 }
 0x3c1   :  { %v3951_v22 = vpop.permute.xlu2 %895  ;;  %v3953_v59 = vpop.permute.xlu1 %815 }
 0x3c2   :  { %5224 = vst [vmem:[#allocation96_spill] sm:$0xff] %v3951_v22  ;;  %v1758_v22 = vstv %s2940_s8  ;;  %s3137_s8 = smov 125  }
 0x3c3   :  { %5225 = vst [vmem:[#allocation97_spill] sm:$0xff] %v3953_v59  ;;  %v1761_v59 = vmul.f32 %v1758_v22, %v3685_v7  ;;  %v1760_v2 = vmul.f32 %v1758_v22, %v3730_v5  ;;  %v1759_v10 = vmul.f32 %v1758_v22, %v3749_v43 }
 0x3c6   :  { %1725 = vrot.lane.b32.xlu0 %v1717_v46, %s3132_s13 }
 0x3c7   :  { %1499 = vrot.lane.b32.xlu2 %v1493_v26, %s3134_s15  ;;  %1591 = vrot.lane.b32.xlu1 %v1584_v41, %s3129_s5 }
 0x3c8   :  { %v3961_v63 = vpop.permute.xlu0 %1017 }
 0x3c9   :  { %v3963_v32 = vpop.permute.xlu2 %969  ;;  %v3965_v0 = vpop.permute.xlu1 %856 }
 0x3ca   :  { %5226 = vst [vmem:[#allocation98_spill] sm:$0xff] %v3965_v0  ;;  %v1784_v0 = vmul.f32 %v3732_v44, %v3501_v37 }
 0x3ce   :  { %1769 = vrot.lane.b32.xlu0 %v1761_v59, %s3133_s14 }
 0x3cf   :  { %1589 = vrot.lane.b32.xlu2 %v1583_v11, %s3129_s5  ;;  %1635 = vrot.lane.b32.xlu1 %v1628_v54, %s3130_s9 }
 0x3d0   :  { %v3973_v46 = vpop.permute.xlu0 %1061 }
 0x3d1   :  { %v3975_v41 = vpop.permute.xlu2 %1013  ;;  %v3977_v26 = vpop.permute.xlu1 %897 }
 0x3d2   :  { %5227 = vst [vmem:[#allocation99_spill] sm:$0xff] %v3977_v26  ;;  %v1802_v26 = vstv %s2942_s10  ;;  %s2944_s10 = sld [smem:[#allocation6 + $0x35]] }
 0x3d3   :  { %v1805_v1 = vmul.f32 %v1802_v26, %v3685_v7  ;;  %v1803_v22 = vmul.f32 %v1802_v26, %v3749_v43 }
 0x3d6   :  { %1792 = vrot.lane.b32.xlu0 %v1784_v0, %s3134_s15 }
 0x3d7   :  { %1633 = vrot.lane.b32.xlu2 %v1627_v53, %s3130_s9  ;;  %1679 = vrot.lane.b32.xlu1 %v1672_v25, %s3131_s11 }
 0x3d8   :  { %v3986_v11 = vpop.permute.xlu0 %1105 }
 0x3d9   :  { %v3988_v59 = vpop.permute.xlu2 %1057  ;;  %v3990_v54 = vpop.permute.xlu1 %971 }
 0x3da   :  { %5228 = vst [vmem:[#allocation100_spill] sm:$0xff] %v3988_v59  ;;  %v1242_v59 = vstv %s2916_s24  ;;  %s2967_s24 = sld [smem:[#allocation6 + $0x28]] }
 0x3db   :  { %v1245_v23 = vmul.f32 %v1242_v59, %v3685_v7 }
 0x3de   :  { %1813 = vrot.lane.b32.xlu0 %v1805_v1, %s3134_s15 }
 0x3df   :  { %1677 = vrot.lane.b32.xlu2 %v1671_v39, %s3131_s11  ;;  %1723 = vrot.lane.b32.xlu1 %v1716_v15, %s3132_s13 }
 0x3e0   :  { %v3998_v25 = vpop.permute.xlu0 %1149 }
 0x3e1   :  { %v4000_v0 = vpop.permute.xlu2 %1101  ;;  %v4002_v53 = vpop.permute.xlu1 %1015 }
 0x3e2   :  { %5229 = vst [vmem:[#allocation101_spill] sm:$0xff] %v4000_v0  ;;  %v1783_v0 = vmul.f32 %v3732_v44, %v3510_v28  ;;  %v1804_v44 = vmul.f32 %v1802_v26, %v3730_v5  ;;  %v1859_v26 = vmul.f32 %v1857_v20, %v3510_v28  ;;  %v1880_v20 = vmul.f32 %v1878_v12, %v3730_v5 }
 0x3e6   :  { %1868 = vrot.lane.b32.xlu0 %v1860_v57, %s3129_s5 }
 0x3e7   :  { %1721 = vrot.lane.b32.xlu2 %v1715_v51, %s3132_s13  ;;  %1767 = vrot.lane.b32.xlu1 %v1760_v2, %s3133_s14 }
 0x3e8   :  { %v4010_v1 = vpop.permute.xlu0 %1193 }
 0x3e9   :  { %5230 = vst [vmem:[#allocation102_spill] sm:$0xff] %v4010_v1  ;;  %v4012_v15 = vpop.permute.xlu2 %1145  ;;  %v4014_v39 = vpop.permute.xlu1 %1059 }
 0x3ea   :  { %5231 = vst [vmem:[#allocation103_spill] sm:$0xff] %v4012_v15  ;;  %v1901_v15 = vstv %s2947_s2  ;;  %s2888_s2 = sld [smem:[#allocation6 + $0x31]] }
 0x3eb   :  { %5232 = vst [vmem:[#allocation104_spill] sm:$0xff] %v4014_v39  ;;  %v1904_v17 = vmul.f32 %v1901_v15, %v3501_v37  ;;  %v1902_v45 = vmul.f32 %v1901_v15, %v3513_v49  ;;  %v1903_v12 = vmul.f32 %v1901_v15, %v3510_v28 }
 0x3ee   :  { %1889 = vrot.lane.b32.xlu0 %v1881_v9, %s3129_s5 }
 0x3ef   :  { %1765 = vrot.lane.b32.xlu2 %v1759_v10, %s3133_s14  ;;  %1790 = vrot.lane.b32.xlu1 %v1783_v0, %s3134_s15 }
 0x3f0   :  { %v4023_v2 = vpop.permute.xlu0 %1283 }
 0x3f1   :  { %5233 = vst [vmem:[#allocation105_spill] sm:$0xff] %v4023_v2  ;;  %v4025_v57 = vpop.permute.xlu2 %1189  ;;  %v4027_v51 = vpop.permute.xlu1 %1103 }
 0x3f2   :  { %5234 = vst [vmem:[#allocation106_spill] sm:$0xff] %v4025_v57  ;;  %v1922_v57 = vstv %s2948_s16  ;;  %s2959_s16 = sld [smem:[#allocation6 + $0xc]] }
 0x3f3   :  { %5235 = vst [vmem:[#allocation107_spill] sm:$0xff] %v4027_v51  ;;  %v1925_v51 = vmul.f32 %v1922_v57, %v3685_v7  ;;  %v1923_v15 = vmul.f32 %v1922_v57, %v3749_v43 }
 0x3f6   :  { %1912 = vrot.lane.b32.xlu0 %v1904_v17, %s3130_s9 }
 0x3f7   :  { %1809 = vrot.lane.b32.xlu2 %v1803_v22, %s3134_s15  ;;  %1811 = vrot.lane.b32.xlu1 %v1804_v44, %s3134_s15 }
 0x3f8   :  { %v4035_v9 = vpop.permute.xlu0 %1327 }
 0x3f9   :  { %v4037_v0 = vpop.permute.xlu2 %1279  ;;  %v4039_v10 = vpop.permute.xlu1 %1147 }
 0x3fa   :  { %5236 = vst [vmem:[#allocation108_spill] sm:$0xff] %v4037_v0  ;;  %v1545_v0 = vstv %s2929_s26  ;;  %s2973_s26 = sld [smem:[#allocation6 + $0xd]] }
 0x3fb   :  { %5237 = vst [vmem:[#allocation109_spill] sm:$0xff] %v4039_v10  ;;  %v1945_v10 = vstv %s2949_s17  ;;  %s3138_s17 = smov 124  }
 0x3fc   :  { %v1948_v36 = vmul.f32 %v1945_v10, %v3501_v37 }
 0x3fe   :  { %1933 = vrot.lane.b32.xlu0 %v1925_v51, %s3130_s9 }
 0x3ff   :  { %1864 = vrot.lane.b32.xlu2 %v1858_v47, %s3129_s5  ;;  %1866 = vrot.lane.b32.xlu1 %v1859_v26, %s3129_s5 }
 0x400   :  { %v4047_v17 = vpop.permute.xlu0 %1371 }
 0x401   :  { %v4049_v22 = vpop.permute.xlu2 %1323  ;;  %v4051_v44 = vpop.permute.xlu1 %1191 }
 0x402   :  { %5238 = vst [vmem:[#allocation110_spill] sm:$0xff] %v4049_v22 }
 0x403   :  { %5239 = vst [vmem:[#allocation111_spill] sm:$0xff] %v4051_v44  ;;  %v1966_v44 = vstv %s2950_s18  ;;  %s2960_s18 = sld [smem:[#allocation6 + $0x3d]] }
 0x404   :  { %v1969_v22 = vmul.f32 %v1966_v44, %v3685_v7  ;;  %v1968_v39 = vmul.f32 %v1966_v44, %v3730_v5 }
 0x406   :  { %1956 = vrot.lane.b32.xlu0 %v1948_v36, %s3131_s11 }
 0x407   :  { %1885 = vrot.lane.b32.xlu2 %v1879_v13, %s3129_s5  ;;  %1887 = vrot.lane.b32.xlu1 %v1880_v20, %s3129_s5 }
 0x408   :  { %v4059_v47 = vpop.permute.xlu0 %1415 }
 0x409   :  { %v4061_v51 = vpop.permute.xlu2 %1367  ;;  %v4063_v26 = vpop.permute.xlu1 %1281 }
 0x40a   :  { %5240 = vst [vmem:[#allocation112_spill] sm:$0xff] %v4061_v51  ;;  %v1989_v51 = vstv %s2951_s19  ;;  %s4622_s19 = sld [smem:[#allocation6 + $0x13]] }
 0x40b   :  { %5241 = vst [vmem:[#allocation113_spill] sm:$0xff] %v4063_v26  ;;  %v1992_v8 = vmul.f32 %v1989_v51, %v3501_v37  ;;  %v1990_v61 = vmul.f32 %v1989_v51, %v3513_v49  ;;  %v1991_v1 = vmul.f32 %v1989_v51, %v3510_v28 }
 0x40e   :  { %1977 = vrot.lane.b32.xlu0 %v1969_v22, %s3131_s11  ;;  %v1924_v22 = vmul.f32 %v1922_v57, %v3730_v5  ;;  %v925_v57 = vstv %s2901_s21  ;;  %s4704_s21 = sld [smem:[#allocation6 + $0x1a]] }
 0x40f   :  { %1908 = vrot.lane.b32.xlu2 %v1902_v45, %s3130_s9  ;;  %1910 = vrot.lane.b32.xlu1 %v1903_v12, %s3130_s9 }
 0x410   :  { %v4071_v36 = vpop.permute.xlu0 %1459 }
 0x411   :  { %5242 = vst [vmem:[#allocation114_spill] sm:$0xff] %v4071_v36  ;;  %v4073_v13 = vpop.permute.xlu2 %1411  ;;  %v4075_v20 = vpop.permute.xlu1 %1325 }
 0x412   :  { %5243 = vst [vmem:[#allocation115_spill] sm:$0xff] %v4073_v13 }
 0x413   :  { %5244 = vst [vmem:[#allocation116_spill] sm:$0xff] %v4075_v20  ;;  %v4089_v20 = vstv %s2952_s20  ;;  %s2962_s20 = sld [smem:[#allocation6 + $0x44]] }
 0x414   :  { %v2013_v16 = vmul.f32 %v4089_v20, %v3685_v7 }
 0x416   :  { %2000 = vrot.lane.b32.xlu0 %v1992_v8, %s3132_s13  ;;  %v1946_v8 = vmul.f32 %v1945_v10, %v3513_v49 }
 0x417   :  { %1929 = vrot.lane.b32.xlu2 %v1923_v15, %s3130_s9  ;;  %1931 = vrot.lane.b32.xlu1 %v1924_v22, %s3130_s9  ;;  %v1947_v15 = vmul.f32 %v1945_v10, %v3510_v28  ;;  %v935_v22 = vmul.f32 %v932_v29, %v3685_v7 }
 0x418   :  { %v4083_v45 = vpop.permute.xlu0 %1503 }
 0x419   :  { %5245 = vst [vmem:[#allocation117_spill] sm:$0xff] %v4083_v45  ;;  %v4085_v12 = vpop.permute.xlu2 %1455  ;;  %v4087_v13 = vpop.permute.xlu1 %1369 }
 0x41a   :  { %5246 = vst [vmem:[#allocation118_spill] sm:$0xff] %v4085_v12  ;;  %v928_v12 = vmul.f32 %v925_v57, %v3501_v37 }
 0x41b   :  { %5247 = vst [vmem:[#allocation119_spill] sm:$0xff] %v4087_v13 }
 0x41c   :  { %v938_v36 = vadd.f32 %v935_v22, %v928_v12 }
 0x41e   :  { %2021 = vrot.lane.b32.xlu0 %v2013_v16, %s3132_s13  ;;  %v961_v10 = vadd.f32 %v3657_v35, %v938_v36  ;;  %v2036_v16 = vmul.f32 %v4106_v62, %v3501_v37 }
 0x41f   :  { %1952 = vrot.lane.b32.xlu2 %v1946_v8, %s3131_s11  ;;  %1954 = vrot.lane.b32.xlu1 %v1947_v15, %s3131_s11  ;;  %v1235_v8 = vstv %s2915_s23  ;;  %v1967_v15 = vmul.f32 %v1966_v44, %v3749_v43  ;;  %s2966_s23 = sld [smem:[#allocation6 + $0x52]] }
 0x420   :  { %v4100_v13 = vpop.permute.xlu0 %1593  ;;  %v1238_v36 = vmul.f32 %v1235_v8, %v3501_v37 }
 0x421   :  { %v4102_v45 = vpop.permute.xlu2 %1499  ;;  %v4104_v34 = vpop.permute.xlu1 %1413 }
 0x422   :  { %5248 = vst [vmem:[#allocation120_spill] sm:$0xff] %v4102_v45  ;;  %v982_v45 = vadd.f32 %v3949_v27, %v961_v10  ;;  %v4126_v10 = vstv %s2954_s25  ;;  %s2968_s25 = sld [smem:[#allocation6 + $0x59]] }
 0x423   :  { %5249 = vst [vmem:[#allocation121_spill] sm:$0xff] %v4104_v34  ;;  %v1248_v34 = vadd.f32 %v1245_v23, %v1238_v36  ;;  %v926_v23 = vmul.f32 %v925_v57, %v3513_v49  ;;  %v1552_v36 = vstv %s2930_s27  ;;  %s2974_s27 = sld [smem:[#allocation6 + $0x3e]] }
 0x424   :  { %v1005_v42 = vadd.f32 %v3669_v48, %v982_v45  ;;  %v933_v45 = vmul.f32 %v932_v29, %v3749_v43  ;;  %v1553_v4 = vmul.f32 %v1552_v36, %v3749_v43 }
 0x426   :  { %2044 = vrot.lane.b32.xlu0 %v2036_v16, %s3133_s14  ;;  %v1271_v16 = vadd.f32 %v3741_v33, %v1248_v34  ;;  %v934_v34 = vmul.f32 %v932_v29, %v3730_v5  ;;  %v1236_v29 = vmul.f32 %v1235_v8, %v3513_v49 }
 0x427   :  { %1973 = vrot.lane.b32.xlu2 %v1967_v15, %s3131_s11  ;;  %1975 = vrot.lane.b32.xlu1 %v1968_v39, %s3131_s11  ;;  %v1026_v15 = vadd.f32 %v3961_v63, %v1005_v42  ;;  %v2057_v39 = vmul.f32 %v4126_v10, %v3685_v7  ;;  %v1555_v42 = vmul.f32 %v1552_v36, %v3685_v7 }
 0x428   :  { %v4119_v12 = vpop.permute.xlu0 %1637 }
 0x429   :  { %v4121_v22 = vpop.permute.xlu2 %1589  ;;  %v4123_v44 = vpop.permute.xlu1 %1457  ;;  %v1049_v51 = vadd.f32 %v3681_v38, %v1026_v15  ;;  %v936_v15 = vadd.f32 %v933_v45, %v926_v23  ;;  %v2012_v23 = vmul.f32 %v4089_v20, %v3730_v5 }
 0x42a   :  { %5250 = vst [vmem:[#allocation122_spill] sm:$0xff] %v4121_v22  ;;  %v1292_v22 = vadd.f32 %v4023_v2, %v1271_v16  ;;  %v2077_v16 = vstv %s2955_s28  ;;  %v1548_v2 = vmul.f32 %v1545_v0, %v3501_v37  ;;  %s2975_s28 = sld [smem:[#allocation6 + $0x14]] }
 0x42b   :  { %5251 = vst [vmem:[#allocation123_spill] sm:$0xff] %v4123_v44 }
 0x42c   :  { %v1315_v52 = vadd.f32 %v3757_v30, %v1292_v22  ;;  %v1558_v33 = vadd.f32 %v1555_v42, %v1548_v2  ;;  %v2011_v22 = vmul.f32 %v4089_v20, %v3749_v43 }
 0x42e   :  { %2065 = vrot.lane.b32.xlu0 %v2057_v39, %s3133_s14  ;;  %v927_v39 = vmul.f32 %v925_v57, %v3510_v28  ;;  %v1244_v57 = vmul.f32 %v1242_v59, %v3730_v5  ;;  %v1336_v55 = vadd.f32 %v4035_v9, %v1315_v52  ;;  %v1581_v45 = vadd.f32 %v3817_v31, %v1558_v33 }
 0x42f   :  { %1996 = vrot.lane.b32.xlu2 %v1990_v61, %s3132_s13  ;;  %1998 = vrot.lane.b32.xlu1 %v1991_v1, %s3132_s13  ;;  %v1243_v61 = vmul.f32 %v1242_v59, %v3749_v43  ;;  %v1070_v1 = vadd.f32 %v3973_v46, %v1049_v51  ;;  %v1554_v51 = vmul.f32 %v1552_v36, %v3730_v5 }
 0x430   :  { %v4143_v44 = vpop.permute.xlu0 %1681  ;;  %v937_v38 = vadd.f32 %v934_v34, %v927_v39  ;;  %v954_v52 = vsel %vm676_vm3, %v3659_v60, %v3701_v14  ;;  %v1547_v34 = vmul.f32 %v1545_v0, %v3510_v28  ;;  %v955_v33 = vsel %vm676_vm3, %v3701_v14, %v3657_v35 }
 0x431   :  { %5252 = vst [vmem:[#allocation124_spill] sm:$0xff] %v4143_v44  ;;  %v4147_v26 = vpop.permute.xlu2 %1633  ;;  %v4149_v6 = vpop.permute.xlu1 %1501  ;;  %v2080_v44 = vmul.f32 %v2077_v16, %v3501_v37  ;;  %v1246_v59 = vadd.f32 %v1243_v61, %v1236_v29  ;;  %v1093_v2 = vadd.f32 %v3697_v18, %v1070_v1  ;;  %v1602_v36 = vadd.f32 %v4100_v13, %v1581_v45 }
 0x432   :  { %5253 = vst [vmem:[#allocation125_spill] sm:$0xff] %v4147_v26  ;;  %v1237_v26 = vmul.f32 %v1235_v8, %v3510_v28  ;;  %v2034_v29 = vmul.f32 %v4106_v62, %v3513_v49  ;;  %v2035_v35 = vmul.f32 %v4106_v62, %v3510_v28  ;;  %v976_v14 = vsel %vm676_vm3, %v3990_v54, %v3949_v27 }
 0x433   :  { %5254 = vst [vmem:[#allocation126_spill] sm:$0xff] %v4149_v6  ;;  %v1546_v6 = vmul.f32 %v1545_v0, %v3513_v49  ;;  %v1114_v20 = vadd.f32 %v3986_v11, %v1093_v2  ;;  %v4189_v0 = vadd.f32 %v1554_v51, %v1547_v34  ;;  %v959_v61 = vadd.f32 %v954_v52, %v936_v15 }
 0x434   :  { %v4174_v8 = vadd.f32 %v1244_v57, %v1237_v26  ;;  %v960_v1 = vadd.f32 %v955_v33, %v937_v38  ;;  %v2055_v57 = vmul.f32 %v4126_v10, %v3749_v43  ;;  %v2056_v51 = vmul.f32 %v4126_v10, %v3730_v5 }
 0x435   :  { %v4187_v26 = vadd.f32 %v1553_v4, %v1546_v6  ;;  %v2098_v6 = vstv %s4155_s4  ;;  %v1137_v62 = vadd.f32 %v3709_v58, %v1114_v20  ;;  %v4218_v15 = vmul.f32 %v2077_v16, %v3510_v28  ;;  %s2976_s4 = sld [smem:[#allocation6 + $0x45]] }
 0x436   :  { %2088 = vrot.lane.b32.xlu0 %v2080_v44, %s3134_s15  ;;  %v1359_v44 = vadd.f32 %v3769_v24, %v1336_v55  ;;  %v975_v55 = vsel %vm676_vm3, %v3963_v32, %v3990_v54  ;;  %v2101_v32 = vmul.f32 %v2098_v6, %v3685_v7  ;;  %v981_v54 = vadd.f32 %v976_v14, %v960_v1  ;;  %v5257_v14 = vld [vmem:[#allocation51_spill] sm:$0xff] }
 0x437   :  { %2017 = vrot.lane.b32.xlu2 %v2011_v22, %s3132_s13  ;;  %2019 = vrot.lane.b32.xlu1 %v2012_v23, %s3132_s13  ;;  %v1625_v22 = vadd.f32 %v3829_v19, %v1602_v36  ;;  %v4215_v23 = vmul.f32 %v2077_v16, %v3513_v49  ;;  %v980_v27 = vadd.f32 %v975_v55, %v959_v61  ;;  %v5256_v55 = vld [vmem:[#allocation44_spill] sm:$0xff] }
 0x438   :  { %v4185_v60 = vpop.permute.xlu0 %1725  ;;  %v1380_v4 = vadd.f32 %v4047_v17, %v1359_v44  ;;  %v4221_v38 = vmul.f32 %v2098_v6, %v3749_v43  ;;  %v1158_v10 = vadd.f32 %v3998_v25, %v1137_v62  ;;  %v998_v52 = vsel %vm717_vm4, %v3671_v50, %v3713_v21  ;;  %v5264_v43 = vld [vmem:[#allocation59_spill] sm:$0xff] }
 0x439   :  { %v4191_v42 = vpop.permute.xlu2 %1677  ;;  %v4193_v39 = vpop.permute.xlu1 %1591  ;;  %v1646_v2 = vadd.f32 %v4119_v12, %v1625_v22  ;;  %v999_v16 = vsel %vm717_vm4, %v3713_v21, %v3669_v48  ;;  %v4236_v34 = vmul.f32 %v2098_v6, %v3730_v5  ;;  %v1264_v33 = vsel %vm676_vm3, %v3743_v40, %v3785_v3  ;;  %v5255_v40 = vld [vmem:[#allocation50_spill] sm:$0xff]  ;;  %v5259_v6 = vld [vmem:[#allocation69_spill] sm:$0xff] }
 0x43a   :  { %v1403_v45 = vadd.f32 %v3781_v56, %v1380_v4  ;;  %v1019_v20 = vsel %vm717_vm4, %v3975_v41, %v4002_v53  ;;  %v1020_v50 = vsel %vm717_vm4, %v4002_v53, %v3961_v63  ;;  %v1003_v44 = vadd.f32 %v998_v52, %v980_v27  ;;  %v5258_v53 = vld [vmem:[#allocation48_spill] sm:$0xff] }
 0x43b   :  { %v1004_v36 = vadd.f32 %v999_v16, %v981_v54  ;;  %v1042_v41 = vsel %vm758_vm5, %v5256_v55, %v5255_v40  ;;  %v1265_v63 = vsel %vm676_vm3, %v3785_v3, %v5257_v14  ;;  %v1181_v4 = vadd.f32 %v5258_v53, %v1158_v10  ;;  %v5261_v27 = vld [vmem:[#allocation108_spill] sm:$0xff]  ;;  %v5263_v16 = vld [vmem:[#allocation105_spill] sm:$0xff]  ;;  %v5266_v10 = vld [vmem:[#allocation42_spill] sm:$0xff] }
 0x43c   :  { %v1424_v48 = vadd.f32 %v4059_v47, %v1403_v45  ;;  %v1669_v61 = vadd.f32 %v5259_v6, %v1646_v2  ;;  %v1269_v1 = vadd.f32 %v1264_v33, %v1246_v59  ;;  %v1024_v62 = vadd.f32 %v1019_v20, %v1003_v44  ;;  %v5262_v45 = vld [vmem:[#allocation102_spill] sm:$0xff]  ;;  %v5265_v3 = vld [vmem:[#allocation124_spill] sm:$0xff] }
 0x43d   :  { %v1025_v22 = vadd.f32 %v1020_v50, %v1004_v36  ;;  %v1202_v52 = vadd.f32 %v5262_v45, %v1181_v4  ;;  %v1043_v59 = vsel %vm758_vm5, %v5255_v40, %v5266_v10  ;;  %v5267_v2 = vld [vmem:[#allocation52_spill] sm:$0xff]  ;;  %v5268_v33 = vld [vmem:[#allocation46_spill] sm:$0xff]  ;;  %v1270_v44 = vadd.f32 %v1265_v63, %v4174_v8  ;;  %v5272_v8 = vld [vmem:[#allocation55_spill] sm:$0xff] }
 0x43e   :  { %2109 = vrot.lane.b32.xlu0 %v2101_v32, %s3134_s15  ;;  %v5260_v32 = vld [vmem:[#allocation113_spill] sm:$0xff]  ;;  %v1447_v49 = vadd.f32 %v5264_v43, %v1424_v48  ;;  %v1690_v14 = vadd.f32 %v5265_v3, %v1669_v61  ;;  %v1086_v20 = vsel %vm799_vm6, %v5268_v33, %v5267_v2  ;;  %v1087_v50 = vsel %vm799_vm6, %v5267_v2, %v3697_v18  ;;  %v5269_v36 = vld [vmem:[#allocation104_spill] sm:$0xff]  ;;  %v5271_v40 = vld [vmem:[#allocation114_spill] sm:$0xff] }
 0x43f   :  { %2040 = vrot.lane.b32.xlu2 %v2034_v29, %s3133_s14  ;;  %2042 = vrot.lane.b32.xlu1 %v2035_v35, %s3133_s14  ;;  %v1285_v54 = vsel %vm676_vm3, %v5261_v27, %v5260_v32  ;;  %v1286_v55 = vsel %vm676_vm3, %v5260_v32, %v5263_v16  ;;  %v5270_v4 = vld [vmem:[#allocation100_spill] sm:$0xff]  ;;  %v1064_v61 = vsel %vm758_vm5, %v5269_v36, %v3973_v46  ;;  %v5273_v63 = vld [vmem:[#allocation47_spill] sm:$0xff]  ;;  %v5274_v33 = vld [vmem:[#allocation61_spill] sm:$0xff] }
 0x440   :  { %v4248_v21 = vpop.permute.xlu0 %1769  ;;  %v1063_v48 = vsel %vm758_vm5, %v5270_v4, %v5269_v36  ;;  %v1290_v32 = vadd.f32 %v1285_v54, %v1269_v1  ;;  %v1468_v27 = vadd.f32 %v5271_v40, %v1447_v49  ;;  %v1047_v16 = vadd.f32 %v1042_v41, %v1024_v62  ;;  %v5275_v46 = vld [vmem:[#allocation54_spill] sm:$0xff]  ;;  %v5276_v54 = vld [vmem:[#allocation72_spill] sm:$0xff] }
 0x441   :  { %v4250_v29 = vpop.permute.xlu2 %1721  ;;  %v4252_v35 = vpop.permute.xlu1 %1635  ;;  %v1048_v10 = vadd.f32 %v1043_v59, %v1025_v22  ;;  %v1291_v18 = vadd.f32 %v1286_v55, %v1270_v44  ;;  %v1130_v2 = vsel %vm840_vm7, %v5273_v63, %v5272_v8  ;;  %v1308_v1 = vsel %vm717_vm4, %v5275_v46, %v5274_v33  ;;  %v5277_v22 = vld [vmem:[#allocation74_spill] sm:$0xff]  ;;  %v5279_v59 = vld [vmem:[#allocation116_spill] sm:$0xff] }
 0x442   :  { %v1309_v49 = vsel %vm717_vm4, %v5274_v33, %v3757_v30  ;;  %v1713_v41 = vadd.f32 %v5276_v54, %v1690_v14  ;;  %v5280_v44 = vld [vmem:[#allocation110_spill] sm:$0xff]  ;;  %v1313_v46 = vadd.f32 %v1308_v1, %v1290_v32  ;;  %v1330_v30 = vsel %vm717_vm4, %v5279_v59, %v4035_v9 }
 0x443   :  { %v1069_v55 = vadd.f32 %v1064_v61, %v1048_v10  ;;  %v1329_v36 = vsel %vm717_vm4, %v5280_v44, %v5279_v59  ;;  %v5281_v14 = vld [vmem:[#allocation62_spill] sm:$0xff]  ;;  %v5282_v61 = vld [vmem:[#allocation64_spill] sm:$0xff]  ;;  %v1314_v1 = vadd.f32 %v1309_v49, %v1291_v18  ;;  %v1575_v9 = vsel %vm676_vm3, %v5277_v22, %v3817_v31  ;;  %v5286_v44 = vld [vmem:[#allocation117_spill] sm:$0xff] }
 0x444   :  { %v1491_v33 = vadd.f32 %v5281_v14, %v1468_v27  ;;  %v1734_v37 = vadd.f32 %v4185_v60, %v1713_v41  ;;  %v1353_v32 = vsel %vm758_vm5, %v5282_v61, %v3769_v24  ;;  %v5284_v27 = vld [vmem:[#allocation107_spill] sm:$0xff]  ;;  %v1334_v59 = vadd.f32 %v1329_v36, %v1313_v46  ;;  %v5287_v49 = vld [vmem:[#allocation122_spill] sm:$0xff] }
 0x445   :  { %v1335_v24 = vadd.f32 %v1330_v30, %v1314_v1  ;;  %v1092_v18 = vadd.f32 %v1087_v50, %v1069_v55  ;;  %v1595_v31 = vsel %vm676_vm3, %v5287_v49, %v4193_v39  ;;  %v5288_v36 = vld [vmem:[#allocation75_spill] sm:$0xff]  ;;  %v5292_v55 = vld [vmem:[#allocation58_spill] sm:$0xff]  ;;  %v5297_v49 = vld [vmem:[#allocation125_spill] sm:$0xff] }
 0x446   :  { %1222 = vrot.lane.b32.xlu0 %v1202_v52, %s3135_s7  ;;  %v1068_v52 = vadd.f32 %v1063_v48, %v1047_v16  ;;  %v1131_v48 = vsel %vm840_vm7, %v5272_v8, %v3709_v58  ;;  %v5283_v16 = vld [vmem:[#allocation56_spill] sm:$0xff]  ;;  %v1512_v58 = vadd.f32 %v5286_v44, %v1491_v33  ;;  %v1757_v46 = vadd.f32 %v5288_v36, %v1734_v37 }
 0x447   :  { %2061 = vrot.lane.b32.xlu2 %v2055_v57, %s3133_s14  ;;  %2063 = vrot.lane.b32.xlu1 %v2056_v51, %s3133_s14  ;;  %v5278_v57 = vld [vmem:[#allocation65_spill] sm:$0xff]  ;;  %v1352_v10 = vsel %vm758_vm5, %v5283_v16, %v5282_v61  ;;  %v1108_v16 = vsel %vm799_vm6, %v5284_v27, %v3986_v11  ;;  %v5290_v11 = vld [vmem:[#allocation112_spill] sm:$0xff]  ;;  %v1358_v33 = vadd.f32 %v1353_v32, %v1335_v24 }
 0x448   :  { %v4301_v62 = vpop.permute.xlu0 %1792  ;;  %v1574_v51 = vsel %vm676_vm3, %v5278_v57, %v5277_v22  ;;  %v5285_v57 = vld [vmem:[#allocation101_spill] sm:$0xff]  ;;  %v1091_v7 = vadd.f32 %v1086_v20, %v1068_v52  ;;  %v1596_v22 = vsel %vm676_vm3, %v4193_v39, %v4100_v13  ;;  %v1113_v52 = vadd.f32 %v1108_v16, %v1092_v18 }
 0x449   :  { %v4309_v4 = vpop.permute.xlu2 %1765  ;;  %v4311_v63 = vpop.permute.xlu1 %1679  ;;  %v1107_v41 = vsel %vm799_vm6, %v5285_v57, %v5284_v27  ;;  %v1579_v8 = vadd.f32 %v1574_v51, %v4187_v26  ;;  %v1580_v26 = vadd.f32 %v1575_v9, %v4189_v0  ;;  %v5289_v51 = vld [vmem:[#allocation119_spill] sm:$0xff]  ;;  %v1357_v13 = vadd.f32 %v1352_v10, %v1334_v59  ;;  %v5293_v10 = vld [vmem:[#allocation77_spill] sm:$0xff] }
 0x44a   :  { %v1112_v20 = vadd.f32 %v1107_v41, %v1091_v7  ;;  %v1373_v50 = vsel %vm758_vm5, %v5290_v11, %v5289_v51  ;;  %v1374_v37 = vsel %vm758_vm5, %v5289_v51, %v4047_v17  ;;  %v1778_v39 = vadd.f32 %v4248_v21, %v1757_v46  ;;  %v5291_v7 = vld [vmem:[#allocation66_spill] sm:$0xff]  ;;  %v5294_v9 = vld [vmem:[#allocation67_spill] sm:$0xff]  ;;  %v5295_v17 = vld [vmem:[#allocation109_spill] sm:$0xff] }
 0x44b   :  { %v1396_v30 = vsel %vm799_vm6, %v5292_v55, %v5291_v7  ;;  %v1600_v61 = vadd.f32 %v1595_v31, %v1579_v8  ;;  %v1618_v27 = vsel %vm717_vm4, %v5294_v9, %v5293_v10  ;;  %v5296_v57 = vld [vmem:[#allocation103_spill] sm:$0xff]  ;;  %v1378_v59 = vadd.f32 %v1373_v50, %v1357_v13  ;;  %v5300_v13 = vld [vmem:[#allocation57_spill] sm:$0xff]  ;;  %v5303_v55 = vld [vmem:[#allocation70_spill] sm:$0xff] }
 0x44c   :  { %v1151_v41 = vsel %vm840_vm7, %v5296_v57, %v5295_v17  ;;  %v1619_v32 = vsel %vm717_vm4, %v5293_v10, %v3829_v19  ;;  %v1135_v8 = vadd.f32 %v1130_v2, %v1112_v20  ;;  %v1152_v16 = vsel %vm840_vm7, %v5295_v17, %v3998_v25  ;;  %v5299_v11 = vld [vmem:[#allocation115_spill] sm:$0xff] }
 0x44d   :  { %v1379_v24 = vadd.f32 %v1374_v37, %v1358_v33  ;;  %v1136_v18 = vadd.f32 %v1131_v48, %v1113_v52  ;;  %v1639_v31 = vsel %vm717_vm4, %v5297_v49, %v4252_v35  ;;  %v1397_v19 = vsel %vm799_vm6, %v5291_v7, %v3781_v56  ;;  %v5298_v48 = vld [vmem:[#allocation121_spill] sm:$0xff]  ;;  %v5302_v7 = vld [vmem:[#allocation80_spill] sm:$0xff] }
 0x44e   :  { %1532 = vrot.lane.b32.xlu0 %v1512_v58, %s3136_s0  ;;  %v1801_v58 = vadd.f32 %v4301_v62, %v1778_v39  ;;  %v1156_v2 = vadd.f32 %v1151_v41, %v1135_v8  ;;  %v1401_v51 = vadd.f32 %v1396_v30, %v1378_v59  ;;  %v1417_v50 = vsel %vm799_vm6, %v5299_v11, %v5298_v48  ;;  %v5301_v37 = vld [vmem:[#allocation49_spill] sm:$0xff] }
 0x44f   :  { %2084 = vrot.lane.b32.xlu2 %v4215_v23, %s3134_s15  ;;  %2086 = vrot.lane.b32.xlu1 %v4218_v15, %s3134_s15  ;;  %v1601_v23 = vadd.f32 %v1596_v22, %v1580_v26  ;;  %v1640_v22 = vsel %vm717_vm4, %v4252_v35, %v4119_v12  ;;  %v1623_v26 = vadd.f32 %v1618_v27, %v1600_v61  ;;  %v5304_v61 = vld [vmem:[#allocation111_spill] sm:$0xff] }
 0x450   :  { %v4358_v0 = vpop.permute.xlu0 %1813  ;;  %v1157_v25 = vadd.f32 %v1152_v16, %v1136_v18  ;;  %v1418_v52 = vsel %vm799_vm6, %v5298_v48, %v4059_v47  ;;  %v1402_v12 = vadd.f32 %v1397_v19, %v1379_v24  ;;  %v1174_v39 = vsel %vm881_vm8, %v5301_v37, %v5300_v13  ;;  %v5313_v37 = vld [vmem:[#allocation63_spill] sm:$0xff] }
 0x451   :  { %v4363_v1 = vpop.permute.xlu2 %1809  ;;  %v4365_v15 = vpop.permute.xlu1 %1723  ;;  %v1822_v46 = vadd.f32 %v4358_v0, %v1801_v58  ;;  %v1624_v20 = vadd.f32 %v1619_v32, %v1601_v23  ;;  %v1644_v35 = vadd.f32 %v1639_v31, %v1623_v26  ;;  %v1175_v47 = vsel %vm881_vm8, %v5300_v13, %v5258_v53  ;;  %v5306_v58 = vld [vmem:[#allocation68_spill] sm:$0xff]  ;;  %v5308_v31 = vld [vmem:[#allocation123_spill] sm:$0xff] }
 0x452   :  { %v1662_v30 = vsel %vm758_vm5, %v5303_v55, %v5302_v7  ;;  %v1663_v33 = vsel %vm758_vm5, %v5302_v7, %v5259_v6  ;;  %v1196_v10 = vsel %vm881_vm8, %v5304_v61, %v5262_v45  ;;  %v1422_v9 = vadd.f32 %v1417_v50, %v1401_v51  ;;  %v5307_v32 = vld [vmem:[#allocation60_spill] sm:$0xff]  ;;  %v5312_v13 = vld [vmem:[#allocation71_spill] sm:$0xff] }
 0x453   :  { %v1645_v56 = vadd.f32 %v1640_v22, %v1624_v20  ;;  %v1423_v53 = vadd.f32 %v1418_v52, %v1402_v12  ;;  %v1179_v57 = vadd.f32 %v1174_v39, %v1156_v2  ;;  %v1180_v41 = vadd.f32 %v1175_v47, %v1157_v25  ;;  %v5309_v22 = vld [vmem:[#allocation118_spill] sm:$0xff]  ;;  %v5311_v25 = vld [vmem:[#allocation73_spill] sm:$0xff]  ;;  %v5315_v47 = vld [vmem:[#allocation120_spill] sm:$0xff] }
 0x454   :  { %v1683_v6 = vsel %vm758_vm5, %v4191_v42, %v4311_v63  ;;  %v1684_v59 = vsel %vm758_vm5, %v4311_v63, %v5265_v3  ;;  %v1440_v8 = vsel %vm840_vm7, %v5307_v32, %v5306_v58  ;;  %v1441_v45 = vsel %vm840_vm7, %v5306_v58, %v5264_v43  ;;  %v5310_v43 = vld [vmem:[#allocation83_spill] sm:$0xff] }
 0x455   :  { %v1667_v16 = vadd.f32 %v1662_v30, %v1644_v35  ;;  %v1668_v24 = vadd.f32 %v1663_v33, %v1645_v56  ;;  %v1201_v49 = vadd.f32 %v1196_v10, %v1180_v41  ;;  %v1461_v42 = vsel %vm840_vm7, %v5309_v22, %v5308_v31  ;;  %v5317_v10 = vld [vmem:[#allocation76_spill] sm:$0xff] }
 0x456   :  { %1830 = vrot.lane.b32.xlu0 %v1822_v46, %s3137_s8  ;;  %v1462_v3 = vsel %vm840_vm7, %v5308_v31, %v5271_v40  ;;  %v1445_v63 = vadd.f32 %v1440_v8, %v1422_v9  ;;  %v1446_v46 = vadd.f32 %v1441_v45, %v1423_v53  ;;  %v1706_v51 = vsel %vm799_vm6, %v5311_v25, %v5310_v43 }
 0x457   :  { %2105 = vrot.lane.b32.xlu2 %v4221_v38, %s3134_s15  ;;  %2107 = vrot.lane.b32.xlu1 %v4236_v34, %s3134_s15  ;;  %v5305_v34 = vld [vmem:[#allocation106_spill] sm:$0xff]  ;;  %v1688_v19 = vadd.f32 %v1683_v6, %v1667_v16  ;;  %v1689_v2 = vadd.f32 %v1684_v59, %v1668_v24  ;;  %v1707_v48 = vsel %vm799_vm6, %v5310_v43, %v5276_v54  ;;  %v5318_v6 = vld [vmem:[#allocation79_spill] sm:$0xff]  ;;  %v1848_v22 = vstv %s2944_s10  ;;  %s2958_s10 = sld [smem:[#allocation6 + $0x36]] }
 0x458   :  { %v4413_v38 = vpop.permute.xlu0 %1868  ;;  %v1195_v23 = vsel %vm881_vm8, %v5305_v34, %v5304_v61  ;;  %v1466_v26 = vadd.f32 %v1461_v42, %v1445_v63  ;;  %v1467_v20 = vadd.f32 %v1462_v3, %v1446_v46  ;;  %v1727_v40 = vsel %vm799_vm6, %v4250_v29, %v4365_v15  ;;  %v5314_v29 = vld [vmem:[#allocation126_spill] sm:$0xff] }
 0x459   :  { %v4421_v27 = vpop.permute.xlu2 %1864  ;;  %v1768_v17 = vpop.permute.xlu1 %1767  ;;  %v1200_v18 = vadd.f32 %v1195_v23, %v1179_v57  ;;  %v1728_v11 = vsel %vm799_vm6, %v4365_v15, %v4185_v60  ;;  %v1711_v52 = vadd.f32 %v1706_v51, %v1688_v19  ;;  %v1712_v12 = vadd.f32 %v1707_v48, %v1689_v2  ;;  %v5316_v23 = vld [vmem:[#allocation86_spill] sm:$0xff] }
 0x45a   :  { %v1484_v39 = vsel %vm881_vm8, %v5313_v37, %v5312_v13  ;;  %v1485_v54 = vsel %vm881_vm8, %v5312_v13, %v5281_v14  ;;  %v1505_v7 = vsel %vm881_vm8, %v5315_v47, %v5314_v29  ;;  %v1506_v60 = vsel %vm881_vm8, %v5314_v29, %v5286_v44 }
 0x45b   :  { %v1489_v15 = vadd.f32 %v1484_v39, %v1466_v26  ;;  %v1490_v55 = vadd.f32 %v1485_v54, %v1467_v20  ;;  %v1732_v30 = vadd.f32 %v1727_v40, %v1711_v52  ;;  %v1733_v33 = vadd.f32 %v1728_v11, %v1712_v12 }
 0x45c   :  { %v1750_v9 = vsel %vm840_vm7, %v5317_v10, %v5316_v23  ;;  %v1751_v14 = vsel %vm840_vm7, %v5316_v23, %v5288_v36  ;;  %v1771_v53 = vsel %vm840_vm7, %v4309_v4, %v1768_v17  ;;  %v1772_v44 = vsel %vm840_vm7, %v1768_v17, %v4248_v21 }
 0x45d   :  { %v1510_v61 = vadd.f32 %v1505_v7, %v1489_v15  ;;  %v1511_v34 = vadd.f32 %v1506_v60, %v1490_v55  ;;  %v1755_v57 = vadd.f32 %v1750_v9, %v1732_v30  ;;  %v1756_v41 = vadd.f32 %v1751_v14, %v1733_v33  ;;  %v5319_v60 = vld [vmem:[#allocation43_spill] sm:$0xff] }
 0x45e   :  { %v1850_v42 = vmul.f32 %v1848_v22, %v3730_v5  ;;  %v1841_v3 = vstv %s2943_s12  ;;  %v1851_v15 = vmul.f32 %v1848_v22, %v5319_v60  ;;  %v5320_v55 = vld [vmem:[#allocation23_spill] sm:$0xff]  ;;  %s2978_s12 = sld [smem:[#allocation6 + $0x4c]] }
 0x45f   :  { %1218 = vrot.lane.b32.xlu2 %v1200_v18, %s3135_s7  ;;  %1220 = vrot.lane.b32.xlu1 %v1201_v49, %s3135_s7  ;;  %v1776_v36 = vadd.f32 %v1771_v53, %v1755_v57  ;;  %v1777_v8 = vadd.f32 %v1772_v44, %v1756_v41  ;;  %v1843_v46 = vmul.f32 %v1841_v3, %v3510_v28  ;;  %s2969_s7 = sld [smem:[#allocation6 + $0x2f]] }
 0x460   :  { %v4455_v50 = vpop.permute.xlu0 %1889  ;;  %v1844_v30 = vmul.f32 %v1841_v3, %v5320_v55 }
 0x461   :  { %v4457_v35 = vpop.permute.xlu2 %1885  ;;  %v1791_v56 = vpop.permute.xlu1 %1790  ;;  %v1853_v19 = vadd.f32 %v1850_v42, %v1843_v46 }
 0x462   :  { %v1794_v59 = vsel %vm881_vm8, %v5318_v6, %v1791_v56  ;;  %v1795_v58 = vsel %vm881_vm8, %v1791_v56, %v4301_v62 }
 0x463   :  { %v1799_v17 = vadd.f32 %v1794_v59, %v1776_v36  ;;  %v1800_v16 = vadd.f32 %v1795_v58, %v1777_v8  ;;  %v656_v8 = vstv %s2888_s2  ;;  %s2980_s2 = sld [smem:[#allocation6 + $0x53]] }
 0x467   :  { %1528 = vrot.lane.b32.xlu2 %v1510_v61, %s3136_s0  ;;  %1530 = vrot.lane.b32.xlu1 %v1511_v34, %s3136_s0  ;;  %v1854_v61 = vadd.f32 %v1851_v15, %v1844_v30  ;;  %v5327_v15 = vld [vmem:[#allocation82_spill] sm:$0xff]  ;;  %s2977_s0 = sld [smem:[#allocation6 + $0x1b]] }
 0x468   :  { %v1913_v32 = vpop.permute.xlu0 %1912 }
 0x469   :  { %v1812_v45 = vpop.permute.xlu1 %1811  ;;  %v4491_v24 = vpop.permute.xlu2 %1908  ;;  %v1877_v23 = vadd.f32 %v4413_v38, %v1854_v61  ;;  %v5328_v61 = vld [vmem:[#allocation78_spill] sm:$0xff] }
 0x46a   :  { %v1815_v21 = vsel %vm881_vm8, %v4363_v1, %v1812_v45  ;;  %v1816_v4 = vsel %vm881_vm8, %v1812_v45, %v4358_v0 }
 0x46b   :  { %v1820_v18 = vadd.f32 %v1815_v21, %v1799_v17  ;;  %v1821_v49 = vadd.f32 %v1816_v4, %v1800_v16  ;;  %v1898_v10 = vadd.f32 %v4455_v50, %v1877_v23  ;;  %v5321_v4 = vld [vmem:[#allocation24_spill] sm:$0xff]  ;;  %v5322_v16 = vld [vmem:[#allocation53_spill] sm:$0xff] }
 0x46d   :  { %v1921_v14 = vadd.f32 %v1913_v32, %v1898_v10 }
 0x46f   :  { %1826 = vrot.lane.b32.xlu2 %v1820_v18, %s3137_s8  ;;  %1828 = vrot.lane.b32.xlu1 %v1821_v49, %s3137_s8  ;;  %v657_v18 = vmul.f32 %v656_v8, %v5322_v16  ;;  %v658_v49 = vmul.f32 %v656_v8, %v3730_v5  ;;  %s2957_s8 = sld [smem:[#allocation6 + $0x5]] }
 0x470   :  { %v1934_v62 = vpop.permute.xlu0 %1933 }
 0x471   :  { %v1867_v31 = vpop.permute.xlu1 %1866  ;;  %v4502_v63 = vpop.permute.xlu2 %1929  ;;  %v1942_v44 = vadd.f32 %v1934_v62, %v1921_v14 }
 0x472   :  { %v4497_v1 = vsel %vm676_vm3, %v4421_v27, %v1867_v31  ;;  %v1871_v0 = vsel %vm676_vm3, %v1867_v31, %v4413_v38  ;;  %v1849_v31 = vmul.f32 %v1848_v22, %v5322_v16 }
 0x473   :  { %v1876_v26 = vadd.f32 %v1871_v0, %v1853_v19 }
 0x478   :  { %v1957_v2 = vpop.permute.xlu0 %1956 }
 0x479   :  { %v4505_v20 = vpop.permute.xlu1 %1887  ;;  %v4510_v25 = vpop.permute.xlu2 %1952  ;;  %v1965_v41 = vadd.f32 %v1957_v2, %v1942_v44 }
 0x47a   :  { %v1892_v27 = vsel %vm676_vm3, %v4505_v20, %v4455_v50  ;;  %v1891_v10 = vsel %vm676_vm3, %v4457_v35, %v4505_v20  ;;  %v5330_v35 = vld [vmem:[#allocation28_spill] sm:$0xff] }
 0x47b   :  { %v1897_v43 = vadd.f32 %v1892_v27, %v1876_v26  ;;  %v5323_v27 = vld [vmem:[#allocation33_spill] sm:$0xff] }
 0x480   :  { %v4512_v51 = vpop.permute.xlu0 %1977 }
 0x481   :  { %v4514_v48 = vpop.permute.xlu1 %1910  ;;  %v4520_v12 = vpop.permute.xlu2 %1973  ;;  %v1986_v6 = vadd.f32 %v4512_v51, %v1965_v41 }
 0x482   :  { %v1915_v40 = vsel %vm717_vm4, %v4514_v48, %v1913_v32  ;;  %v651_v32 = vstv %s649_s1  ;;  %s2979_s1 = sld [smem:[#allocation6 + $0x22]] }
 0x483   :  { %v1920_v11 = vadd.f32 %v1915_v40, %v1897_v43  ;;  %v652_v17 = vmul.f32 %v651_v32, %v5321_v4  ;;  %v653_v46 = vmul.f32 %v651_v32, %v3510_v28  ;;  %v5324_v43 = vld [vmem:[#allocation26_spill] sm:$0xff] }
 0x484   :  { %v677_v40 = vsel %vm676_vm3, %v5324_v43, %v5323_v27 }
 0x485   :  { %v659_v22 = vadd.f32 %v657_v18, %v652_v17 }
 0x487   :  { %v681_v14 = vadd.f32 %v677_v40, %v659_v22 }
 0x488   :  { %v4518_v52 = vpop.permute.xlu0 %2000 }
 0x489   :  { %v4522_v56 = vpop.permute.xlu1 %1931  ;;  %v4532_v47 = vpop.permute.xlu2 %1996  ;;  %v2009_v59 = vadd.f32 %v4518_v52, %v1986_v6  ;;  %v1914_v6 = vsel %vm717_vm4, %v4491_v24, %v4514_v48  ;;  %v5332_v48 = vld [vmem:[#allocation92_spill] sm:$0xff] }
 0x48a   :  { %v1936_v13 = vsel %vm717_vm4, %v4522_v56, %v1934_v62  ;;  %v1842_v62 = vmul.f32 %v1841_v3, %v5321_v4 }
 0x48b   :  { %v1941_v37 = vadd.f32 %v1936_v13, %v1920_v11  ;;  %v5325_v11 = vld [vmem:[#allocation25_spill] sm:$0xff]  ;;  %v660_v13 = vadd.f32 %v658_v49, %v653_v46  ;;  %v5331_v49 = vld [vmem:[#allocation27_spill] sm:$0xff] }
 0x48c   :  { %v678_v3 = vsel %vm676_vm3, %v5323_v27, %v5325_v11 }
 0x48d   :  { %v682_v44 = vadd.f32 %v678_v3, %v660_v13 }
 0x490   :  { %v4526_v39 = vpop.permute.xlu0 %2021 }
 0x491   :  { %v4528_v54 = vpop.permute.xlu1 %1954  ;;  %v4544_v9 = vpop.permute.xlu2 %2017  ;;  %v2030_v50 = vadd.f32 %v4526_v39, %v2009_v59  ;;  %v4593_v59 = vstv %s2959_s16  ;;  %s2970_s16 = sld [smem:[#allocation6 + $0x60]] }
 0x492   :  { %v1959_v29 = vsel %vm758_vm5, %v4528_v54, %v1957_v2  ;;  %v2170_v18 = vmul.f32 %v4593_v59, %v5320_v55 }
 0x493   :  { %v4534_v7 = vadd.f32 %v1959_v29, %v1941_v37  ;;  %v1852_v37 = vadd.f32 %v1849_v31, %v1842_v62  ;;  %v5326_v29 = vld [vmem:[#allocation89_spill] sm:$0xff] }
 0x494   :  { %v696_v30 = vsel %vm676_vm3, %v5327_v15, %v5326_v29  ;;  %v697_v23 = vsel %vm676_vm3, %v5326_v29, %v5328_v61  ;;  %v5333_v62 = vld [vmem:[#allocation85_spill] sm:$0xff]  ;;  %v5335_v29 = vld [vmem:[#allocation39_spill] sm:$0xff] }
 0x495   :  { %v1875_v41 = vadd.f32 %v4497_v1, %v1852_v37  ;;  %v701_v32 = vadd.f32 %v697_v23, %v682_v44  ;;  %v737_v31 = vsel %vm717_vm4, %v5333_v62, %v5332_v48  ;;  %v5337_v15 = vld [vmem:[#allocation29_spill] sm:$0xff]  ;;  %v5340_v44 = vld [vmem:[#allocation84_spill] sm:$0xff] }
 0x496   :  { %v5344_v62 = vld [vmem:[#allocation97_spill] sm:$0xff] }
 0x497   :  { %v1896_v8 = vadd.f32 %v1891_v10, %v1875_v41  ;;  %v5338_v10 = vld [vmem:[#allocation95_spill] sm:$0xff] }
 0x498   :  { %v4538_v33 = vpop.permute.xlu0 %2044 }
 0x499   :  { %v4540_v34 = vpop.permute.xlu1 %1975  ;;  %v4552_v58 = vpop.permute.xlu2 %2040  ;;  %v2053_v45 = vadd.f32 %v4538_v33, %v2030_v50  ;;  %v700_v50 = vadd.f32 %v696_v30, %v681_v14  ;;  %v1919_v17 = vadd.f32 %v1914_v6, %v1896_v8  ;;  %v760_v30 = vsel %vm758_vm5, %v5335_v29, %v5337_v15 }
 0x49a   :  { %v1979_v40 = vsel %vm758_vm5, %v4520_v12, %v4540_v34  ;;  %v1980_v11 = vsel %vm758_vm5, %v4540_v34, %v4512_v51  ;;  %v5336_v51 = vld [vmem:[#allocation30_spill] sm:$0xff] }
 0x49b   :  { %v759_v34 = vsel %vm758_vm5, %v5336_v51, %v5335_v29  ;;  %v1985_v23 = vadd.f32 %v1980_v11, %v4534_v7 }
 0x4a0   :  { %v4546_v53 = vpop.permute.xlu0 %2065 }
 0x4a1   :  { %v4548_v57 = vpop.permute.xlu1 %1998  ;;  %v2074_v21 = vadd.f32 %v4546_v53, %v2053_v45  ;;  %v4570_v19 = vpop.permute.xlu2 %2061  ;;  %v1935_v45 = vsel %vm717_vm4, %v4502_v63, %v4522_v56  ;;  %v1958_v56 = vsel %vm758_vm5, %v4510_v25, %v4528_v54  ;;  %v4624_v25 = vstv %s2960_s18  ;;  %s3140_s18 = smov 122  }
 0x4a2   :  { %v1940_v27 = vadd.f32 %v1935_v45, %v1919_v17  ;;  %v2002_v54 = vsel %vm799_vm6, %v4532_v47, %v4548_v57  ;;  %v2003_v37 = vsel %vm799_vm6, %v4548_v57, %v4518_v52  ;;  %v2191_v12 = vmul.f32 %v4624_v25, %v5319_v60  ;;  %v5339_v47 = vld [vmem:[#allocation88_spill] sm:$0xff] }
 0x4a3   :  { %v778_v14 = vsel %vm758_vm5, %v5339_v47, %v5338_v10  ;;  %v779_v52 = vsel %vm758_vm5, %v5338_v10, %v5340_v44  ;;  %v5349_v47 = vld [vmem:[#allocation34_spill] sm:$0xff] }
 0x4a4   :  { %v1963_v13 = vadd.f32 %v1958_v56, %v1940_v27  ;;  %v5350_v44 = vld [vmem:[#allocation98_spill] sm:$0xff] }
 0x4a6   :  { %v1984_v61 = vadd.f32 %v1979_v40, %v1963_v13 }
 0x4a8   :  { %v4554_v38 = vpop.permute.xlu0 %2088  ;;  %v2007_v7 = vadd.f32 %v2002_v54, %v1984_v61  ;;  %v5347_v61 = vld [vmem:[#allocation41_spill] sm:$0xff] }
 0x4a9   :  { %v4557_v36 = vpop.permute.xlu1 %2019  ;;  %v2097_v0 = vadd.f32 %v4554_v38, %v2074_v21  ;;  %v5329_v21 = vld [vmem:[#allocation36_spill] sm:$0xff]  ;;  %v2085_v43 = vpop.permute.xlu2 %2084 }
 0x4aa   :  { %v718_v20 = vsel %vm717_vm4, %v5330_v35, %v5329_v21  ;;  %v719_v24 = vsel %vm717_vm4, %v5329_v21, %v5331_v49  ;;  %v2023_v57 = vsel %vm799_vm6, %v4544_v9, %v4557_v36  ;;  %v2024_v41 = vsel %vm799_vm6, %v4557_v36, %v4526_v39  ;;  %v5341_v39 = vld [vmem:[#allocation40_spill] sm:$0xff] }
 0x4ab   :  { %v722_v46 = vadd.f32 %v718_v20, %v700_v50  ;;  %v622_v35 = vlaneseq  ;;  %v2028_v9 = vadd.f32 %v2023_v57, %v2007_v7  ;;  %v5342_v36 = vld [vmem:[#allocation32_spill] sm:$0xff] }
 0x4ac   :  { %v800_v49 = vsel %vm799_vm6, %v5342_v36, %v5341_v39  ;;  %v5354_v36 = vld [vmem:[#allocation38_spill] sm:$0xff] }
 0x4ad   :  { %v741_v3 = vadd.f32 %v737_v31, %v722_v46  ;;  %v5345_v31 = vld [vmem:[#allocation91_spill] sm:$0xff] }
 0x4af   :  { %v763_v6 = vadd.f32 %v759_v34, %v741_v3 }
 0x4b0   :  { %v4567_v42 = vpop.permute.xlu0 %2109 }
 0x4b1   :  { %v2043_v2 = vpop.permute.xlu1 %2042  ;;  %v2118_v26 = vadd.f32 %v4567_v42, %v2097_v0  ;;  %v5334_v0 = vld [vmem:[#allocation81_spill] sm:$0xff]  ;;  %v782_v20 = vadd.f32 %v778_v14, %v763_v6  ;;  %v842_v14 = vsel %vm840_vm7, %v5347_v61, %v5349_v47 }
 0x4b2   :  { %v738_v63 = vsel %vm717_vm4, %v5332_v48, %v5334_v0  ;;  %v2046_v45 = vsel %vm840_vm7, %v4552_v58, %v2043_v2  ;;  %v2047_v21 = vsel %vm840_vm7, %v2043_v2, %v4538_v33  ;;  %v4666_v48 = vstv %s4622_s19  ;;  %v5343_v33 = vld [vmem:[#allocation31_spill] sm:$0xff]  ;;  %s3141_s19 = smov [#allocation7]  }
 0x4b3   :  { %2138 = vrot.lane.b32.xlu0 %v2118_v26, %s3138_s17  ;;  %v723_v26 = vadd.f32 %v719_v24, %v701_v32  ;;  %v2008_v32 = vadd.f32 %v2003_v37, %v1985_v23  ;;  %v801_v2 = vsel %vm799_vm6, %v5341_v39, %v5343_v33  ;;  %v819_v0 = vsel %vm799_vm6, %v5345_v31, %v5344_v62  ;;  %v5348_v23 = vld [vmem:[#allocation35_spill] sm:$0xff]  ;;  %v5353_v39 = vld [vmem:[#allocation45_spill] sm:$0xff] }
 0x4b4   :  { %v2051_v56 = vadd.f32 %v2046_v45, %v2028_v9  ;;  %v804_v40 = vadd.f32 %v800_v49, %v782_v20  ;;  %v2214_v13 = vmul.f32 %v4666_v48, %v5320_v55  ;;  %v841_v10 = vsel %vm840_vm7, %v5348_v23, %v5347_v61  ;;  %v5356_v33 = vld [vmem:[#allocation99_spill] sm:$0xff]  ;;  %v5358_v31 = vld [vmem:[#allocation93_spill] sm:$0xff] }
 0x4b5   :  { %v742_v22 = vadd.f32 %v738_v63, %v723_v26  ;;  %v2106_v63 = vpop.permute.xlu2 %2105  ;;  %v5346_v26 = vld [vmem:[#allocation87_spill] sm:$0xff]  ;;  %v4706_v20 = vstv %s2962_s20  ;;  %v882_v49 = vsel %vm881_vm8, %v5354_v36, %v5353_v39  ;;  %s2864_s20 = sshll.u32 %s3141_s19, 4  ;;  %s2865_s20 = int_to_ptr.vmem [resolvable:$true] %s2864_s20 }
 0x4b6   :  { %v823_v54 = vadd.f32 %v819_v0, %v804_v40  ;;  %v902_v0 = vsel %vm881_vm8, %v5356_v33, %v5358_v31  ;;  %v2169_v40 = vmul.f32 %v4593_v59, %v3510_v28 }
 0x4b7   :  { %v764_v50 = vadd.f32 %v760_v30, %v742_v22 }
 0x4b8   :  { %v845_v6 = vadd.f32 %v841_v10, %v823_v54  ;;  %v1223_v7 = vpop.permute.xlu0 %1222  ;;  %v2255_v54 = vstv %s4704_s21 }
 0x4b9   :  { %v2064_v1 = vpop.permute.xlu1 %2063  ;;  %v783_v17 = vadd.f32 %v779_v52, %v764_v50  ;;  %v5351_v52 = vld [vmem:[#allocation94_spill] sm:$0xff] }
 0x4ba   :  { %v2067_v24 = vsel %vm840_vm7, %v4570_v19, %v2064_v1  ;;  %v2068_v58 = vsel %vm840_vm7, %v2064_v1, %v4546_v53  ;;  %v820_v19 = vsel %vm799_vm6, %v5344_v62, %v5346_v26  ;;  %v623_v1 = vand.u32 127, %v622_v35 }
 0x4bb   :  { %2178 = vrot.lane.b32.xlu0 %v2170_v18, %s3129_s5  ;;  %v2029_v18 = vadd.f32 %v2024_v41, %v2008_v32  ;;  %v805_v11 = vadd.f32 %v801_v2, %v783_v17  ;;  %v2072_v3 = vadd.f32 %v2067_v24, %v2051_v56  ;;  %v860_v57 = vsel %vm840_vm7, %v5351_v52, %v5350_v44  ;;  %v5352_v41 = vld [vmem:[#allocation90_spill] sm:$0xff]  ;;  %v5355_v24 = vld [vmem:[#allocation37_spill] sm:$0xff]  ;;  %v5357_v2 = vld [vmem:[#allocation96_spill] sm:$0xff] }
 0x4bc   :  { %v4700_v32 = vand.u32 15, %v623_v1  ;;  %v864_v45 = vadd.f32 %v860_v57, %v845_v6  ;;  %v901_v62 = vsel %vm881_vm8, %v5357_v2, %v5356_v33  ;;  %v2212_v6 = vmul.f32 %v4666_v48, %v5321_v4 }
 0x4bd   :  { %v2052_v46 = vadd.f32 %v2047_v21, %v2029_v18  ;;  %v824_v37 = vadd.f32 %v820_v19, %v805_v11  ;;  %v1219_v35 = vpop.permute.xlu2 %1218  ;;  %v2235_v18 = vmul.f32 %v4706_v20, %v5319_v60  ;;  %v2477_v2 = vstv %s2973_s26 }
 0x4be   :  { %v1203_v17 = vadd.s32 4294967294, %v4700_v32  ;;  %v907_v56 = vadd.s32 4294967293, %v4700_v32  ;;  %v1513_v11 = vadd.s32 4294967295, %v4700_v32 }
 0x4bf   :  { %v2073_v22 = vadd.f32 %v2068_v58, %v2052_v46  ;;  %v846_v50 = vadd.f32 %v842_v14, %v824_v37  ;;  %v883_v58 = vsel %vm881_vm8, %v5353_v39, %v5355_v24  ;;  %v2189_v14 = vmul.f32 %v4624_v25, %v5322_v16 }
 0x4c0   :  { %vm1205_vm10 = vcmp.ge.s32.totalorder %v1203_v17, 0  ;;  %vm909_vm12 = vcmp.ge.s32.totalorder %v907_v56, 0  ;;  %vm1515_vm15 = vcmp.ge.s32.totalorder %v1513_v11, 0  ;;  %v2256_v17 = vmul.f32 %v2255_v54, %v5321_v4 }
 0x4c1   :  { %v2087_v8 = vpop.permute.xlu1 %2086  ;;  %v4800_v11 = vstv %s2976_s4 }
 0x4c2   :  { %v2090_v27 = vsel %vm881_vm8, %v2085_v43, %v2087_v8  ;;  %v2091_v53 = vsel %vm881_vm8, %v2087_v8, %v4554_v38  ;;  %v624_v38 = vadd.s32 128, %v623_v1  ;;  %v2168_v1 = vmul.f32 %v4593_v59, %v5321_v4 }
 0x4c3   :  { %2199 = vrot.lane.b32.xlu0 %v2191_v12, %s3129_s5  ;;  %v2095_v12 = vadd.f32 %v2090_v27, %v2072_v3  ;;  %v2096_v29 = vadd.f32 %v2091_v53, %v2073_v22  ;;  %v886_v27 = vadd.f32 %v882_v49, %v864_v45  ;;  %v2233_v45 = vmul.f32 %v4706_v20, %v5322_v16 }
 0x4c4   :  { %v4702_v8 = vand.u32 15, %v624_v38  ;;  %v2258_v38 = vmul.f32 %v2255_v54, %v5320_v55  ;;  %v2364_v49 = vstv %s2968_s25 }
 0x4c5   :  { %v905_v22 = vadd.f32 %v901_v62, %v886_v27  ;;  %v1529_v59 = vpop.permute.xlu2 %1528  ;;  %v2367_v24 = vmul.f32 %v2364_v49, %v5319_v60  ;;  %v2478_v62 = vmul.f32 %v2477_v2, %v5321_v4 }
 0x4c6   :  { %v1204_v9 = vadd.s32 4294967294, %v4702_v8  ;;  %v908_v46 = vadd.s32 4294967293, %v4702_v8  ;;  %v1514_v3 = vadd.s32 4294967295, %v4702_v8 }
 0x4c8   :  { %vm1206_vm11 = vcmp.ge.s32.totalorder %v1204_v9, 0  ;;  %vm910_vm13 = vcmp.ge.s32.totalorder %v908_v46, 0  ;;  %vm1516_vm0 = vcmp.ge.s32.totalorder %v1514_v3, 0  ;;  %v2257_v9 = vmul.f32 %v2255_v54, %v3510_v28 }
 0x4c9   :  { %v2108_v51 = vpop.permute.xlu1 %2107 }
 0x4ca   :  { %v2111_v34 = vsel %vm881_vm8, %v2106_v63, %v2108_v51  ;;  %v2112_v43 = vsel %vm881_vm8, %v2108_v51, %v4567_v42  ;;  %v861_v42 = vsel %vm840_vm7, %v5350_v44, %v5352_v41  ;;  %v919_v51 = vsel %vm909_vm12, %v905_v22, 0.0 }
 0x4cb   :  { %v2116_v15 = vadd.f32 %v2111_v34, %v2095_v12  ;;  %v2117_v30 = vadd.f32 %v2112_v43, %v2096_v29  ;;  %2222 = vrot.lane.b32.xlu0 %v2214_v13, %s3130_s9  ;;  %v865_v21 = vadd.f32 %v861_v42, %v846_v50  ;;  %v1533_v29 = vpop.permute.xlu0 %1532  ;;  %v2190_v44 = vmul.f32 %v4624_v25, %v3730_v5 }
 0x4cc   :  { %v2276_v41 = vstv %s2964_s3  ;;  %v2213_v25 = vmul.f32 %v4666_v48, %v3510_v28  ;;  %v2299_v50 = vstv %s2965_s22  ;;  %v2320_v48 = vstv %s2966_s23  ;;  %s2866_s22 = sshll.u32 %s5063_s6, 4  ;;  %s2867_s22 = int_to_ptr.hbm [resolvable:$true] %s2866_s22 }
 0x4cd   :  { %2134 = vrot.lane.b32.xlu2 %v2116_v15, %s3138_s17  ;;  %2136 = vrot.lane.b32.xlu1 %v2117_v30, %s3138_s17  ;;  %v887_v53 = vadd.f32 %v883_v58, %v865_v21  ;;  %v2279_v42 = vmul.f32 %v2276_v41, %v5319_v60  ;;  %v2234_v21 = vmul.f32 %v4706_v20, %v3730_v5  ;;  %v1827_v3 = vpop.permute.xlu2 %1826  ;;  %s2984_s17 = sld [smem:[#allocation6 + $0x61]] }
 0x4ce   :  { %v2277_v39 = vmul.f32 %v2276_v41, %v5322_v16  ;;  %v2278_v36 = vmul.f32 %v2276_v41, %v3730_v5  ;;  %v2300_v58 = vmul.f32 %v2299_v50, %v5321_v4  ;;  %v2301_v33 = vmul.f32 %v2299_v50, %v3510_v28 }
 0x4cf   :  { %v906_v13 = vadd.f32 %v902_v0, %v887_v53  ;;  %v2321_v31 = vmul.f32 %v2320_v48, %v5322_v16  ;;  %v2322_v0 = vmul.f32 %v2320_v48, %v3730_v5  ;;  %v2365_v53 = vmul.f32 %v2364_v49, %v5322_v16 }
 0x4d0   :  { %v2543_v22 = vmul.f32 %v4800_v11, %v5322_v16 }
 0x4d1   :  { %v1221_v63 = vpop.permute.xlu1 %1220  ;;  %v920_v34 = vsel %vm910_vm13, %v906_v13, 0.0  ;;  %v4804_v13 = vstv %s2969_s7 }
 0x4d2   :  { %v1225_v26 = vsel %vm1224_vm9, %v1219_v35, %v1221_v63  ;;  %v1226_v19 = vsel %vm1224_vm9, %v1221_v63, %v1223_v7  ;;  %v2302_v7 = vmul.f32 %v2299_v50, %v5320_v55  ;;  %v2323_v35 = vmul.f32 %v2320_v48, %v5319_v60 }
 0x4d3   :  { %2243 = vrot.lane.b32.xlu0 %v2235_v18, %s3130_s9  ;;  %v1229_v37 = vsel %vm1205_vm10, %v1225_v26, 0.0  ;;  %v1230_v12 = vsel %vm1206_vm11, %v1226_v19, 0.0  ;;  %v2343_v18 = vstv %s2967_s24  ;;  %v2498_v63 = vstv %s2974_s27 }
 0x4d4   :  { %v1231_v15 = vadd.f32 %v1229_v37, %v919_v51  ;;  %v1232_v30 = vadd.f32 %v1230_v12, %v920_v34  ;;  %v2346_v20 = vmul.f32 %v2343_v18, %v5320_v55  ;;  %v2499_v56 = vmul.f32 %v2498_v63, %v5322_v16 }
 0x4d5   :  { %2174 = vrot.lane.b32.xlu2 %v2168_v1, %s3129_s5  ;;  %2176 = vrot.lane.b32.xlu1 %v2169_v40, %s3129_s5  ;;  %v2344_v46 = vmul.f32 %v2343_v18, %v5321_v4  ;;  %v2345_v26 = vmul.f32 %v2343_v18, %v3510_v28  ;;  %v2521_v19 = vstv %s2975_s28  ;;  %v2366_v1 = vmul.f32 %v2364_v49, %v3730_v5  ;;  %v1831_v40 = vpop.permute.xlu0 %1830 }
 0x4d6   :  { %v2522_v27 = vmul.f32 %v2521_v19, %v5321_v4  ;;  %v2388_v54 = vmul.f32 %v4804_v13, %v5321_v4  ;;  %v2389_v37 = vmul.f32 %v4804_v13, %v3510_v28  ;;  %v2479_v34 = vmul.f32 %v2477_v2, %v3510_v28 }
 0x4d7   :  { %v2500_v41 = vmul.f32 %v2498_v63, %v3730_v5  ;;  %v2524_v18 = vmul.f32 %v2521_v19, %v5320_v55 }
 0x4d9   :  { %v1531_v43 = vpop.permute.xlu1 %1530 }
 0x4da   :  { %v1535_v61 = vsel %vm1534_vm14, %v1529_v59, %v1531_v43  ;;  %v1536_v23 = vsel %vm1534_vm14, %v1531_v43, %v1533_v29  ;;  %v4813_v59 = vstv %s2977_s0  ;;  %v2480_v43 = vmul.f32 %v2477_v2, %v5320_v55 }
 0x4db   :  { %v1539_v10 = vsel %vm1515_vm15, %v1535_v61, 0.0  ;;  %v1540_v47 = vsel %vm1516_vm0, %v1536_v23, 0.0  ;;  %2266 = vrot.lane.b32.xlu0 %v2258_v38, %s3131_s11  ;;  %v2566_v51 = vmul.f32 %v4813_v59, %v5321_v4  ;;  %v4822_v38 = vstv %s2957_s8 }
 0x4dc   :  { %v4742_v52 = vadd.f32 %v1539_v10, %v1231_v15  ;;  %v4744_v57 = vadd.f32 %v1540_v47, %v1232_v30  ;;  %v4824_v15 = vstv %s2958_s10  ;;  %v4828_v23 = vstv %s2978_s12 }
 0x4dd   :  { %2195 = vrot.lane.b32.xlu2 %v2189_v14, %s3129_s5  ;;  %2197 = vrot.lane.b32.xlu1 %v2190_v44, %s3129_s5  ;;  %v2161_v61 = vmul.f32 %v4824_v15, %v5319_v60  ;;  %v2154_v47 = vmul.f32 %v4822_v38, %v5320_v55  ;;  %v2587_v14 = vmul.f32 %v4828_v23, %v5322_v16 }
 0x4df   :  { %v2164_v44 = vadd.f32 %v2161_v61, %v2154_v47 }
 0x4e3   :  { %2287 = vrot.lane.b32.xlu0 %v2279_v42, %s3131_s11  ;;  %v2501_v42 = vmul.f32 %v2498_v63, %v5319_v60 }
 0x4e5   :  { %2218 = vrot.lane.b32.xlu2 %v2212_v6, %s3130_s9  ;;  %2220 = vrot.lane.b32.xlu1 %v2213_v25, %s3130_s9 }
 0x4eb   :  { %2310 = vrot.lane.b32.xlu0 %v2302_v7, %s3132_s13  ;;  %v1829_v7 = vpop.permute.xlu1 %1828 }
 0x4ed   :  { %2239 = vrot.lane.b32.xlu2 %v2233_v45, %s3130_s9  ;;  %2241 = vrot.lane.b32.xlu1 %v2234_v21, %s3130_s9  ;;  %v4842_v21 = vstv %s2979_s1 }
 0x4ee   :  { %v2610_v48 = vmul.f32 %v4842_v21, %v5321_v4 }
 0x4f3   :  { %2331 = vrot.lane.b32.xlu0 %v2323_v35, %s3132_s13  ;;  %v2119_v35 = vadd.s32 1, %v4700_v32 }
 0x4f5   :  { %2262 = vrot.lane.b32.xlu2 %v2256_v17, %s3131_s11  ;;  %2264 = vrot.lane.b32.xlu1 %v2257_v9, %s3131_s11  ;;  %v2120_v17 = vadd.s32 1, %v4702_v8  ;;  %v2523_v9 = vmul.f32 %v2521_v19, %v3510_v28  ;;  %vm2123_vm9 = vcmp.lt.s32.totalorder %v2119_v35, 16 }
 0x4f7   :  { %vm2124_vm10 = vcmp.lt.s32.totalorder %v2120_v17, 16 }
 0x4fb   :  { %2354 = vrot.lane.b32.xlu0 %v2346_v20, %s3133_s14  ;;  %v1833_v20 = vsel %vm1832_vm1, %v1827_v3, %v1829_v7 }
 0x4fc   :  { %v1837_v2 = vadd.f32 %v1833_v20, %v4742_v52  ;;  %v2545_v52 = vmul.f32 %v4800_v11, %v5319_v60 }
 0x4fd   :  { %2283 = vrot.lane.b32.xlu2 %v2277_v39, %s3131_s11  ;;  %2285 = vrot.lane.b32.xlu1 %v2278_v36, %s3131_s11  ;;  %v1834_v39 = vsel %vm1832_vm1, %v1829_v7, %v1831_v40  ;;  %v2588_v7 = vmul.f32 %v4828_v23, %v3730_v5 }
 0x503   :  { %2375 = vrot.lane.b32.xlu0 %v2367_v24, %s3133_s14  ;;  %v4856_v24 = vstv %s2980_s2 }
 0x505   :  { %2306 = vrot.lane.b32.xlu2 %v2300_v58, %s3132_s13  ;;  %2308 = vrot.lane.b32.xlu1 %v2301_v33, %s3132_s13 }
 0x50b   :  { %2484 = vrot.lane.b32.xlu0 %v2478_v62, %s3129_s5  ;;  %v1838_v62 = vadd.f32 %v1834_v39, %v4744_v57 }
 0x50d   :  { %2327 = vrot.lane.b32.xlu2 %v2321_v31, %s3132_s13  ;;  %2329 = vrot.lane.b32.xlu1 %v2322_v0, %s3132_s13 }
 0x513   :  { %2505 = vrot.lane.b32.xlu0 %v2499_v56, %s3129_s5 }
 0x515   :  { %2350 = vrot.lane.b32.xlu2 %v2344_v46, %s3133_s14  ;;  %2352 = vrot.lane.b32.xlu1 %v2345_v26, %s3133_s14  ;;  %v2631_v46 = vmul.f32 %v4856_v24, %v5322_v16 }
 0x51b   :  { %2528 = vrot.lane.b32.xlu0 %v2522_v27, %s3130_s9  ;;  %v2544_v27 = vmul.f32 %v4800_v11, %v3730_v5  ;;  %v2159_v11 = vmul.f32 %v4824_v15, %v5322_v16 }
 0x51d   :  { %2371 = vrot.lane.b32.xlu2 %v2365_v53, %s3133_s14  ;;  %2373 = vrot.lane.b32.xlu1 %v2366_v1, %s3133_s14 }
 0x523   :  { %2549 = vrot.lane.b32.xlu0 %v2543_v22, %s3130_s9 }
 0x525   :  { %2394 = vrot.lane.b32.xlu2 %v2388_v54, %s3134_s15  ;;  %2396 = vrot.lane.b32.xlu1 %v2389_v37, %s3134_s15  ;;  %v2139_v12 = vpop.permute.xlu0 %2138  ;;  %v2152_v37 = vmul.f32 %v4822_v38, %v5321_v4 }
 0x527   :  { %v2135_v29 = vpop.permute.xlu2 %2134 }
 0x52b   :  { %2572 = vrot.lane.b32.xlu0 %v2566_v51, %s3131_s11  ;;  %v2153_v51 = vmul.f32 %v4822_v38, %v3510_v28 }
 0x52d   :  { %2486 = vrot.lane.b32.xlu2 %v2479_v34, %s3129_s5  ;;  %2488 = vrot.lane.b32.xlu1 %v2480_v43, %s3129_s5  ;;  %v2179_v30 = vpop.permute.xlu0 %2178  ;;  %v2567_v34 = vmul.f32 %v4813_v59, %v3510_v28  ;;  %v2568_v43 = vmul.f32 %v4813_v59, %v5320_v55 }
 0x52e   :  { %v2187_v6 = vadd.f32 %v2179_v30, %v2164_v44 }
 0x52f   :  { %v2175_v10 = vpop.permute.xlu2 %2174 }
 0x533   :  { %2593 = vrot.lane.b32.xlu0 %v2587_v14, %s3131_s11 }
 0x535   :  { %2507 = vrot.lane.b32.xlu2 %v2500_v41, %s3129_s5  ;;  %2509 = vrot.lane.b32.xlu1 %v2501_v42, %s3129_s5  ;;  %v4839_v25 = vpop.permute.xlu0 %2199  ;;  %s2981_s5 = sld [smem:[#allocation6 + $0x29]] }
 0x536   :  { %v2208_v50 = vadd.f32 %v4839_v25, %v2187_v6 }
 0x537   :  { %v2196_v45 = vpop.permute.xlu2 %2195 }
 0x53b   :  { %2616 = vrot.lane.b32.xlu0 %v2610_v48, %s3132_s13  ;;  %v4875_v54 = vstv %s2981_s5  ;;  %v2589_v48 = vmul.f32 %v4828_v23, %v5319_v60  ;;  %v2611_v23 = vmul.f32 %v4842_v21, %v3510_v28 }
 0x53d   :  { %2530 = vrot.lane.b32.xlu2 %v2523_v9, %s3130_s9  ;;  %2532 = vrot.lane.b32.xlu1 %v2524_v18, %s3130_s9  ;;  %v4853_v36 = vpop.permute.xlu0 %2222 }
 0x53e   :  { %v2231_v49 = vadd.f32 %v4853_v36, %v2208_v50  ;;  %v2390_v50 = vmul.f32 %v4804_v13, %v5320_v55 }
 0x53f   :  { %v2219_v58 = vpop.permute.xlu2 %2218  ;;  %v2137_v33 = vpop.permute.xlu1 %2136 }
 0x540   :  { %v2141_v31 = vsel %vm2140_vm2, %v2135_v29, %v2137_v33  ;;  %v2142_v0 = vsel %vm2140_vm2, %v2137_v33, %v2139_v12  ;;  %v2160_v12 = vmul.f32 %v4824_v15, %v3730_v5  ;;  %v2654_v29 = vmul.f32 %v4875_v54, %v5321_v4 }
 0x541   :  { %v2145_v63 = vsel %vm2123_vm9, %v2141_v31, 0.0  ;;  %v2146_v56 = vsel %vm2124_vm10, %v2142_v0, 0.0  ;;  %v2612_v33 = vmul.f32 %v4842_v21, %v5320_v55  ;;  %v2632_v21 = vmul.f32 %v4856_v24, %v3730_v5 }
 0x542   :  { %v4862_v26 = vadd.f32 %v2145_v63, %v1837_v2  ;;  %v4864_v19 = vadd.f32 %v2146_v56, %v1838_v62  ;;  %v2163_v61 = vadd.f32 %v2160_v12, %v2153_v51  ;;  %v2408_v63 = vstv %s2970_s16 }
 0x543   :  { %2637 = vrot.lane.b32.xlu0 %v2631_v46, %s3132_s13  ;;  %v2656_v51 = vmul.f32 %v4875_v54, %v5320_v55 }
 0x545   :  { %2551 = vrot.lane.b32.xlu2 %v2544_v27, %s3130_s9  ;;  %2553 = vrot.lane.b32.xlu1 %v2545_v52, %s3130_s9  ;;  %v2244_v57 = vpop.permute.xlu0 %2243  ;;  %s2982_s9 = sld [smem:[#allocation6 + $0x5a]]  ;;  %v2411_v27 = vmul.f32 %v2408_v63, %v5319_v60  ;;  %v2633_v52 = vmul.f32 %v4856_v24, %v5319_v60  ;;  %v2655_v24 = vmul.f32 %v4875_v54, %v3510_v28 }
 0x546   :  { %v2252_v53 = vadd.f32 %v2244_v57, %v2231_v49 }
 0x547   :  { %v2240_v1 = vpop.permute.xlu2 %2239  ;;  %v2177_v40 = vpop.permute.xlu1 %2176 }
 0x548   :  { %v2180_v3 = vsel %vm676_vm3, %v2175_v10, %v2177_v40  ;;  %v2181_v22 = vsel %vm676_vm3, %v2177_v40, %v2179_v30  ;;  %v2162_v30 = vadd.f32 %v2159_v11, %v2152_v37 }
 0x549   :  { %v2186_v14 = vadd.f32 %v2181_v22, %v2163_v61 }
 0x54a   :  { %v2185_v47 = vadd.f32 %v2180_v3, %v2162_v30 }
 0x54b   :  { %2660 = vrot.lane.b32.xlu0 %v2654_v29, %s3133_s14  ;;  %v2674_v18 = vstv %s2982_s9 }
 0x54c   :  { %v2677_v49 = vmul.f32 %v2674_v18, %v5319_v60  ;;  %v2675_v54 = vmul.f32 %v2674_v18, %v5322_v16 }
 0x54d   :  { %2574 = vrot.lane.b32.xlu2 %v2567_v34, %s3131_s11  ;;  %2576 = vrot.lane.b32.xlu1 %v2568_v43, %s3131_s11  ;;  %v2267_v15 = vpop.permute.xlu0 %2266 }
 0x54e   :  { %v2275_v10 = vadd.f32 %v2267_v15, %v2252_v53 }
 0x54f   :  { %v2263_v44 = vpop.permute.xlu2 %2262  ;;  %v2198_v38 = vpop.permute.xlu1 %2197 }
 0x550   :  { %v2201_v41 = vsel %vm676_vm3, %v2196_v45, %v2198_v38  ;;  %v2202_v42 = vsel %vm676_vm3, %v2198_v38, %v4839_v25 }
 0x551   :  { %v2206_v6 = vadd.f32 %v2201_v41, %v2185_v47  ;;  %v2207_v59 = vadd.f32 %v2202_v42, %v2186_v14  ;;  %v2718_v47 = vstv %s2984_s17  ;;  %v2676_v41 = vmul.f32 %v2674_v18, %v3730_v5 }
 0x552   :  { %v2721_v38 = vmul.f32 %v2718_v47, %v5319_v60 }
 0x553   :  { %2398 = vrot.lane.b32.xlu0 %v2390_v50, %s3134_s15 }
 0x555   :  { %2595 = vrot.lane.b32.xlu2 %v2588_v7, %s3131_s11  ;;  %2597 = vrot.lane.b32.xlu1 %v2589_v48, %s3131_s11  ;;  %v2288_v45 = vpop.permute.xlu0 %2287  ;;  %s2983_s11 = sld [smem:[#allocation6 + $0x30]] }
 0x556   :  { %v2296_v25 = vadd.f32 %v2288_v45, %v2275_v10 }
 0x557   :  { %v2284_v35 = vpop.permute.xlu2 %2283  ;;  %v2221_v17 = vpop.permute.xlu1 %2220 }
 0x558   :  { %v2224_v9 = vsel %vm717_vm4, %v2219_v58, %v2221_v17  ;;  %v2225_v13 = vsel %vm717_vm4, %v2221_v17, %v4853_v36  ;;  %v2410_v17 = vmul.f32 %v2408_v63, %v3730_v5 }
 0x559   :  { %v2229_v20 = vadd.f32 %v2224_v9, %v2206_v6  ;;  %v2230_v39 = vadd.f32 %v2225_v13, %v2207_v59 }
 0x55b   :  { %2685 = vrot.lane.b32.xlu0 %v2677_v49, %s3133_s14 }
 0x55d   :  { %2618 = vrot.lane.b32.xlu2 %v2611_v23, %s3132_s13  ;;  %2620 = vrot.lane.b32.xlu1 %v2612_v33, %s3132_s13  ;;  %v2311_v58 = vpop.permute.xlu0 %2310 }
 0x55e   :  { %v2319_v36 = vadd.f32 %v2311_v58, %v2296_v25 }
 0x55f   :  { %v2307_v2 = vpop.permute.xlu2 %2306  ;;  %v2242_v62 = vpop.permute.xlu1 %2241 }
 0x560   :  { %v2245_v31 = vsel %vm717_vm4, %v2240_v1, %v2242_v62  ;;  %v2246_v0 = vsel %vm717_vm4, %v2242_v62, %v2244_v57  ;;  %v2697_v57 = vstv %s2983_s11 }
 0x561   :  { %v2250_v56 = vadd.f32 %v2245_v31, %v2229_v20  ;;  %v2251_v46 = vadd.f32 %v2246_v0, %v2230_v39  ;;  %v2700_v29 = vmul.f32 %v2697_v57, %v5320_v55  ;;  %v2698_v33 = vmul.f32 %v2697_v57, %v5321_v4 }
 0x563   :  { %2419 = vrot.lane.b32.xlu0 %v2411_v27, %s3134_s15 }
 0x565   :  { %2639 = vrot.lane.b32.xlu2 %v2632_v21, %s3132_s13  ;;  %2641 = vrot.lane.b32.xlu1 %v2633_v52, %s3132_s13  ;;  %v2332_v53 = vpop.permute.xlu0 %2331  ;;  %s2972_s13 = sld [smem:[#allocation6 + $0x37]] }
 0x566   :  { %v2340_v1 = vadd.f32 %v2332_v53, %v2319_v36 }
 0x567   :  { %v2328_v40 = vpop.permute.xlu2 %2327  ;;  %v2265_v3 = vpop.permute.xlu1 %2264 }
 0x568   :  { %v2268_v22 = vsel %vm758_vm5, %v2263_v44, %v2265_v3  ;;  %v2269_v37 = vsel %vm758_vm5, %v2265_v3, %v2267_v15 }
 0x569   :  { %v2273_v11 = vadd.f32 %v2268_v22, %v2250_v56  ;;  %v2274_v12 = vadd.f32 %v2269_v37, %v2251_v46 }
 0x56b   :  { %2708 = vrot.lane.b32.xlu0 %v2700_v29, %s3134_s15 }
 0x56d   :  { %2662 = vrot.lane.b32.xlu2 %v2655_v24, %s3133_s14  ;;  %2664 = vrot.lane.b32.xlu1 %v2656_v51, %s3133_s14  ;;  %v2355_v34 = vpop.permute.xlu0 %2354 }
 0x56e   :  { %v2363_v43 = vadd.f32 %v2355_v34, %v2340_v1  ;;  %v2719_v1 = vmul.f32 %v2718_v47, %v5322_v16 }
 0x56f   :  { %v2351_v30 = vpop.permute.xlu2 %2350  ;;  %v2286_v61 = vpop.permute.xlu1 %2285 }
 0x570   :  { %v2289_v15 = vsel %vm758_vm5, %v2284_v35, %v2286_v61  ;;  %v2290_v10 = vsel %vm758_vm5, %v2286_v61, %v2288_v45  ;;  %v2409_v35 = vmul.f32 %v2408_v63, %v5322_v16 }
 0x571   :  { %v2294_v14 = vadd.f32 %v2289_v15, %v2273_v11  ;;  %v2295_v44 = vadd.f32 %v2290_v10, %v2274_v12 }
 0x573   :  { %2729 = vrot.lane.b32.xlu0 %v2721_v38, %s3134_s15 }
 0x575   :  { %2681 = vrot.lane.b32.xlu2 %v2675_v54, %s3133_s14  ;;  %2683 = vrot.lane.b32.xlu1 %v2676_v41, %s3133_s14  ;;  %v2376_v42 = vpop.permute.xlu0 %2375  ;;  %s2971_s14 = sld [smem:[#allocation6 + $0x6]] }
 0x576   :  { %v4945_v6 = vadd.f32 %v2376_v42, %v2363_v43 }
 0x577   :  { %v2372_v59 = vpop.permute.xlu2 %2371  ;;  %v2309_v50 = vpop.permute.xlu1 %2308 }
 0x578   :  { %v2312_v7 = vsel %vm799_vm6, %v2307_v2, %v2309_v50  ;;  %v2313_v48 = vsel %vm799_vm6, %v2309_v50, %v2311_v58  ;;  %v2699_v58 = vmul.f32 %v2697_v57, %v3510_v28  ;;  %v4959_v2 = vstv %s2972_s13 }
 0x579   :  { %v2317_v45 = vadd.f32 %v2312_v7, %v2294_v14  ;;  %v2318_v25 = vadd.f32 %v2313_v48, %v2295_v44  ;;  %v2469_v21 = vmul.f32 %v4959_v2, %v5322_v16  ;;  %v2720_v57 = vmul.f32 %v2718_v47, %v3730_v5 }
 0x57b   :  { %v4961_v0 = vstv %s2971_s14 }
 0x57c   :  { %v2462_v27 = vmul.f32 %v4961_v0, %v5321_v4  ;;  %v2463_v50 = vmul.f32 %v4961_v0, %v3510_v28 }
 0x57d   :  { %2415 = vrot.lane.b32.xlu2 %v2409_v35, %s3134_s15  ;;  %2417 = vrot.lane.b32.xlu1 %v2410_v17, %s3134_s15  ;;  %v2485_v9 = vpop.permute.xlu0 %2484 }
 0x57f   :  { %v2395_v13 = vpop.permute.xlu2 %2394  ;;  %v2330_v18 = vpop.permute.xlu1 %2329 }
 0x580   :  { %v2333_v20 = vsel %vm799_vm6, %v2328_v40, %v2330_v18  ;;  %v2334_v39 = vsel %vm799_vm6, %v2330_v18, %v2332_v53  ;;  %v2472_v40 = vadd.f32 %v2469_v21, %v2462_v27 }
 0x581   :  { %v2338_v49 = vadd.f32 %v2333_v20, %v2317_v45  ;;  %v2339_v23 = vadd.f32 %v2334_v39, %v2318_v25 }
 0x585   :  { %2704 = vrot.lane.b32.xlu2 %v2698_v33, %s3134_s15  ;;  %2706 = vrot.lane.b32.xlu1 %v2699_v58, %s3134_s15  ;;  %v2506_v36 = vpop.permute.xlu0 %2505 }
 0x587   :  { %v2487_v62 = vpop.permute.xlu2 %2486  ;;  %v2353_v31 = vpop.permute.xlu1 %2352 }
 0x588   :  { %v2490_v63 = vsel %vm676_vm3, %v2485_v9, %v2487_v62  ;;  %v2356_v56 = vsel %vm840_vm7, %v2351_v30, %v2353_v31  ;;  %v2357_v46 = vsel %vm840_vm7, %v2353_v31, %v2355_v34 }
 0x589   :  { %v2361_v52 = vadd.f32 %v2356_v56, %v2338_v49  ;;  %v2362_v53 = vadd.f32 %v2357_v46, %v2339_v23  ;;  %v2495_v22 = vadd.f32 %v2490_v63, %v2472_v40  ;;  %v2464_v40 = vmul.f32 %v4961_v0, %v5320_v55 }
 0x58d   :  { %2725 = vrot.lane.b32.xlu2 %v2719_v1, %s3134_s15  ;;  %2727 = vrot.lane.b32.xlu1 %v2720_v57, %s3134_s15  ;;  %v2529_v3 = vpop.permute.xlu0 %2528  ;;  %v2471_v57 = vmul.f32 %v4959_v2, %v5319_v60  ;;  %s3139_s15 = smov 123  }
 0x58f   :  { %v2508_v37 = vpop.permute.xlu2 %2507  ;;  %v2374_v11 = vpop.permute.xlu1 %2373 }
 0x590   :  { %v2511_v4 = vsel %vm676_vm3, %v2506_v36, %v2508_v37  ;;  %v2377_v12 = vsel %vm840_vm7, %v2372_v59, %v2374_v11  ;;  %v2378_v29 = vsel %vm840_vm7, %v2374_v11, %v2376_v42  ;;  %v2470_v59 = vmul.f32 %v4959_v2, %v3730_v5 }
 0x591   :  { %v2516_v24 = vadd.f32 %v2511_v4, %v2495_v22  ;;  %v2382_v51 = vadd.f32 %v2377_v12, %v2361_v52  ;;  %v2383_v16 = vadd.f32 %v2378_v29, %v2362_v53  ;;  %v2474_v22 = vadd.f32 %v2471_v57, %v2464_v40 }
 0x592   :  { %v2473_v7 = vadd.f32 %v2470_v59, %v2463_v50 }
 0x595   :  { %v2550_v34 = vpop.permute.xlu0 %2549 }
 0x597   :  { %v4977_v43 = vpop.permute.xlu2 %2530  ;;  %v2397_v30 = vpop.permute.xlu1 %2396 }
 0x598   :  { %v2534_v61 = vsel %vm717_vm4, %v2529_v3, %v4977_v43  ;;  %v2400_v15 = vsel %vm881_vm8, %v2395_v13, %v2397_v30 }
 0x599   :  { %v2539_v10 = vadd.f32 %v2534_v61, %v2516_v24  ;;  %v4982_v47 = vadd.f32 %v2400_v15, %v2382_v51 }
 0x59d   :  { %v2573_v14 = vpop.permute.xlu0 %2572 }
 0x59f   :  { %v4984_v44 = vpop.permute.xlu2 %2551  ;;  %v2489_v38 = vpop.permute.xlu1 %2488 }
 0x5a0   :  { %v2555_v54 = vsel %vm717_vm4, %v2550_v34, %v4984_v44  ;;  %v2491_v41 = vsel %vm676_vm3, %v2487_v62, %v2489_v38  ;;  %v2497_v11 = vadd.f32 %v2489_v38, %v2474_v22 }
 0x5a1   :  { %v2560_v42 = vadd.f32 %v2555_v54, %v2539_v10  ;;  %v2496_v45 = vadd.f32 %v2491_v41, %v2473_v7 }
 0x5a5   :  { %v2594_v48 = vpop.permute.xlu0 %2593 }
 0x5a7   :  { %v2575_v25 = vpop.permute.xlu2 %2574  ;;  %v2510_v35 = vpop.permute.xlu1 %2509 }
 0x5a8   :  { %v2578_v17 = vsel %vm758_vm5, %v2573_v14, %v2575_v25  ;;  %v2512_v9 = vsel %vm676_vm3, %v2508_v37, %v2510_v35  ;;  %v2518_v4 = vadd.f32 %v2510_v35, %v2497_v11  ;;  %vm2450_vm3 = vcmask 1006592  }
 0x5a9   :  { %v2583_v13 = vadd.f32 %v2578_v17, %v2560_v42  ;;  %v2517_v18 = vadd.f32 %v2512_v9, %v2496_v45 }
 0x5ad   :  { %v2617_v20 = vpop.permute.xlu0 %2616 }
 0x5af   :  { %v2596_v39 = vpop.permute.xlu2 %2595  ;;  %v2533_v49 = vpop.permute.xlu1 %2532 }
 0x5b0   :  { %v2599_v23 = vsel %vm758_vm5, %v2594_v48, %v2596_v39  ;;  %v2541_v12 = vadd.f32 %v2533_v49, %v2518_v4  ;;  %v2535_v50 = vsel %vm717_vm4, %v4977_v43, %v2533_v49 }
 0x5b1   :  { %v2604_v5 = vadd.f32 %v2599_v23, %v2583_v13  ;;  %v2540_v48 = vadd.f32 %v2535_v50, %v2517_v18 }
 0x5b5   :  { %v2638_v33 = vpop.permute.xlu0 %2637 }
 0x5b7   :  { %v2619_v58 = vpop.permute.xlu2 %2618  ;;  %v2554_v28 = vpop.permute.xlu1 %2553 }
 0x5b8   :  { %v2622_v36 = vsel %vm799_vm6, %v2617_v20, %v2619_v58  ;;  %v2562_v51 = vadd.f32 %v2554_v28, %v2541_v12  ;;  %v2556_v7 = vsel %vm717_vm4, %v4984_v44, %v2554_v28 }
 0x5b9   :  { %v2627_v62 = vadd.f32 %v2622_v36, %v2604_v5  ;;  %v2561_v13 = vadd.f32 %v2556_v7, %v2540_v48 }
 0x5bd   :  { %v2661_v31 = vpop.permute.xlu0 %2660 }
 0x5bf   :  { %v2640_v63 = vpop.permute.xlu2 %2639  ;;  %v2577_v56 = vpop.permute.xlu1 %2576 }
 0x5c0   :  { %v2643_v46 = vsel %vm799_vm6, %v2638_v33, %v2640_v63  ;;  %v2585_v61 = vadd.f32 %v2577_v56, %v2562_v51  ;;  %v2579_v35 = vsel %vm758_vm5, %v2575_v25, %v2577_v56 }
 0x5c1   :  { %v4998_v27 = vadd.f32 %v2643_v46, %v2627_v62  ;;  %v2584_v33 = vadd.f32 %v2579_v35, %v2561_v13 }
 0x5c5   :  { %v2399_v21 = vpop.permute.xlu0 %2398 }
 0x5c6   :  { %v2401_v52 = vsel %vm881_vm8, %v2397_v30, %v2399_v21  ;;  %v2407_v29 = vadd.f32 %v2399_v21, %v4945_v6 }
 0x5c7   :  { %v2406_v53 = vadd.f32 %v2401_v52, %v2383_v16  ;;  %v2598_v1 = vpop.permute.xlu1 %2597  ;;  %v2663_v30 = vpop.permute.xlu2 %2662 }
 0x5c8   :  { %v2606_v60 = vadd.f32 %v2598_v1, %v2585_v61  ;;  %v2600_v5 = vsel %vm758_vm5, %v2596_v39, %v2598_v1  ;;  %v2666_v36 = vsel %vm840_vm7, %v2661_v31, %v2663_v30 }
 0x5c9   :  { %v2605_v44 = vadd.f32 %v2600_v5, %v2584_v33  ;;  %v2671_v46 = vadd.f32 %v2666_v36, %v4998_v27  ;;  %v2429_v27 = vadd.s32 2, %v4700_v32 }
 0x5cb   :  { %vm2433_vm4 = vcmp.lt.s32.totalorder %v2429_v27, 16  ;;  %v3049_v27 = vld [vmem:[#allocation2 + $0x40] sm:$0xff] }
 0x5cd   :  { %v2686_v3 = vpop.permute.xlu0 %2685 }
 0x5cf   :  { %v2621_v37 = vpop.permute.xlu1 %2620  ;;  %v2682_v14 = vpop.permute.xlu2 %2681 }
 0x5d0   :  { %v2629_v2 = vadd.f32 %v2621_v37, %v2606_v60  ;;  %v2623_v43 = vsel %vm799_vm6, %v2619_v58, %v2621_v37 }
 0x5d1   :  { %v2628_v25 = vadd.f32 %v2623_v43, %v2605_v44 }
 0x5d5   :  { %v2420_v24 = vpop.permute.xlu0 %2419 }
 0x5d6   :  { %v2428_v34 = vadd.f32 %v2420_v24, %v2407_v29 }
 0x5d7   :  { %v2642_v16 = vpop.permute.xlu1 %2641  ;;  %v2416_v59 = vpop.permute.xlu2 %2415 }
 0x5d8   :  { %2448 = vrot.lane.b32.xlu0 %v2428_v34, %s3139_s15  ;;  %v2650_v55 = vadd.f32 %v2642_v16, %v2629_v2  ;;  %v2644_v49 = vsel %vm799_vm6, %v2640_v63, %v2642_v16  ;;  %v2740_v16 = vadd.s32 3, %v4702_v8  ;;  %vm2760_vm6 = vcmask 998400  }
 0x5d9   :  { %v2649_v56 = vadd.f32 %v2644_v49, %v2628_v25 }
 0x5dd   :  { %v2709_v15 = vpop.permute.xlu0 %2708 }
 0x5df   :  { %v2665_v0 = vpop.permute.xlu1 %2664  ;;  %v2705_v18 = vpop.permute.xlu2 %2704 }
 0x5e0   :  { %v2673_v10 = vadd.f32 %v2665_v0, %v2650_v55  ;;  %v2667_v62 = vsel %vm840_vm7, %v2663_v30, %v2665_v0  ;;  %v2739_v30 = vadd.s32 3, %v4700_v32 }
 0x5e1   :  { %v2672_v21 = vadd.f32 %v2667_v62, %v2649_v56 }
 0x5e2   :  { %v2694_v38 = vadd.f32 %v2686_v3, %v2673_v10 }
 0x5e4   :  { %v2717_v54 = vadd.f32 %v2709_v15, %v2694_v38 }
 0x5e5   :  { %v2730_v41 = vpop.permute.xlu0 %2729 }
 0x5e6   :  { %v2738_v42 = vadd.f32 %v2730_v41, %v2717_v54 }
 0x5e7   :  { %v2684_v6 = vpop.permute.xlu1 %2683  ;;  %v2726_v1 = vpop.permute.xlu2 %2725 }
 0x5e8   :  { %2758 = vrot.lane.b32.xlu0 %v2738_v42, %s3140_s18  ;;  %v2688_v39 = vsel %vm840_vm7, %v2684_v6, %v2686_v3  ;;  %v2430_v3 = vadd.s32 2, %v4702_v8 }
 0x5e9   :  { %v2693_v63 = vadd.f32 %v2688_v39, %v2672_v21 }
 0x5ea   :  { %vm2434_vm5 = vcmp.lt.s32.totalorder %v2430_v3, 16  ;;  %v5365_v3 = vld [vmem:[#allocation20_spill] sm:$0xff] }
 0x5ef   :  { %v2418_v45 = vpop.permute.xlu1 %2417 }
 0x5f0   :  { %v2421_v17 = vsel %vm881_vm8, %v2416_v59, %v2418_v45  ;;  %v2422_v9 = vsel %vm881_vm8, %v2418_v45, %v2420_v24 }
 0x5f1   :  { %v2426_v20 = vadd.f32 %v2421_v17, %v4982_v47  ;;  %v2427_v23 = vadd.f32 %v2422_v9, %v2406_v53  ;;  %v2687_v47 = vsel %vm840_vm7, %v2682_v14, %v2684_v6  ;;  %vm2743_vm7 = vcmp.lt.s32.totalorder %v2739_v30, 16  ;;  %v5367_v30 = vld [vmem:[#allocation17_spill] sm:$0xff] }
 0x5f2   :  { %v2692_v53 = vadd.f32 %v2687_v47, %v2671_v46  ;;  %v5359_v46 = vld [vmem:[#allocation12_spill] sm:$0xff] }
 0x5f3   :  { %2444 = vrot.lane.b32.xlu2 %v2426_v20, %s3139_s15  ;;  %2446 = vrot.lane.b32.xlu1 %v2427_v23, %s3139_s15 }
 0x5f7   :  { %v2707_v28 = vpop.permute.xlu1 %2706 }
 0x5f8   :  { %v2710_v58 = vsel %vm881_vm8, %v2705_v18, %v2707_v28  ;;  %v2711_v52 = vsel %vm881_vm8, %v2707_v28, %v2709_v15 }
 0x5f9   :  { %v2715_v57 = vadd.f32 %v2710_v58, %v2692_v53  ;;  %v2716_v40 = vadd.f32 %v2711_v52, %v2693_v63  ;;  %v5360_v58 = vld [vmem:[#allocation11_spill] sm:$0xff] }
 0x5fa   :  { %v5361_v53 = vld [vmem:[#allocation15_spill] sm:$0xff] }
 0x5ff   :  { %v2728_v31 = vpop.permute.xlu1 %2727 }
 0x600   :  { %v2731_v22 = vsel %vm881_vm8, %v2726_v1, %v2728_v31  ;;  %v2732_v37 = vsel %vm881_vm8, %v2728_v31, %v2730_v41  ;;  %vm2744_vm8 = vcmp.lt.s32.totalorder %v2740_v16, 16  ;;  %v5362_v1 = vld [vmem:[#allocation18_spill] sm:$0xff] }
 0x601   :  { %v2736_v11 = vadd.f32 %v2731_v22, %v2715_v57  ;;  %v2737_v4 = vadd.f32 %v2732_v37, %v2716_v40  ;;  %v5363_v40 = vld [vmem:[#allocation13_spill] sm:$0xff]  ;;  %v5364_v37 = vld [vmem:[#allocation14_spill] sm:$0xff] }
 0x603   :  { %2754 = vrot.lane.b32.xlu2 %v2736_v11, %s3140_s18  ;;  %2756 = vrot.lane.b32.xlu1 %v2737_v4, %s3140_s18 }
 0x64a   :  { %v2449_v12 = vpop.permute.xlu0 %2448 }
 0x64d   :  { %v2445_v29 = vpop.permute.xlu2 %2444 }
 0x65a   :  { %v2759_v2 = vpop.permute.xlu0 %2758 }
 0x65d   :  { %v2755_v15 = vpop.permute.xlu2 %2754 }
 0x665   :  { %v2447_v24 = vpop.permute.xlu1 %2446 }
 0x666   :  { %v2451_v51 = vsel %vm2450_vm3, %v2445_v29, %v2447_v24  ;;  %v2452_v34 = vsel %vm2450_vm3, %v2447_v24, %v2449_v12  ;;  %v2833_v12 = vmul.f32 %v3049_v27, %v5365_v3  ;;  %v5366_v29 = vld [vmem:[#allocation16_spill] sm:$0xff] }
 0x667   :  { %v2455_v61 = vsel %vm2433_vm4, %v2451_v51, 0.0  ;;  %v2456_v60 = vsel %vm2434_vm5, %v2452_v34, 0.0  ;;  %v3050_v51 = vld [vmem:[#allocation2 + $0x48] sm:$0xff] }
 0x668   :  { %v2457_v0 = vadd.f32 %v2455_v61, %v4862_v26  ;;  %v2458_v10 = vadd.f32 %v2456_v60, %v4864_v19  ;;  %v2834_v34 = vmul.f32 %v3050_v51, %v5365_v3  ;;  %v3051_v61 = vld [vmem:[#allocation2 + $0x50] sm:$0xff]  ;;  %v5368_v60 = vld [vmem:[#allocation19_spill] sm:$0xff] }
 0x675   :  { %v2757_v55 = vpop.permute.xlu1 %2756 }
 0x676   :  { %v2761_v14 = vsel %vm2760_vm6, %v2755_v15, %v2757_v55  ;;  %v2762_v38 = vsel %vm2760_vm6, %v2757_v55, %v2759_v2  ;;  %v2835_v2 = vmul.f32 %v3051_v61, %v5368_v60  ;;  %v3052_v55 = vld [vmem:[#allocation2 + $0x58] sm:$0xff] }
 0x677   :  { %v2765_v54 = vsel %vm2743_vm7, %v2761_v14, 0.0  ;;  %v2766_v41 = vsel %vm2744_vm8, %v2762_v38, 0.0  ;;  %v3053_v14 = vld [vmem:[#allocation2 + $0x60] sm:$0xff]  ;;  %v5369_v38 = vld [vmem:[#allocation21_spill] sm:$0xff] }
 0x678   :  { %v2767_v42 = vadd.f32 %v2765_v54, %v2457_v0  ;;  %v2768_v32 = vadd.f32 %v2766_v41, %v2458_v10  ;;  %v2836_v0 = vmul.f32 %v3052_v55, %v5368_v60  ;;  %v2837_v54 = vmul.f32 %v3053_v14, %v5369_v38 }
 0x67a   :  { %v2985_v6 = vmul.f32 -1.442695, %v2767_v42  ;;  %v2986_v8 = vmul.f32 -1.442695, %v2768_v32  ;;  %v3054_v42 = vld [vmem:[#allocation2 + $0x68] sm:$0xff] }
 0x67b   :  { %v2838_v32 = vmul.f32 %v3054_v42, %v5369_v38 }
 0x67c   :  { %3041 = vpow2.f32 %v2985_v6 }
 0x67d   :  { %3043 = vpow2.f32 %v2986_v8  ;;  %v3055_v8 = vld [vmem:[#allocation2 + $0x70] sm:$0xff] }
 0x682   :  { %v3042_v59 = vpop.eup %3041 }
 0x683   :  { %v3044_v50 = vpop.eup %3043  ;;  %v2775_v7 = vadd.f32 1.0, %v3042_v59  ;;  %v5370_v59 = vld [vmem:[#allocation22_spill] sm:$0xff] }
 0x684   :  { %v2776_v48 = vadd.f32 1.0, %v3044_v50  ;;  %v2839_v50 = vmul.f32 %v3055_v8, %v5370_v59 }
 0x685   :  { %3045 = vrcp.f32 %v2775_v7  ;;  %v2788_v9 = vand.u32 2147483648, %v2775_v7  ;;  %v2786_v23 = vand.u32 2147483647, %v2775_v7  ;;  %vm2782_vm13 = vweird.f32 %v2775_v7 }
 0x686   :  { %3047 = vrcp.f32 %v2776_v48  ;;  %v2803_v5 = vand.u32 2147483648, %v2776_v48  ;;  %v2801_v43 = vand.u32 2147483647, %v2776_v48  ;;  %vm2797_vm15 = vweird.f32 %v2776_v48 }
 0x687   :  { %v2789_v18 = vor.u32 1.1754944e-38, %v2788_v9  ;;  %vm2787_vm0 = vcmp.eq.f32.partialorder %v2786_v23, 8.507059e+37 }
 0x688   :  { %v2804_v28 = vor.u32 1.1754944e-38, %v2803_v5  ;;  %vm2802_vm2 = vcmp.eq.f32.partialorder %v2801_v43, 8.507059e+37 }
 0x68b   :  { %v3046_v45 = vpop.eup %3045 }
 0x68c   :  { %v3048_v26 = vpop.eup %3047  ;;  %v2778_v35 = vmul.f32 %v3046_v45, %v2775_v7  ;;  %vm2783_vm11 = vweird.f32 %v3046_v45 }
 0x68d   :  { %v2793_v19 = vmul.f32 %v3048_v26, %v2776_v48  ;;  %vm2798_vm12 = vweird.f32 %v3048_v26  ;;  %vm2784_vm14 = vmor %vm2782_vm13, %vm2783_vm11  ;;  %v3056_v48 = vld [vmem:[#allocation2 + $0x78] sm:$0xff] }
 0x68e   :  { %v2779_v17 = vsub.f32 1.0, %v2778_v35  ;;  %vm2799_vm1 = vmor %vm2797_vm15, %vm2798_vm12 }
 0x68f   :  { %v2794_v13 = vsub.f32 1.0, %v2793_v19 }
 0x690   :  { %v2780_v20 = vmul.f32 %v3046_v45, %v2779_v17 }
 0x691   :  { %v2795_v33 = vmul.f32 %v3048_v26, %v2794_v13 }
 0x692   :  { %v2781_v44 = vadd.f32 %v3046_v45, %v2780_v20 }
 0x693   :  { %v2796_v49 = vadd.f32 %v3048_v26, %v2795_v33 }
 0x694   :  { %v2785_v25 = vsel %vm2784_vm14, %v3046_v45, %v2781_v44  ;;  %v2840_v45 = vmul.f32 %v3056_v48, %v5370_v59 }
 0x695   :  { %v2790_v36 = vsel %vm2787_vm0, %v2789_v18, %v2785_v25  ;;  %v2800_v62 = vsel %vm2799_vm1, %v3048_v26, %v2796_v49 }
 0x696   :  { %v2805_v56 = vsel %vm2802_vm2, %v2804_v28, %v2800_v62  ;;  %v2807_v47 = vperm.slane %v2790_v36, 0  ;;  %v2841_v22 = vperm.slane %v2790_v36, 1 }
 0x697   :  { %v2808_v39 = vperm.slane %v2805_v56, 0  ;;  %v2842_v4 = vperm.slane %v2805_v56, 1 }
 0x698   :  { %v2809_v21 = vmul.f32 %v2807_v47, %v5359_v46  ;;  %v2811_v52 = vmul.f32 %v2807_v47, %v5360_v58  ;;  %v2813_v31 = vmul.f32 %v2807_v47, %v5363_v40  ;;  %v2815_v24 = vmul.f32 %v2807_v47, %v5366_v29 }
 0x699   :  { %v2810_v63 = vmul.f32 %v2808_v39, %v5361_v53  ;;  %v2812_v57 = vmul.f32 %v2808_v39, %v5362_v1  ;;  %v2814_v11 = vmul.f32 %v2808_v39, %v5364_v37  ;;  %v2816_v16 = vmul.f32 %v2808_v39, %v5367_v30 }
 0x69a   :  { %2817 = vst [vmem:[#allocation7] sm:$0xff] %v2809_v21  ;;  %v2843_v15 = vmul.f32 %v2841_v22, %v2833_v12  ;;  %v2844_v10 = vmul.f32 %v2842_v4, %v2834_v34  ;;  %v2845_v41 = vmul.f32 %v2841_v22, %v2835_v2  ;;  %v2846_v6 = vmul.f32 %v2842_v4, %v2836_v0 }
 0x69b   :  { %2818 = vst [vmem:[#allocation7 + $0x8] sm:$0xff] %v2810_v63  ;;  %v2847_v7 = vmul.f32 %v2841_v22, %v2837_v54  ;;  %v2848_v26 = vmul.f32 %v2842_v4, %v2838_v32  ;;  %v2849_v35 = vmul.f32 %v2841_v22, %v2839_v50  ;;  %v2850_v19 = vmul.f32 %v2842_v4, %v2840_v45 }
 0x69c   :  { %2819 = vst [vmem:[#allocation7 + $0x10] sm:$0xff] %v2811_v52 }
 0x69d   :  { %2820 = vst [vmem:[#allocation7 + $0x18] sm:$0xff] %v2812_v57 }
 0x69e   :  { %2821 = vst [vmem:[#allocation7 + $0x20] sm:$0xff] %v2813_v31 }
 0x69f   :  { %2822 = vst [vmem:[#allocation7 + $0x28] sm:$0xff] %v2814_v11 }
 0x6a0   :  { %2823 = vst [vmem:[#allocation7 + $0x30] sm:$0xff] %v2815_v24 }
 0x6a1   :  { %2824 = vst [vmem:[#allocation7 + $0x38] sm:$0xff] %v2816_v16 }
 0x6a2   :  { %2852 = vst [vmem:[#allocation7 + $0x40] sm:$0xff] %v2843_v15 }
 0x6a3   :  { %2853 = vst [vmem:[#allocation7 + $0x48] sm:$0xff] %v2844_v10 }
 0x6a4   :  { %2854 = vst [vmem:[#allocation7 + $0x50] sm:$0xff] %v2845_v41 }
 0x6a5   :  { %2855 = vst [vmem:[#allocation7 + $0x58] sm:$0xff] %v2846_v6 }
 0x6a6   :  { %2856 = vst [vmem:[#allocation7 + $0x60] sm:$0xff] %v2847_v7 }
 0x6a7   :  { %2857 = vst [vmem:[#allocation7 + $0x68] sm:$0xff] %v2848_v26 }
 0x6a8   :  { %2858 = vst [vmem:[#allocation7 + $0x70] sm:$0xff] %v2849_v35 }
 0x6a9   :  { %2859 = vst [vmem:[#allocation7 + $0x78] sm:$0xff] %v2850_v19 }
 0x6aa   :  { %2872 = dma.vmem_to_hbm [thread:$0]  %s2865_s20, 2048, %s2867_s22, [#allocation4], %s3124_s29, %s3124_s29, %s3125_s30  }
 0x6ab   :  { %3121 = dma.done.wait [#allocation4], 2048  }
 0x6ac   :  { %3122 = vsyncadd [#allocation4], 4294965248 }
 0x6ad   :  { %2877 = vsyncpa [#allocation3], 1 }
 0x6ae   :  { %2878 = vsyncpa [#allocation4], 1 }
 0x6af   :  { %2879 = vsyncpa [#allocation5], 1 }

</bundles_post_ra>
